<compile_context>
chip_gen: v5e
topology: v5e:2x2
jax: 0.10.0
libtpu: 0.0.40
codegen_flags: <defaults>
</compile_context>

<pallas_src>
import functools
import math

import jax
import jax.numpy as jnp
from jax import lax
from jax.experimental import pallas as pl
from jax.experimental.pallas import tpu as pltpu

KSIZE = 5
PAD = (KSIZE - 1) // 2
LANE = 128


# ---------------------------------------------------------------------------
# Fused kernel: one (batch b, pipeline step t) grid point
# ---------------------------------------------------------------------------
def _conv_ffn_kernel(x_ref, w1_ref, b1_ref, wdw_ref, bdw_ref, w2_ref, b2_ref,
                     o_ref, hp_ref, *, num_row_tiles, approximate_gelu):
    """Lagged pipeline over row tiles (grid dim 1 has T+1 steps):

        step t < T : fc1 + GELU of x row-tile t  -> hidden scratch rows
        step t > 0 : 5x5 dwconv + GELU + residual + fc2 of row-tile t-1

    so the conv of tile t-1 always has its +PAD row halo (written this step)
    and its -PAD halo (written at step t-1, or the zeroed top halo rows).

    Refs:
      x_ref  : (1, TH, W, Cin)   bf16  current x row tile
      w1_ref : (Cin, Cp)         bf16
      b1_ref : (1, Cp)           f32
      wdw_ref: (K*K, Cp)         f32   depthwise taps, flattened (i*K + j, ch)
      bdw_ref: (1, Cp)           f32
      w2_ref : (Cp, Cout)        bf16
      b2_ref : (1, Cout)         f32
      o_ref  : (1, TH, W, Cout)        output row tile (tile t-1)
      hp_ref : (H+2*PAD, W, Cp)  f32   persistent per-image hidden scratch
    """
    TH, W, cin = x_ref.shape[1], x_ref.shape[2], x_ref.shape[3]
    Cp = w1_ref.shape[1]
    cout = o_ref.shape[3]
    H = hp_ref.shape[0] - 2 * PAD

    t = pl.program_id(1)
    gelu = functools.partial(jax.nn.gelu, approximate=approximate_gelu)

    @pl.when(t == 0)
    def _():
        # Zero the top/bottom conv halo rows once per image (fc1 never writes
        # them); the W halo is handled with rolls + narrow selects below.
        halo = jnp.zeros((PAD, W, Cp), jnp.float32)
        hp_ref[0:PAD, :, :] = halo
        hp_ref[H + PAD:H + 2 * PAD, :, :] = halo

    @pl.when(t < num_row_tiles)
    def _():
        # fc1 + GELU of row tile t (bf16 MXU operands, f32 accumulate).
        xm = x_ref[...].reshape(TH * W, cin)
        if xm.dtype != jnp.bfloat16:
            xm = xm.astype(jnp.bfloat16)
        h = jnp.dot(xm, w1_ref[...], preferred_element_type=jnp.float32)
        h = gelu(h + b1_ref[...])
        hp_ref[pl.ds(t * TH + PAD, TH), :, :] = h.reshape(TH, W, Cp)

    @pl.when(t > 0)
    def _():
        # ---- depthwise 5x5 conv + GELU + residual on row tile t-1 ----------
        r0 = pl.multiple_of((t - 1) * TH, TH)
        cols = lax.broadcasted_iota(jnp.int32, (1, W, 1), 1)

        acc = None
        for j in range(KSIZE):
            # Sum the 5 row taps first (row offsets live on the untiled leading
            # scratch axis -> aligned whole-slab reads), then apply this j's
            # single column shift on the XLU with pltpu.roll.  Only the <=PAD
            # wrapped border columns need zeroing -> one select per shifted j.
            a_j = None
            for i in range(KSIZE):
                k = i * KSIZE + j
                term = hp_ref[pl.ds(r0 + i, TH), :, :] * wdw_ref[k:k + 1, :]
                a_j = term if a_j is None else a_j + term
            shift = PAD - j
            if shift != 0:
                a_j = pltpu.roll(a_j, shift=shift % W, axis=1)   # XLU
                # out[w] = a_j[w - shift]; zero the wrapped border columns.
                valid = (cols >= shift) & (cols < W + shift)
                a_j = jnp.where(valid, a_j, 0.0)
            acc = a_j if acc is None else acc + a_j

        center = hp_ref[pl.ds(r0 + PAD, TH), :, :]        # hidden @ out rows
        hres = center + gelu(acc + bdw_ref[...])          # residual

        # ---- fc2 ------------------------------------------------------------
        y = jnp.dot(hres.reshape(TH * W, Cp).astype(jnp.bfloat16), w2_ref[...],
                    preferred_element_type=jnp.float32)
        y = y + b2_ref[...]
        o_ref[...] = y.reshape(1, TH, W, cout).astype(o_ref.dtype)


# ---------------------------------------------------------------------------
# Wrapper
# ---------------------------------------------------------------------------
def _pick_tile_rows(H, target=8):
    # Sweep `tile_rows` upward (16/32) on real shapes once VMEM allows; 8 keeps
    # the demo exercising the cross-tile halo path.
    if H <= target:
        return H
    for th in range(target, 1, -1):
        if H % th == 0 and th >= PAD:
            return th
    return H


def _padded_bytes(shape, dtype):
    """VMEM footprint of one buffer with (sublane, lane) padding of the two
    minor dims (f32 tile (8,128), bf16 (16,128))."""
    itemsize = jnp.dtype(dtype).itemsize
    sub = {4: 8, 2: 16, 1: 32}.get(itemsize, 8)
    dims = list(shape) if len(shape) >= 2 else [1] + list(shape)
    dims = [int(d) for d in dims]
    dims[-1] = -(-dims[-1] // LANE) * LANE
    dims[-2] = -(-dims[-2] // sub) * sub
    n = 1
    for d in dims:
        n *= d
    return n * itemsize


def conv_ffn_forward(x, params, x_size, *, approximate_gelu=True,
                     tile_rows=None, vmem_limit_bytes=None):
    """Fused  fc1 -> GELU -> (h + GELU(dwconv5x5(h))) -> fc2  on (B, N, C)."""
    H, W = x_size
    B, N, Cin = x.shape
    out_dtype = x.dtype
    hidden = params["w1"].shape[1]
    Cout = params["w2"].shape[1]

    # cls-token layout: the conv only sees patch tokens; the cls token takes a
    # trivial dense path in plain JAX (dwconv passes it through unchanged).
    cls_tok = None
    if N == H * W + 1:
        cls_tok, x = x[:, :1, :], x[:, 1:, :]
        N = H * W
    elif N != H * W:
        raise NotImplementedError("only N == H*W or N == H*W + 1 token layouts")
    assert W % 8 == 0, "W must be a multiple of 8 (sublane) for the fused kernel"

    # Lane-pad hidden channels to a multiple of 128 (exact: padded channels are
    # identically zero through fc1 / conv / residual and contribute 0 to fc2).
    # NOTE: this inflates the VALU-bound conv work by Cp/hidden; prefer hidden
    # sizes near a multiple of 128 in production.
    Cp = max(LANE, ((hidden + LANE - 1) // LANE) * LANE)

    w1p = jnp.zeros((Cin, Cp), jnp.bfloat16).at[:, :hidden].set(
        params["w1"].astype(jnp.bfloat16))
    b1p = jnp.zeros((1, Cp), jnp.float32).at[:, :hidden].set(
        params["b1"].astype(jnp.float32))
    wdwp = jnp.zeros((KSIZE * KSIZE, Cp), jnp.float32).at[:, :hidden].set(
        params["wdw"].reshape(KSIZE * KSIZE, hidden).astype(jnp.float32))
    bdwp = jnp.zeros((1, Cp), jnp.float32).at[:, :hidden].set(
        params["bdw"].astype(jnp.float32))
    w2p = jnp.zeros((Cp, Cout), jnp.bfloat16).at[:hidden, :].set(
        params["w2"].astype(jnp.bfloat16))
    b2p = params["b2"].astype(jnp.float32).reshape(1, Cout)

    # fc1 consumes bf16 on the MXU anyway -> cast x in the wrapper (halves the
    # x HBM DMA / VMEM block, removes the in-kernel cast).  Fall back to the
    # input dtype if W is not bf16-sublane (16) aligned so the in-kernel
    # reshape stays a free layout reindex.
    x_dt = jnp.bfloat16 if W % 16 == 0 else x.dtype
    x4 = x.reshape(B, H, W, Cin).astype(x_dt)

    TH = tile_rows or _pick_tile_rows(H)
    assert H % TH == 0 and (TH >= PAD or H == TH)
    T = H // TH

    # ---- VMEM budget from actual buffer arithmetic (double-buffered blocks +
    # persistent scratch), never below the 32 MiB default so it can only help.
    need = (2 * _padded_bytes((1, TH, W, Cin), x_dt)
            + 2 * _padded_bytes((1, TH, W, Cout), out_dtype)
            + 2 * (_padded_bytes((Cin, Cp), jnp.bfloat16)
                   + _padded_bytes((1, Cp), jnp.float32)
                   + _padded_bytes((KSIZE * KSIZE, Cp), jnp.float32)
                   + _padded_bytes((1, Cp), jnp.float32)
                   + _padded_bytes((Cp, Cout), jnp.bfloat16)
                   + _padded_bytes((1, Cout), jnp.float32))
            + _padded_bytes((H + 2 * PAD, W, Cp), jnp.float32))
    if vmem_limit_bytes is None:
        vmem_limit_bytes = min(max(2 * need, 32 * 1024 * 1024),
                               100 * 1024 * 1024)

    flops = 2 * B * N * Cp * (Cin + Cout) + 2 * B * N * Cp * KSIZE * KSIZE
    bytes_accessed = (x4.size * jnp.dtype(x_dt).itemsize
                      + B * N * Cout * jnp.dtype(out_dtype).itemsize
                      + (w1p.size + w2p.size) * 2
                      + (b1p.size + wdwp.size + bdwp.size + b2p.size) * 4)

    kernel = functools.partial(_conv_ffn_kernel, num_row_tiles=T,
                               approximate_gelu=approximate_gelu)

    out4 = pl.pallas_call(
        kernel,
        out_shape=jax.ShapeDtypeStruct((B, H, W, Cout), out_dtype),
        grid_spec=pltpu.PrefetchScalarGridSpec(
            num_scalar_prefetch=0,
            grid=(B, T + 1),          # +1: flush step emits the last row tile
            in_specs=[
                # x tiled per row tile; the flush step redundantly indexes the
                # last tile (its fc1 branch is skipped).
                pl.BlockSpec((1, TH, W, Cin),
                             lambda b, t: (b, jnp.minimum(t, T - 1), 0, 0)),
                pl.BlockSpec((Cin, Cp), lambda b, t: (0, 0)),
                pl.BlockSpec((1, Cp), lambda b, t: (0, 0)),
                pl.BlockSpec((KSIZE * KSIZE, Cp), lambda b, t: (0, 0)),
                pl.BlockSpec((1, Cp), lambda b, t: (0, 0)),
                pl.BlockSpec((Cp, Cout), lambda b, t: (0, 0)),
                pl.BlockSpec((1, Cout), lambda b, t: (0, 0)),
            ],
            # Output lags one step: tile t-1 written at step t (standard
            # accumulator-style deferred write; the block is only flushed when
            # its index changes, after it has been written).
            out_specs=pl.BlockSpec((1, TH, W, Cout),
                                   lambda b, t: (b, jnp.maximum(t - 1, 0), 0, 0)),
            scratch_shapes=[pltpu.VMEM((H + 2 * PAD, W, Cp), jnp.float32)],
        ),
        compiler_params=pltpu.CompilerParams(
            dimension_semantics=("parallel", "arbitrary"),
            vmem_limit_bytes=int(vmem_limit_bytes)),
        cost_estimate=pl.CostEstimate(flops=int(flops),
                                      transcendentals=int(2 * B * N * Cp),
                                      bytes_accessed=int(bytes_accessed)),
    )(x4, w1p, b1p, wdwp, bdwp, w2p, b2p)

    out = out4.reshape(B, N, Cout)

    if cls_tok is not None:
        # PyTorch path: dwconv leaves the cls token untouched, so
        # x + dwconv(x) == 2*h for the cls token, then fc2.
        h_cls = jax.nn.gelu(cls_tok @ params["w1"] + params["b1"],
                            approximate=False)
        y_cls = (2.0 * h_cls) @ params["w2"] + params["b2"]
        out = jnp.concatenate([y_cls.astype(out.dtype), out], axis=1)
    return out


# ---------------------------------------------------------------------------
# Params + pure-JAX reference
# ---------------------------------------------------------------------------
def init_params(key, in_features, hidden_features, out_features):
    ks = jax.random.split(key, 6)
    s1 = 1.0 / math.sqrt(in_features)
    sdw = 1.0 / math.sqrt(KSIZE * KSIZE)     # depthwise fan_in = 1*K*K
    s2 = 1.0 / math.sqrt(hidden_features)
    return dict(
        w1=jax.random.uniform(ks[0], (in_features, hidden_features), jnp.float32, -s1, s1),
        b1=jax.random.uniform(ks[1], (hidden_features,), jnp.float32, -s1, s1),
        wdw=jax.random.uniform(ks[2], (KSIZE, KSIZE, hidden_features), jnp.float32, -sdw, sdw),
        bdw=jax.random.uniform(ks[3], (hidden_features,), jnp.float32, -sdw, sdw),
        w2=jax.random.uniform(ks[4], (hidden_features, out_features), jnp.float32, -s2, s2),
        b2=jax.random.uniform(ks[5], (out_features,), jnp.float32, -s2, s2),
    )


def conv_ffn_reference(x, params, x_size, *, approximate=False):
    """Pure-JAX f32 reference matching the PyTorch module."""
    H, W = x_size
    B, N, _ = x.shape
    h = jax.nn.gelu(x @ params["w1"] + params["b1"], approximate=approximate)
    h4 = h.reshape(B, H, W, -1)
    hpad = jnp.pad(h4, ((0, 0), (PAD, PAD), (PAD, PAD), (0, 0)))
    acc = jnp.zeros_like(h4)
    for i in range(KSIZE):
        for j in range(KSIZE):
            acc = acc + hpad[:, i:i + H, j:j + W, :] * params["wdw"][i, j]
    conv = jax.nn.gelu(acc + params["bdw"], approximate=approximate)
    hres = h4 + conv
    y = hres.reshape(B, N, -1) @ params["w2"] + params["b2"]
    return y


if __name__ == "__main__":
    B, H, W = 2, 16, 16
    in_features, hidden_features, out_features = 16, 32, 16
    N = H * W

    key = jax.random.PRNGKey(0)
    kx, kp = jax.random.split(key)
    x = jax.random.normal(kx, (B, N, in_features), jnp.float32)
    params = init_params(kp, in_features, hidden_features, out_features)

    fwd = jax.jit(functools.partial(conv_ffn_forward, x_size=(H, W)))
    out = jax.block_until_ready(fwd(x, params))
    assert out.shape == (B, N, out_features)

    # Tight check vs a tanh-GELU f32 reference (isolates bf16-MXU error only).
    ref_tanh = conv_ffn_reference(x, params, (H, W), approximate=True)
    assert jnp.allclose(out, ref_tanh, atol=2.5e-2, rtol=2.5e-2), \
        "mismatch vs tanh-GELU reference"

    # Explicit border check: the 5x5 zero-padding halo rows/columns.
    diff = jnp.abs(out - ref_tanh).reshape(B, H, W, -1)
    row = jnp.arange(H)[:, None]
    col = jnp.arange(W)[None, :]
    border = (row < PAD) | (row >= H - PAD) | (col < PAD) | (col >= W - PAD)
    border_err = float(jnp.max(jnp.where(border[None, :, :, None], diff, 0.0)))
    assert border_err < 2.5e-2, f"halo/border mismatch: {border_err}"

    # Documented tolerance vs the exact-erf GELU PyTorch semantics
    # (tanh GELU + bf16 MXU operands are deliberate performance trade-offs).
    ref_exact = conv_ffn_reference(x, params, (H, W), approximate=False)
    assert jnp.allclose(out, ref_exact, atol=5e-2, rtol=5e-2), \
        "mismatch vs exact-GELU reference"

    print("KERNEL_OK")
</pallas_src>

<mosaic_0001>
module attributes {stable_mosaic.version = 11 : i64} {
  func.func @_conv_ffn_kernel(%arg0: i32, %arg1: i32, %arg2: memref<1x8x16x16xbf16, #tpu.memory_space<vmem>>, %arg3: memref<16x128xbf16, #tpu.memory_space<vmem>>, %arg4: memref<1x128xf32, #tpu.memory_space<vmem>>, %arg5: memref<25x128xf32, #tpu.memory_space<vmem>>, %arg6: memref<1x128xf32, #tpu.memory_space<vmem>>, %arg7: memref<128x16xbf16, #tpu.memory_space<vmem>>, %arg8: memref<1x16xf32, #tpu.memory_space<vmem>>, %arg9: memref<1x8x16x16xf32, #tpu.memory_space<vmem>>, %arg10: memref<20x16x128xf32, #tpu.memory_space<vmem>>) attributes {dimension_semantics = [#tpu.dimension_semantics<parallel>, #tpu.dimension_semantics<arbitrary>], iteration_bounds = array<i64: 2, 3>, scalar_prefetch = 0 : i64, scratch_operands = 1 : i64, tpu.core_type = #tpu.core_type<tc>, window_params = [{transform_indices = @transform_0, window_bounds = array<i64: 1, 8, 16, 16>}, {pipeline_mode = #tpu.pipeline_mode<synchronous>, transform_indices = @transform_1, window_bounds = array<i64: 16, 128>}, {pipeline_mode = #tpu.pipeline_mode<synchronous>, transform_indices = @transform_2, window_bounds = array<i64: 1, 128>}, {pipeline_mode = #tpu.pipeline_mode<synchronous>, transform_indices = @transform_3, window_bounds = array<i64: 25, 128>}, {pipeline_mode = #tpu.pipeline_mode<synchronous>, transform_indices = @transform_4, window_bounds = array<i64: 1, 128>}, {pipeline_mode = #tpu.pipeline_mode<synchronous>, transform_indices = @transform_5, window_bounds = array<i64: 128, 16>}, {pipeline_mode = #tpu.pipeline_mode<synchronous>, transform_indices = @transform_6, window_bounds = array<i64: 1, 16>}, {transform_indices = @transform_7, window_bounds = array<i64: 1, 8, 16, 16>}]} {
    %c0_i32 = arith.constant 0 : i32
    %0 = arith.cmpi eq, %arg1, %c0_i32 : i32
    %1 = arith.extui %0 : i1 to i32
    %c0_i32_0 = arith.constant 0 : i32
    %2 = arith.cmpi ne, %1, %c0_i32_0 : i32
    scf.if %2 {
      %cst = arith.constant 0.000000e+00 : f32
      %9 = vector.broadcast %cst : f32 to vector<2x16x128xf32>
      %c0 = arith.constant 0 : index
      %c0_4 = arith.constant 0 : index
      %c0_5 = arith.constant 0 : index
      %10 = vector.load %arg10[%c0, %c0_4, %c0_5] : memref<20x16x128xf32, #tpu.memory_space<vmem>>, vector<2x16x128xf32>
      tpu.vector_store %arg10[%c0, %c0_4, %c0_5], %9 {strides = array<i32>} : memref<20x16x128xf32, #tpu.memory_space<vmem>>, vector<2x16x128xf32>,
      %c18 = arith.constant 18 : index
      %c0_6 = arith.constant 0 : index
      %c0_7 = arith.constant 0 : index
      %11 = vector.load %arg10[%c18, %c0_6, %c0_7] : memref<20x16x128xf32, #tpu.memory_space<vmem>>, vector<2x16x128xf32>
      tpu.vector_store %arg10[%c18, %c0_6, %c0_7], %9 {strides = array<i32>} : memref<20x16x128xf32, #tpu.memory_space<vmem>>, vector<2x16x128xf32>,
    } else {
    }
    %c2_i32 = arith.constant 2 : i32
    %3 = arith.cmpi slt, %arg1, %c2_i32 : i32
    %4 = arith.extui %3 : i1 to i32
    %c0_i32_1 = arith.constant 0 : i32
    %5 = arith.cmpi ne, %4, %c0_i32_1 : i32
    scf.if %5 {
      %c0 = arith.constant 0 : index
      %c0_4 = arith.constant 0 : index
      %c0_5 = arith.constant 0 : index
      %c0_6 = arith.constant 0 : index
      %9 = vector.load %arg2[%c0, %c0_4, %c0_5, %c0_6] : memref<1x8x16x16xbf16, #tpu.memory_space<vmem>>, vector<1x8x16x16xbf16>
      %10 = vector.shape_cast %9 : vector<1x8x16x16xbf16> to vector<128x16xbf16>
      %c0_7 = arith.constant 0 : index
      %c0_8 = arith.constant 0 : index
      %11 = vector.load %arg3[%c0_7, %c0_8] : memref<16x128xbf16, #tpu.memory_space<vmem>>, vector<16x128xbf16>
      %cst = arith.constant dense<0.000000e+00> : vector<128x128xf32>
      %12 = tpu.matmul %10, %11, %cst {dimension_numbers = #tpu.dot_dimension_numbers<[1], [0], [0], [1], [0, 0, 1, 1], [], []>} : vector<128x16xbf16>, vector<16x128xbf16>, vector<128x128xf32> -> vector<128x128xf32>
      %c0_9 = arith.constant 0 : index
      %c0_10 = arith.constant 0 : index
      %13 = vector.load %arg4[%c0_9, %c0_10] : memref<1x128xf32, #tpu.memory_space<vmem>>, vector<1x128xf32>
      %14 = vector.broadcast %13 : vector<1x128xf32> to vector<128x128xf32>
      %15 = arith.addf %12, %14 : vector<128x128xf32>
      %16 = arith.mulf %15, %15 : vector<128x128xf32>
      %17 = arith.mulf %15, %16 : vector<128x128xf32>
      %cst_11 = arith.constant 4.471500e-02 : f32
      %18 = vector.broadcast %cst_11 : f32 to vector<128x128xf32>
      %19 = arith.mulf %18, %17 : vector<128x128xf32>
      %20 = arith.addf %15, %19 : vector<128x128xf32>
      %cst_12 = arith.constant 0.797884583 : f32
      %21 = vector.broadcast %cst_12 : f32 to vector<128x128xf32>
      %22 = arith.mulf %21, %20 : vector<128x128xf32>
      %23 = math.tanh %22 : vector<128x128xf32>
      %cst_13 = arith.constant 1.000000e+00 : f32
      %24 = vector.broadcast %cst_13 : f32 to vector<128x128xf32>
      %25 = arith.addf %24, %23 : vector<128x128xf32>
      %cst_14 = arith.constant 5.000000e-01 : f32
      %26 = vector.broadcast %cst_14 : f32 to vector<128x128xf32>
      %27 = arith.mulf %26, %25 : vector<128x128xf32>
      %28 = arith.mulf %15, %27 : vector<128x128xf32>
      %29 = vector.shape_cast %28 : vector<128x128xf32> to vector<8x16x128xf32>
      %c8_i32 = arith.constant 8 : i32
      %30 = arith.muli %arg1, %c8_i32 : i32
      %c2_i32_15 = arith.constant 2 : i32
      %31 = arith.addi %30, %c2_i32_15 : i32
      %32 = arith.index_cast %31 : i32 to index
      %c0_16 = arith.constant 0 : index
      %c0_17 = arith.constant 0 : index
      %33 = vector.load %arg10[%32, %c0_16, %c0_17] : memref<20x16x128xf32, #tpu.memory_space<vmem>>, vector<8x16x128xf32>
      tpu.vector_store %arg10[%32, %c0_16, %c0_17], %29 {strides = array<i32>} : memref<20x16x128xf32, #tpu.memory_space<vmem>>, vector<8x16x128xf32>,
    } else {
    }
    %c0_i32_2 = arith.constant 0 : i32
    %6 = arith.cmpi sgt, %arg1, %c0_i32_2 : i32
    %7 = arith.extui %6 : i1 to i32
    %c0_i32_3 = arith.constant 0 : i32
    %8 = arith.cmpi ne, %7, %c0_i32_3 : i32
    scf.if %8 {
      %c1_i32 = arith.constant 1 : i32
      %9 = arith.subi %arg1, %c1_i32 : i32
      %c8_i32 = arith.constant 8 : i32
      %10 = arith.muli %9, %c8_i32 : i32
      %11 = tpu.assume_multiple %10, 8 : i32
      %12 = tpu.iota {dimensions = array<i32: 1>} : vector<1x16x1xi32>
      %c0_i32_4 = arith.constant 0 : i32
      %13 = arith.addi %11, %c0_i32_4 : i32
      %14 = arith.index_cast %13 : i32 to index
      %c0 = arith.constant 0 : index
      %c0_5 = arith.constant 0 : index
      %15 = vector.load %arg10[%14, %c0, %c0_5] : memref<20x16x128xf32, #tpu.memory_space<vmem>>, vector<8x16x128xf32>
      %c0_6 = arith.constant 0 : index
      %c0_7 = arith.constant 0 : index
      %16 = vector.load %arg5[%c0_6, %c0_7] : memref<25x128xf32, #tpu.memory_space<vmem>>, vector<1x128xf32>
      %17 = vector.shape_cast %16 : vector<1x128xf32> to vector<1x1x128xf32>
      %18 = vector.broadcast %17 : vector<1x1x128xf32> to vector<8x16x128xf32>
      %19 = arith.mulf %15, %18 : vector<8x16x128xf32>
      %c1_i32_8 = arith.constant 1 : i32
      %20 = arith.addi %11, %c1_i32_8 : i32
      %21 = arith.index_cast %20 : i32 to index
      %c0_9 = arith.constant 0 : index
      %c0_10 = arith.constant 0 : index
      %22 = vector.load %arg10[%21, %c0_9, %c0_10] : memref<20x16x128xf32, #tpu.memory_space<vmem>>, vector<8x16x128xf32>
      %c5 = arith.constant 5 : index
      %c0_11 = arith.constant 0 : index
      %23 = vector.load %arg5[%c5, %c0_11] : memref<25x128xf32, #tpu.memory_space<vmem>>, vector<1x128xf32>
      %24 = vector.shape_cast %23 : vector<1x128xf32> to vector<1x1x128xf32>
      %25 = vector.broadcast %24 : vector<1x1x128xf32> to vector<8x16x128xf32>
      %26 = arith.mulf %22, %25 : vector<8x16x128xf32>
      %27 = arith.addf %19, %26 : vector<8x16x128xf32>
      %c2_i32_12 = arith.constant 2 : i32
      %28 = arith.addi %11, %c2_i32_12 : i32
      %29 = arith.index_cast %28 : i32 to index
      %c0_13 = arith.constant 0 : index
      %c0_14 = arith.constant 0 : index
      %30 = vector.load %arg10[%29, %c0_13, %c0_14] : memref<20x16x128xf32, #tpu.memory_space<vmem>>, vector<8x16x128xf32>
      %c10 = arith.constant 10 : index
      %c0_15 = arith.constant 0 : index
      %31 = vector.load %arg5[%c10, %c0_15] : memref<25x128xf32, #tpu.memory_space<vmem>>, vector<1x128xf32>
      %32 = vector.shape_cast %31 : vector<1x128xf32> to vector<1x1x128xf32>
      %33 = vector.broadcast %32 : vector<1x1x128xf32> to vector<8x16x128xf32>
      %34 = arith.mulf %30, %33 : vector<8x16x128xf32>
      %35 = arith.addf %27, %34 : vector<8x16x128xf32>
      %c3_i32 = arith.constant 3 : i32
      %36 = arith.addi %11, %c3_i32 : i32
      %37 = arith.index_cast %36 : i32 to index
      %c0_16 = arith.constant 0 : index
      %c0_17 = arith.constant 0 : index
      %38 = vector.load %arg10[%37, %c0_16, %c0_17] : memref<20x16x128xf32, #tpu.memory_space<vmem>>, vector<8x16x128xf32>
      %c15 = arith.constant 15 : index
      %c0_18 = arith.constant 0 : index
      %39 = vector.load %arg5[%c15, %c0_18] : memref<25x128xf32, #tpu.memory_space<vmem>>, vector<1x128xf32>
      %40 = vector.shape_cast %39 : vector<1x128xf32> to vector<1x1x128xf32>
      %41 = vector.broadcast %40 : vector<1x1x128xf32> to vector<8x16x128xf32>
      %42 = arith.mulf %38, %41 : vector<8x16x128xf32>
      %43 = arith.addf %35, %42 : vector<8x16x128xf32>
      %c4_i32 = arith.constant 4 : i32
      %44 = arith.addi %11, %c4_i32 : i32
      %45 = arith.index_cast %44 : i32 to index
      %c0_19 = arith.constant 0 : index
      %c0_20 = arith.constant 0 : index
      %46 = vector.load %arg10[%45, %c0_19, %c0_20] : memref<20x16x128xf32, #tpu.memory_space<vmem>>, vector<8x16x128xf32>
      %c20 = arith.constant 20 : index
      %c0_21 = arith.constant 0 : index
      %47 = vector.load %arg5[%c20, %c0_21] : memref<25x128xf32, #tpu.memory_space<vmem>>, vector<1x128xf32>
      %48 = vector.shape_cast %47 : vector<1x128xf32> to vector<1x1x128xf32>
      %49 = vector.broadcast %48 : vector<1x1x128xf32> to vector<8x16x128xf32>
      %50 = arith.mulf %46, %49 : vector<8x16x128xf32>
      %51 = arith.addf %43, %50 : vector<8x16x128xf32>
      %c2_i32_22 = arith.constant 2 : i32
      %52 = tpu.dynamic_rotate %51 by %c2_i32_22 dim 1 : vector<8x16x128xf32>, i32 -> vector<8x16x128xf32>
      %c2_i32_23 = arith.constant 2 : i32
      %53 = vector.broadcast %c2_i32_23 : i32 to vector<1x16x1xi32>
      %54 = arith.cmpi sge, %12, %53 : vector<1x16x1xi32>
      %c18_i32 = arith.constant 18 : i32
      %55 = vector.broadcast %c18_i32 : i32 to vector<1x16x1xi32>
      %56 = arith.cmpi slt, %12, %55 : vector<1x16x1xi32>
      %57 = arith.andi %54, %56 : vector<1x16x1xi1>
      %cst = arith.constant 0.000000e+00 : f32
      %58 = vector.shape_cast %57 : vector<1x16x1xi1> to vector<1x16x1xi1>
      %59 = vector.broadcast %58 : vector<1x16x1xi1> to vector<8x16x128xi1>
      %60 = vector.broadcast %cst : f32 to vector<8x16x128xf32>
      %61 = arith.select %59, %52, %60 : vector<8x16x128xi1>, vector<8x16x128xf32>
      %c0_i32_24 = arith.constant 0 : i32
      %62 = arith.addi %11, %c0_i32_24 : i32
      %63 = arith.index_cast %62 : i32 to index
      %c0_25 = arith.constant 0 : index
      %c0_26 = arith.constant 0 : index
      %64 = vector.load %arg10[%63, %c0_25, %c0_26] : memref<20x16x128xf32, #tpu.memory_space<vmem>>, vector<8x16x128xf32>
      %c1 = arith.constant 1 : index
      %c0_27 = arith.constant 0 : index
      %65 = vector.load %arg5[%c1, %c0_27] : memref<25x128xf32, #tpu.memory_space<vmem>>, vector<1x128xf32>
      %66 = vector.shape_cast %65 : vector<1x128xf32> to vector<1x1x128xf32>
      %67 = vector.broadcast %66 : vector<1x1x128xf32> to vector<8x16x128xf32>
      %68 = arith.mulf %64, %67 : vector<8x16x128xf32>
      %c1_i32_28 = arith.constant 1 : i32
      %69 = arith.addi %11, %c1_i32_28 : i32
      %70 = arith.index_cast %69 : i32 to index
      %c0_29 = arith.constant 0 : index
      %c0_30 = arith.constant 0 : index
      %71 = vector.load %arg10[%70, %c0_29, %c0_30] : memref<20x16x128xf32, #tpu.memory_space<vmem>>, vector<8x16x128xf32>
      %c6 = arith.constant 6 : index
      %c0_31 = arith.constant 0 : index
      %72 = vector.load %arg5[%c6, %c0_31] : memref<25x128xf32, #tpu.memory_space<vmem>>, vector<1x128xf32>
      %73 = vector.shape_cast %72 : vector<1x128xf32> to vector<1x1x128xf32>
      %74 = vector.broadcast %73 : vector<1x1x128xf32> to vector<8x16x128xf32>
      %75 = arith.mulf %71, %74 : vector<8x16x128xf32>
      %76 = arith.addf %68, %75 : vector<8x16x128xf32>
      %c2_i32_32 = arith.constant 2 : i32
      %77 = arith.addi %11, %c2_i32_32 : i32
      %78 = arith.index_cast %77 : i32 to index
      %c0_33 = arith.constant 0 : index
      %c0_34 = arith.constant 0 : index
      %79 = vector.load %arg10[%78, %c0_33, %c0_34] : memref<20x16x128xf32, #tpu.memory_space<vmem>>, vector<8x16x128xf32>
      %c11 = arith.constant 11 : index
      %c0_35 = arith.constant 0 : index
      %80 = vector.load %arg5[%c11, %c0_35] : memref<25x128xf32, #tpu.memory_space<vmem>>, vector<1x128xf32>
      %81 = vector.shape_cast %80 : vector<1x128xf32> to vector<1x1x128xf32>
      %82 = vector.broadcast %81 : vector<1x1x128xf32> to vector<8x16x128xf32>
      %83 = arith.mulf %79, %82 : vector<8x16x128xf32>
      %84 = arith.addf %76, %83 : vector<8x16x128xf32>
      %c3_i32_36 = arith.constant 3 : i32
      %85 = arith.addi %11, %c3_i32_36 : i32
      %86 = arith.index_cast %85 : i32 to index
      %c0_37 = arith.constant 0 : index
      %c0_38 = arith.constant 0 : index
      %87 = vector.load %arg10[%86, %c0_37, %c0_38] : memref<20x16x128xf32, #tpu.memory_space<vmem>>, vector<8x16x128xf32>
      %c16 = arith.constant 16 : index
      %c0_39 = arith.constant 0 : index
      %88 = vector.load %arg5[%c16, %c0_39] : memref<25x128xf32, #tpu.memory_space<vmem>>, vector<1x128xf32>
      %89 = vector.shape_cast %88 : vector<1x128xf32> to vector<1x1x128xf32>
      %90 = vector.broadcast %89 : vector<1x1x128xf32> to vector<8x16x128xf32>
      %91 = arith.mulf %87, %90 : vector<8x16x128xf32>
      %92 = arith.addf %84, %91 : vector<8x16x128xf32>
      %c4_i32_40 = arith.constant 4 : i32
      %93 = arith.addi %11, %c4_i32_40 : i32
      %94 = arith.index_cast %93 : i32 to index
      %c0_41 = arith.constant 0 : index
      %c0_42 = arith.constant 0 : index
      %95 = vector.load %arg10[%94, %c0_41, %c0_42] : memref<20x16x128xf32, #tpu.memory_space<vmem>>, vector<8x16x128xf32>
      %c21 = arith.constant 21 : index
      %c0_43 = arith.constant 0 : index
      %96 = vector.load %arg5[%c21, %c0_43] : memref<25x128xf32, #tpu.memory_space<vmem>>, vector<1x128xf32>
      %97 = vector.shape_cast %96 : vector<1x128xf32> to vector<1x1x128xf32>
      %98 = vector.broadcast %97 : vector<1x1x128xf32> to vector<8x16x128xf32>
      %99 = arith.mulf %95, %98 : vector<8x16x128xf32>
      %100 = arith.addf %92, %99 : vector<8x16x128xf32>
      %c1_i32_44 = arith.constant 1 : i32
      %101 = tpu.dynamic_rotate %100 by %c1_i32_44 dim 1 : vector<8x16x128xf32>, i32 -> vector<8x16x128xf32>
      %c1_i32_45 = arith.constant 1 : i32
      %102 = vector.broadcast %c1_i32_45 : i32 to vector<1x16x1xi32>
      %103 = arith.cmpi sge, %12, %102 : vector<1x16x1xi32>
      %c17_i32 = arith.constant 17 : i32
      %104 = vector.broadcast %c17_i32 : i32 to vector<1x16x1xi32>
      %105 = arith.cmpi slt, %12, %104 : vector<1x16x1xi32>
      %106 = arith.andi %103, %105 : vector<1x16x1xi1>
      %cst_46 = arith.constant 0.000000e+00 : f32
      %107 = vector.shape_cast %106 : vector<1x16x1xi1> to vector<1x16x1xi1>
      %108 = vector.broadcast %107 : vector<1x16x1xi1> to vector<8x16x128xi1>
      %109 = vector.broadcast %cst_46 : f32 to vector<8x16x128xf32>
      %110 = arith.select %108, %101, %109 : vector<8x16x128xi1>, vector<8x16x128xf32>
      %111 = arith.addf %61, %110 : vector<8x16x128xf32>
      %c0_i32_47 = arith.constant 0 : i32
      %112 = arith.addi %11, %c0_i32_47 : i32
      %113 = arith.index_cast %112 : i32 to index
      %c0_48 = arith.constant 0 : index
      %c0_49 = arith.constant 0 : index
      %114 = vector.load %arg10[%113, %c0_48, %c0_49] : memref<20x16x128xf32, #tpu.memory_space<vmem>>, vector<8x16x128xf32>
      %c2 = arith.constant 2 : index
      %c0_50 = arith.constant 0 : index
      %115 = vector.load %arg5[%c2, %c0_50] : memref<25x128xf32, #tpu.memory_space<vmem>>, vector<1x128xf32>
      %116 = vector.shape_cast %115 : vector<1x128xf32> to vector<1x1x128xf32>
      %117 = vector.broadcast %116 : vector<1x1x128xf32> to vector<8x16x128xf32>
      %118 = arith.mulf %114, %117 : vector<8x16x128xf32>
      %c1_i32_51 = arith.constant 1 : i32
      %119 = arith.addi %11, %c1_i32_51 : i32
      %120 = arith.index_cast %119 : i32 to index
      %c0_52 = arith.constant 0 : index
      %c0_53 = arith.constant 0 : index
      %121 = vector.load %arg10[%120, %c0_52, %c0_53] : memref<20x16x128xf32, #tpu.memory_space<vmem>>, vector<8x16x128xf32>
      %c7 = arith.constant 7 : index
      %c0_54 = arith.constant 0 : index
      %122 = vector.load %arg5[%c7, %c0_54] : memref<25x128xf32, #tpu.memory_space<vmem>>, vector<1x128xf32>
      %123 = vector.shape_cast %122 : vector<1x128xf32> to vector<1x1x128xf32>
      %124 = vector.broadcast %123 : vector<1x1x128xf32> to vector<8x16x128xf32>
      %125 = arith.mulf %121, %124 : vector<8x16x128xf32>
      %126 = arith.addf %118, %125 : vector<8x16x128xf32>
      %c2_i32_55 = arith.constant 2 : i32
      %127 = arith.addi %11, %c2_i32_55 : i32
      %128 = arith.index_cast %127 : i32 to index
      %c0_56 = arith.constant 0 : index
      %c0_57 = arith.constant 0 : index
      %129 = vector.load %arg10[%128, %c0_56, %c0_57] : memref<20x16x128xf32, #tpu.memory_space<vmem>>, vector<8x16x128xf32>
      %c12 = arith.constant 12 : index
      %c0_58 = arith.constant 0 : index
      %130 = vector.load %arg5[%c12, %c0_58] : memref<25x128xf32, #tpu.memory_space<vmem>>, vector<1x128xf32>
      %131 = vector.shape_cast %130 : vector<1x128xf32> to vector<1x1x128xf32>
      %132 = vector.broadcast %131 : vector<1x1x128xf32> to vector<8x16x128xf32>
      %133 = arith.mulf %129, %132 : vector<8x16x128xf32>
      %134 = arith.addf %126, %133 : vector<8x16x128xf32>
      %c3_i32_59 = arith.constant 3 : i32
      %135 = arith.addi %11, %c3_i32_59 : i32
      %136 = arith.index_cast %135 : i32 to index
      %c0_60 = arith.constant 0 : index
      %c0_61 = arith.constant 0 : index
      %137 = vector.load %arg10[%136, %c0_60, %c0_61] : memref<20x16x128xf32, #tpu.memory_space<vmem>>, vector<8x16x128xf32>
      %c17 = arith.constant 17 : index
      %c0_62 = arith.constant 0 : index
      %138 = vector.load %arg5[%c17, %c0_62] : memref<25x128xf32, #tpu.memory_space<vmem>>, vector<1x128xf32>
      %139 = vector.shape_cast %138 : vector<1x128xf32> to vector<1x1x128xf32>
      %140 = vector.broadcast %139 : vector<1x1x128xf32> to vector<8x16x128xf32>
      %141 = arith.mulf %137, %140 : vector<8x16x128xf32>
      %142 = arith.addf %134, %141 : vector<8x16x128xf32>
      %c4_i32_63 = arith.constant 4 : i32
      %143 = arith.addi %11, %c4_i32_63 : i32
      %144 = arith.index_cast %143 : i32 to index
      %c0_64 = arith.constant 0 : index
      %c0_65 = arith.constant 0 : index
      %145 = vector.load %arg10[%144, %c0_64, %c0_65] : memref<20x16x128xf32, #tpu.memory_space<vmem>>, vector<8x16x128xf32>
      %c22 = arith.constant 22 : index
      %c0_66 = arith.constant 0 : index
      %146 = vector.load %arg5[%c22, %c0_66] : memref<25x128xf32, #tpu.memory_space<vmem>>, vector<1x128xf32>
      %147 = vector.shape_cast %146 : vector<1x128xf32> to vector<1x1x128xf32>
      %148 = vector.broadcast %147 : vector<1x1x128xf32> to vector<8x16x128xf32>
      %149 = arith.mulf %145, %148 : vector<8x16x128xf32>
      %150 = arith.addf %142, %149 : vector<8x16x128xf32>
      %151 = arith.addf %111, %150 : vector<8x16x128xf32>
      %c0_i32_67 = arith.constant 0 : i32
      %152 = arith.addi %11, %c0_i32_67 : i32
      %153 = arith.index_cast %152 : i32 to index
      %c0_68 = arith.constant 0 : index
      %c0_69 = arith.constant 0 : index
      %154 = vector.load %arg10[%153, %c0_68, %c0_69] : memref<20x16x128xf32, #tpu.memory_space<vmem>>, vector<8x16x128xf32>
      %c3 = arith.constant 3 : index
      %c0_70 = arith.constant 0 : index
      %155 = vector.load %arg5[%c3, %c0_70] : memref<25x128xf32, #tpu.memory_space<vmem>>, vector<1x128xf32>
      %156 = vector.shape_cast %155 : vector<1x128xf32> to vector<1x1x128xf32>
      %157 = vector.broadcast %156 : vector<1x1x128xf32> to vector<8x16x128xf32>
      %158 = arith.mulf %154, %157 : vector<8x16x128xf32>
      %c1_i32_71 = arith.constant 1 : i32
      %159 = arith.addi %11, %c1_i32_71 : i32
      %160 = arith.index_cast %159 : i32 to index
      %c0_72 = arith.constant 0 : index
      %c0_73 = arith.constant 0 : index
      %161 = vector.load %arg10[%160, %c0_72, %c0_73] : memref<20x16x128xf32, #tpu.memory_space<vmem>>, vector<8x16x128xf32>
      %c8 = arith.constant 8 : index
      %c0_74 = arith.constant 0 : index
      %162 = vector.load %arg5[%c8, %c0_74] : memref<25x128xf32, #tpu.memory_space<vmem>>, vector<1x128xf32>
      %163 = vector.shape_cast %162 : vector<1x128xf32> to vector<1x1x128xf32>
      %164 = vector.broadcast %163 : vector<1x1x128xf32> to vector<8x16x128xf32>
      %165 = arith.mulf %161, %164 : vector<8x16x128xf32>
      %166 = arith.addf %158, %165 : vector<8x16x128xf32>
      %c2_i32_75 = arith.constant 2 : i32
      %167 = arith.addi %11, %c2_i32_75 : i32
      %168 = arith.index_cast %167 : i32 to index
      %c0_76 = arith.constant 0 : index
      %c0_77 = arith.constant 0 : index
      %169 = vector.load %arg10[%168, %c0_76, %c0_77] : memref<20x16x128xf32, #tpu.memory_space<vmem>>, vector<8x16x128xf32>
      %c13 = arith.constant 13 : index
      %c0_78 = arith.constant 0 : index
      %170 = vector.load %arg5[%c13, %c0_78] : memref<25x128xf32, #tpu.memory_space<vmem>>, vector<1x128xf32>
      %171 = vector.shape_cast %170 : vector<1x128xf32> to vector<1x1x128xf32>
      %172 = vector.broadcast %171 : vector<1x1x128xf32> to vector<8x16x128xf32>
      %173 = arith.mulf %169, %172 : vector<8x16x128xf32>
      %174 = arith.addf %166, %173 : vector<8x16x128xf32>
      %c3_i32_79 = arith.constant 3 : i32
      %175 = arith.addi %11, %c3_i32_79 : i32
      %176 = arith.index_cast %175 : i32 to index
      %c0_80 = arith.constant 0 : index
      %c0_81 = arith.constant 0 : index
      %177 = vector.load %arg10[%176, %c0_80, %c0_81] : memref<20x16x128xf32, #tpu.memory_space<vmem>>, vector<8x16x128xf32>
      %c18 = arith.constant 18 : index
      %c0_82 = arith.constant 0 : index
      %178 = vector.load %arg5[%c18, %c0_82] : memref<25x128xf32, #tpu.memory_space<vmem>>, vector<1x128xf32>
      %179 = vector.shape_cast %178 : vector<1x128xf32> to vector<1x1x128xf32>
      %180 = vector.broadcast %179 : vector<1x1x128xf32> to vector<8x16x128xf32>
      %181 = arith.mulf %177, %180 : vector<8x16x128xf32>
      %182 = arith.addf %174, %181 : vector<8x16x128xf32>
      %c4_i32_83 = arith.constant 4 : i32
      %183 = arith.addi %11, %c4_i32_83 : i32
      %184 = arith.index_cast %183 : i32 to index
      %c0_84 = arith.constant 0 : index
      %c0_85 = arith.constant 0 : index
      %185 = vector.load %arg10[%184, %c0_84, %c0_85] : memref<20x16x128xf32, #tpu.memory_space<vmem>>, vector<8x16x128xf32>
      %c23 = arith.constant 23 : index
      %c0_86 = arith.constant 0 : index
      %186 = vector.load %arg5[%c23, %c0_86] : memref<25x128xf32, #tpu.memory_space<vmem>>, vector<1x128xf32>
      %187 = vector.shape_cast %186 : vector<1x128xf32> to vector<1x1x128xf32>
      %188 = vector.broadcast %187 : vector<1x1x128xf32> to vector<8x16x128xf32>
      %189 = arith.mulf %185, %188 : vector<8x16x128xf32>
      %190 = arith.addf %182, %189 : vector<8x16x128xf32>
      %c15_i32 = arith.constant 15 : i32
      %191 = tpu.dynamic_rotate %190 by %c15_i32 dim 1 : vector<8x16x128xf32>, i32 -> vector<8x16x128xf32>
      %c-1_i32 = arith.constant -1 : i32
      %192 = vector.broadcast %c-1_i32 : i32 to vector<1x16x1xi32>
      %193 = arith.cmpi sge, %12, %192 : vector<1x16x1xi32>
      %c15_i32_87 = arith.constant 15 : i32
      %194 = vector.broadcast %c15_i32_87 : i32 to vector<1x16x1xi32>
      %195 = arith.cmpi slt, %12, %194 : vector<1x16x1xi32>
      %196 = arith.andi %193, %195 : vector<1x16x1xi1>
      %cst_88 = arith.constant 0.000000e+00 : f32
      %197 = vector.shape_cast %196 : vector<1x16x1xi1> to vector<1x16x1xi1>
      %198 = vector.broadcast %197 : vector<1x16x1xi1> to vector<8x16x128xi1>
      %199 = vector.broadcast %cst_88 : f32 to vector<8x16x128xf32>
      %200 = arith.select %198, %191, %199 : vector<8x16x128xi1>, vector<8x16x128xf32>
      %201 = arith.addf %151, %200 : vector<8x16x128xf32>
      %c0_i32_89 = arith.constant 0 : i32
      %202 = arith.addi %11, %c0_i32_89 : i32
      %203 = arith.index_cast %202 : i32 to index
      %c0_90 = arith.constant 0 : index
      %c0_91 = arith.constant 0 : index
      %204 = vector.load %arg10[%203, %c0_90, %c0_91] : memref<20x16x128xf32, #tpu.memory_space<vmem>>, vector<8x16x128xf32>
      %c4 = arith.constant 4 : index
      %c0_92 = arith.constant 0 : index
      %205 = vector.load %arg5[%c4, %c0_92] : memref<25x128xf32, #tpu.memory_space<vmem>>, vector<1x128xf32>
      %206 = vector.shape_cast %205 : vector<1x128xf32> to vector<1x1x128xf32>
      %207 = vector.broadcast %206 : vector<1x1x128xf32> to vector<8x16x128xf32>
      %208 = arith.mulf %204, %207 : vector<8x16x128xf32>
      %c1_i32_93 = arith.constant 1 : i32
      %209 = arith.addi %11, %c1_i32_93 : i32
      %210 = arith.index_cast %209 : i32 to index
      %c0_94 = arith.constant 0 : index
      %c0_95 = arith.constant 0 : index
      %211 = vector.load %arg10[%210, %c0_94, %c0_95] : memref<20x16x128xf32, #tpu.memory_space<vmem>>, vector<8x16x128xf32>
      %c9 = arith.constant 9 : index
      %c0_96 = arith.constant 0 : index
      %212 = vector.load %arg5[%c9, %c0_96] : memref<25x128xf32, #tpu.memory_space<vmem>>, vector<1x128xf32>
      %213 = vector.shape_cast %212 : vector<1x128xf32> to vector<1x1x128xf32>
      %214 = vector.broadcast %213 : vector<1x1x128xf32> to vector<8x16x128xf32>
      %215 = arith.mulf %211, %214 : vector<8x16x128xf32>
      %216 = arith.addf %208, %215 : vector<8x16x128xf32>
      %c2_i32_97 = arith.constant 2 : i32
      %217 = arith.addi %11, %c2_i32_97 : i32
      %218 = arith.index_cast %217 : i32 to index
      %c0_98 = arith.constant 0 : index
      %c0_99 = arith.constant 0 : index
      %219 = vector.load %arg10[%218, %c0_98, %c0_99] : memref<20x16x128xf32, #tpu.memory_space<vmem>>, vector<8x16x128xf32>
      %c14 = arith.constant 14 : index
      %c0_100 = arith.constant 0 : index
      %220 = vector.load %arg5[%c14, %c0_100] : memref<25x128xf32, #tpu.memory_space<vmem>>, vector<1x128xf32>
      %221 = vector.shape_cast %220 : vector<1x128xf32> to vector<1x1x128xf32>
      %222 = vector.broadcast %221 : vector<1x1x128xf32> to vector<8x16x128xf32>
      %223 = arith.mulf %219, %222 : vector<8x16x128xf32>
      %224 = arith.addf %216, %223 : vector<8x16x128xf32>
      %c3_i32_101 = arith.constant 3 : i32
      %225 = arith.addi %11, %c3_i32_101 : i32
      %226 = arith.index_cast %225 : i32 to index
      %c0_102 = arith.constant 0 : index
      %c0_103 = arith.constant 0 : index
      %227 = vector.load %arg10[%226, %c0_102, %c0_103] : memref<20x16x128xf32, #tpu.memory_space<vmem>>, vector<8x16x128xf32>
      %c19 = arith.constant 19 : index
      %c0_104 = arith.constant 0 : index
      %228 = vector.load %arg5[%c19, %c0_104] : memref<25x128xf32, #tpu.memory_space<vmem>>, vector<1x128xf32>
      %229 = vector.shape_cast %228 : vector<1x128xf32> to vector<1x1x128xf32>
      %230 = vector.broadcast %229 : vector<1x1x128xf32> to vector<8x16x128xf32>
      %231 = arith.mulf %227, %230 : vector<8x16x128xf32>
      %232 = arith.addf %224, %231 : vector<8x16x128xf32>
      %c4_i32_105 = arith.constant 4 : i32
      %233 = arith.addi %11, %c4_i32_105 : i32
      %234 = arith.index_cast %233 : i32 to index
      %c0_106 = arith.constant 0 : index
      %c0_107 = arith.constant 0 : index
      %235 = vector.load %arg10[%234, %c0_106, %c0_107] : memref<20x16x128xf32, #tpu.memory_space<vmem>>, vector<8x16x128xf32>
      %c24 = arith.constant 24 : index
      %c0_108 = arith.constant 0 : index
      %236 = vector.load %arg5[%c24, %c0_108] : memref<25x128xf32, #tpu.memory_space<vmem>>, vector<1x128xf32>
      %237 = vector.shape_cast %236 : vector<1x128xf32> to vector<1x1x128xf32>
      %238 = vector.broadcast %237 : vector<1x1x128xf32> to vector<8x16x128xf32>
      %239 = arith.mulf %235, %238 : vector<8x16x128xf32>
      %240 = arith.addf %232, %239 : vector<8x16x128xf32>
      %c14_i32 = arith.constant 14 : i32
      %241 = tpu.dynamic_rotate %240 by %c14_i32 dim 1 : vector<8x16x128xf32>, i32 -> vector<8x16x128xf32>
      %c-2_i32 = arith.constant -2 : i32
      %242 = vector.broadcast %c-2_i32 : i32 to vector<1x16x1xi32>
      %243 = arith.cmpi sge, %12, %242 : vector<1x16x1xi32>
      %c14_i32_109 = arith.constant 14 : i32
      %244 = vector.broadcast %c14_i32_109 : i32 to vector<1x16x1xi32>
      %245 = arith.cmpi slt, %12, %244 : vector<1x16x1xi32>
      %246 = arith.andi %243, %245 : vector<1x16x1xi1>
      %cst_110 = arith.constant 0.000000e+00 : f32
      %247 = vector.shape_cast %246 : vector<1x16x1xi1> to vector<1x16x1xi1>
      %248 = vector.broadcast %247 : vector<1x16x1xi1> to vector<8x16x128xi1>
      %249 = vector.broadcast %cst_110 : f32 to vector<8x16x128xf32>
      %250 = arith.select %248, %241, %249 : vector<8x16x128xi1>, vector<8x16x128xf32>
      %251 = arith.addf %201, %250 : vector<8x16x128xf32>
      %c2_i32_111 = arith.constant 2 : i32
      %252 = arith.addi %11, %c2_i32_111 : i32
      %253 = arith.index_cast %252 : i32 to index
      %c0_112 = arith.constant 0 : index
      %c0_113 = arith.constant 0 : index
      %254 = vector.load %arg10[%253, %c0_112, %c0_113] : memref<20x16x128xf32, #tpu.memory_space<vmem>>, vector<8x16x128xf32>
      %c0_114 = arith.constant 0 : index
      %c0_115 = arith.constant 0 : index
      %255 = vector.load %arg6[%c0_114, %c0_115] : memref<1x128xf32, #tpu.memory_space<vmem>>, vector<1x128xf32>
      %256 = vector.shape_cast %255 : vector<1x128xf32> to vector<1x1x128xf32>
      %257 = vector.broadcast %256 : vector<1x1x128xf32> to vector<8x16x128xf32>
      %258 = arith.addf %251, %257 : vector<8x16x128xf32>
      %259 = arith.mulf %258, %258 : vector<8x16x128xf32>
      %260 = arith.mulf %258, %259 : vector<8x16x128xf32>
      %cst_116 = arith.constant 4.471500e-02 : f32
      %261 = vector.broadcast %cst_116 : f32 to vector<8x16x128xf32>
      %262 = arith.mulf %261, %260 : vector<8x16x128xf32>
      %263 = arith.addf %258, %262 : vector<8x16x128xf32>
      %cst_117 = arith.constant 0.797884583 : f32
      %264 = vector.broadcast %cst_117 : f32 to vector<8x16x128xf32>
      %265 = arith.mulf %264, %263 : vector<8x16x128xf32>
      %266 = math.tanh %265 : vector<8x16x128xf32>
      %cst_118 = arith.constant 1.000000e+00 : f32
      %267 = vector.broadcast %cst_118 : f32 to vector<8x16x128xf32>
      %268 = arith.addf %267, %266 : vector<8x16x128xf32>
      %cst_119 = arith.constant 5.000000e-01 : f32
      %269 = vector.broadcast %cst_119 : f32 to vector<8x16x128xf32>
      %270 = arith.mulf %269, %268 : vector<8x16x128xf32>
      %271 = arith.mulf %258, %270 : vector<8x16x128xf32>
      %272 = arith.addf %254, %271 : vector<8x16x128xf32>
      %273 = vector.shape_cast %272 : vector<8x16x128xf32> to vector<128x128xf32>
      %274 = arith.truncf %273 : vector<128x128xf32> to vector<128x128xbf16>
      %c0_120 = arith.constant 0 : index
      %c0_121 = arith.constant 0 : index
      %275 = vector.load %arg7[%c0_120, %c0_121] : memref<128x16xbf16, #tpu.memory_space<vmem>>, vector<128x16xbf16>
      %cst_122 = arith.constant dense<0.000000e+00> : vector<128x16xf32>
      %276 = tpu.matmul %274, %275, %cst_122 {dimension_numbers = #tpu.dot_dimension_numbers<[1], [0], [0], [1], [0, 0, 1, 1], [], []>} : vector<128x128xbf16>, vector<128x16xbf16>, vector<128x16xf32> -> vector<128x16xf32>
      %c0_123 = arith.constant 0 : index
      %c0_124 = arith.constant 0 : index
      %277 = vector.load %arg8[%c0_123, %c0_124] : memref<1x16xf32, #tpu.memory_space<vmem>>, vector<1x16xf32>
      %278 = vector.broadcast %277 : vector<1x16xf32> to vector<128x16xf32>
      %279 = arith.addf %276, %278 : vector<128x16xf32>
      %280 = vector.shape_cast %279 : vector<128x16xf32> to vector<1x8x16x16xf32>
      %c0_125 = arith.constant 0 : index
      %c0_126 = arith.constant 0 : index
      %c0_127 = arith.constant 0 : index
      %c0_128 = arith.constant 0 : index
      %281 = vector.load %arg9[%c0_125, %c0_126, %c0_127, %c0_128] : memref<1x8x16x16xf32, #tpu.memory_space<vmem>>, vector<1x8x16x16xf32>
      tpu.vector_store %arg9[%c0_125, %c0_126, %c0_127, %c0_128], %280 {strides = array<i32>} : memref<1x8x16x16xf32, #tpu.memory_space<vmem>>, vector<1x8x16x16xf32>,
    } else {
    }
    return
  }
  func.func @transform_0(%arg0: i32, %arg1: i32) -> (i32, i32, i32, i32) {
    %c1_i32 = arith.constant 1 : i32
    %0 = arith.minsi %arg1, %c1_i32 : i32
    %c0_i32 = arith.constant 0 : i32
    %c0_i32_0 = arith.constant 0 : i32
    %c0_i32_1 = arith.constant 0 : i32
    return %arg0, %0, %c0_i32, %c0_i32_0 : i32, i32, i32, i32
  }
  func.func @transform_1(%arg0: i32, %arg1: i32) -> (i32, i32) {
    %c0_i32 = arith.constant 0 : i32
    %c0_i32_0 = arith.constant 0 : i32
    %c0_i32_1 = arith.constant 0 : i32
    return %c0_i32, %c0_i32_0 : i32, i32
  }
  func.func @transform_2(%arg0: i32, %arg1: i32) -> (i32, i32) {
    %c0_i32 = arith.constant 0 : i32
    %c0_i32_0 = arith.constant 0 : i32
    %c0_i32_1 = arith.constant 0 : i32
    return %c0_i32, %c0_i32_0 : i32, i32
  }
  func.func @transform_3(%arg0: i32, %arg1: i32) -> (i32, i32) {
    %c0_i32 = arith.constant 0 : i32
    %c0_i32_0 = arith.constant 0 : i32
    %c0_i32_1 = arith.constant 0 : i32
    return %c0_i32, %c0_i32_0 : i32, i32
  }
  func.func @transform_4(%arg0: i32, %arg1: i32) -> (i32, i32) {
    %c0_i32 = arith.constant 0 : i32
    %c0_i32_0 = arith.constant 0 : i32
    %c0_i32_1 = arith.constant 0 : i32
    return %c0_i32, %c0_i32_0 : i32, i32
  }
  func.func @transform_5(%arg0: i32, %arg1: i32) -> (i32, i32) {
    %c0_i32 = arith.constant 0 : i32
    %c0_i32_0 = arith.constant 0 : i32
    %c0_i32_1 = arith.constant 0 : i32
    return %c0_i32, %c0_i32_0 : i32, i32
  }
  func.func @transform_6(%arg0: i32, %arg1: i32) -> (i32, i32) {
    %c0_i32 = arith.constant 0 : i32
    %c0_i32_0 = arith.constant 0 : i32
    %c0_i32_1 = arith.constant 0 : i32
    return %c0_i32, %c0_i32_0 : i32, i32
  }
  func.func @transform_7(%arg0: i32, %arg1: i32) -> (i32, i32, i32, i32) {
    %c1_i32 = arith.constant 1 : i32
    %0 = arith.subi %arg1, %c1_i32 : i32
    %c0_i32 = arith.constant 0 : i32
    %1 = arith.maxsi %0, %c0_i32 : i32
    %c0_i32_0 = arith.constant 0 : i32
    %c0_i32_1 = arith.constant 0 : i32
    %c0_i32_2 = arith.constant 0 : i32
    return %arg0, %1, %c0_i32_0, %c0_i32_1 : i32, i32, i32, i32
  }
}

</mosaic_0001>

<bundles_post_ra>
// kernel: conv_ffn_forward.1
= control target key start
LH: loop header
LB: loop body
LE: loop exit
PB: predicated region body
PF: predicated region fallthrough
CT: control target
= control target key end

     0   :  { %s2787_s24 = smov 0   ;;  %s2789_s25 = smov 0   ;;  %s4634_s0 = inlined_call_operand.vmem [shape: bf16[2,16,16,16], index: 0, kind: input, shape index: {}]   ;;  %s4635_s1 = inlined_call_operand.vmem [shape: bf16[16,128], index: 1, kind: input, shape index: {}]   ;;  %s4636_s2 = inlined_call_operand.vmem [shape: f32[1,128], index: 2, kind: input, shape index: {}]   ;;  %s4637_s3 = inlined_call_operand.vmem [shape: f32[25,128], index: 3, kind: input, shape index: {}]   ;;  %s4638_s4 = inlined_call_operand.vmem [shape: f32[1,128], index: 4, kind: input, shape index: {}]   ;;  %s4639_s5 = inlined_call_operand.vmem [shape: bf16[128,16], index: 5, kind: input, shape index: {}]   ;;  %s4640_s6 = inlined_call_operand.vmem [shape: f32[1,16], index: 6, kind: input, shape index: {}]   ;;  %s4641_s7 = inlined_call_operand.vmem [shape: f32[2,16,16,16], index: 7, kind: output, shape index: {}]  }
   0x1   :  { %s2791_s26 = smov 0   ;;  %s2793_s27 = smov 0  }
   0x2   :  { %s2795_s28 = smov 0  }
   0x3 LB: > { %s26_s29 = sadd.s32 1, %s2736_s26  ;;  %s29_s30 = sadd.s32 1, %s2740_s27  ;;  %s2744_s28 = sphi %s2795_s28, %s17_s28   ;;  %s2740_s27 = sphi %s2793_s27, %s4693_s27   ;;  %s2736_s26 = sphi %s2791_s26, %s4692_s26   ;;  %s2732_s25 = sphi %s2789_s25, %s4691_s25   ;;  %s2728_s24 = sphi %s2787_s24, %s4690_s24  }
   0x4   : > { %p27_p0 = scmp.ge.s32.totalorder %s26_s29, 3  ;;  %p2307_p1 = scmp.ge.s32.totalorder %s2744_s28, 1 }
   0x5   : > { %p273_p2 = scmp.lt.s32.totalorder %s2744_s28, 7 }
   0x6   : > { %s4695_s29 = smov (%p27_p0, %s26_s29), 0  ;;  %s4697_s30 = smov (!%p27_p0, %s29_s30), %s2740_s27 }
   0x7   : > { %p274_p3 = pnand %p2307_p1, %p273_p2  ;;  %p31_p4 = scmp.ge.s32.totalorder %s4697_s30, 2 }
   0x8   : > { %p320_p5 = scmp.lt.s32.totalorder (!%p274_p3), %s2728_s24, 1  ;;  %p323_p6 = scmp.lt.s32.totalorder (!%p274_p3), %s2732_s25, 1 }
   0x9   : > { %s4699_s30 = smov (%p31_p4, %s4697_s30), 0  ;;  %277 = sbr.rel (%p274_p3) target bundleno = 703 (0x2bf), region = 48 }
   0xa   : > { %s2821_s8 = sadd.s32 (!%p274_p3), 4294967295, %s2728_s24  ;;  %p2317_p10 = scmp.ne.s32.totalorder (!%p274_p3), %s2728_s24, 0 }
   0xb   : > { %p336_p7 = scmp.gt.s32.totalorder (!%p274_p3), %s2821_s8, 0 }
   0xe   : > { %s321_s9 = scalar_select %p320_p5, %s2728_s24, 1 }
   0xf   : > { %s4701_s25 = smov (!%p323_p6, %s2732_s25), 1 }
  0x10   : > { %s2308_s10 = sshll.u32 %s321_s9, 3  ;;  %s2310_s11 = sshll.u32 %s4701_s25, 5 }
  0x11   : > { %p325_p8 = scmp.lt.s32.totalorder %s2308_s10, 15 }
  0x12   : > { %s337_s12 = scalar_select %p336_p7, %s2821_s8, 0 }
  0x13   : > { %s4703_s10 = smov (!%p325_p8, %s2308_s10), 15 }
  0x14   : > { %s2313_s13 = sshll.u32 %s337_s12, 3  ;;  %s2309_s14 = sshll.u32 %s4703_s10, 1 }
  0x15   : > { %p341_p9 = scmp.lt.s32.totalorder %s2313_s13, 15  ;;  %s329_s15 = sadd.s32 %s2310_s11, %s2309_s14 }
  0x16   : > { %s2311_s16 = sshll.u32 %s329_s15, 2 }
  0x17   : > { %s2829_s19 = scalar_lea.vmem %s4634_s0, %s2311_s16  ;;  %s4705_s13 = smov (!%p341_p9, %s2313_s13), 15 }
  0x18   : > { %s2314_s20 = sshll.u32 %s4705_s13, 1  ;;  %356 = sbr.rel (%p2317_p10) target bundleno = 38 (0x26), region = 52 }
  0x19   : > { %s345_s21 = sadd.s32 %s2314_s20, %s2310_s11 }
  0x1a   : > { %s2316_s22 = sshll.u32 %s345_s21, 3 }
  0x1b   : > { %s2834_s25 = scalar_lea.vmem %s4641_s7, %s2316_s22 }
  0x1d   : > { %v2746_v0 = vmov 0.0  }
  0x1e   : > { %357 = vst [vmem:[#allocation2] sm:$0xff] %v2746_v0 }
  0x1f   : > { %358 = vst [vmem:[#allocation2 + $0x8] sm:$0xff] %v2746_v0 }
  0x20   : > { %359 = vst [vmem:[#allocation2 + $0x10] sm:$0xff] %v2746_v0 }
  0x21   : > { %360 = vst [vmem:[#allocation2 + $0x18] sm:$0xff] %v2746_v0 }
  0x22   : > { %362 = vst [vmem:[#allocation2 + $0x120] sm:$0xff] %v2746_v0 }
  0x23   : > { %363 = vst [vmem:[#allocation2 + $0x128] sm:$0xff] %v2746_v0 }
  0x24   : > { %364 = vst [vmem:[#allocation2 + $0x130] sm:$0xff] %v2746_v0 }
  0x25   : > { %365 = vst [vmem:[#allocation2 + $0x138] sm:$0xff] %v2746_v0 }
  0x26 PF: > { %p2318_p11 = scmp.ge.s32.totalorder %s2728_s24, 2 }
  0x27   : > { %s2500_s14 = sshll.u32 (!%p2318_p11), %s2728_s24, 7 }
  0x28   : > { %369 = sbr.rel (%p2318_p11) target bundleno = 235 (0xeb), region = 56  ;;  %s2941_s15 = scalar_lea.vmem (!%p2318_p11), [#allocation2], %s2500_s14 }
  0x2d   : > { %v2499_v1 = vld [vmem:[%s4635_s1] sm:$0xff]  ;;  %v2493_v3 = vld [vmem:[%s2829_s19 + $0x10] sm:$0xff]  ;;  %vm438_vm0 = vcmask 130048   ;;  %v2492_v6 = vld [vmem:[%s2829_s19 + $0x8] sm:$0xff] }
  0x2e   : > { %v2491_v2 = vld [vmem:[%s2829_s19] sm:$0xff]  ;;  %470 = vmatpush.bf16.msra.mxu0 %v2499_v1  ;;  %2514 = vmatpush.bf16.msra.mxu1 %v2499_v1  ;;  %v2497_v5 = vld [vmem:[%s2829_s19 + $0x30] sm:$0xff]  ;;  %v2494_v7 = vld [vmem:[%s2829_s19 + $0x18] sm:$0xff] }
  0x2f   : > { %v2495_v4 = vld [vmem:[%s2829_s19 + $0x20] sm:$0xff]  ;;  %2515 = vmatpush.bf16.msra.mxu2 %v2499_v1  ;;  %2516 = vmatpush.bf16.msra.mxu3 %v2499_v1  ;;  %v2496_v8 = vld [vmem:[%s2829_s19 + $0x28] sm:$0xff]  ;;  %v2498_v9 = vld [vmem:[%s2829_s19 + $0x38] sm:$0xff] }
  0x30   : > { %v2860_v10 = vld [vmem:[%s4636_s2] ss:$0 sm:$0xff] }
  0x31   : > { %2355 = vmatmul.msk.bf16.vlgmr.msra.gmra.mxu0 %vm438_vm0, %v2491_v2  ;;  %2357 = vmatmul.msk.bf16.vlgmr.msra.gmra.mxu1 %vm438_vm0, %v2493_v3 }
  0x32   : > { %2359 = vmatmul.msk.bf16.vlgmr.msra.gmra.mxu2 %vm438_vm0, %v2495_v4  ;;  %2361 = vmatmul.msk.bf16.vlgmr.msra.gmra.mxu3 %vm438_vm0, %v2497_v5 }
  0x41   : > { %2356 = vmatmul.msk.bf16.gmra.mxu0 %vm438_vm0, %v2492_v6  ;;  %2358 = vmatmul.msk.bf16.gmra.mxu1 %vm438_vm0, %v2494_v7 }
  0x42   : > { %2360 = vmatmul.msk.bf16.gmra.mxu2 %vm438_vm0, %v2496_v8  ;;  %2362 = vmatmul.msk.bf16.gmra.mxu3 %vm438_vm0, %v2498_v9 }
  0xae   : > { %v472_v11 = vpop.f32.mrf.mxu0  ;;  %v482_v12 = vpop.f32.mrf.mxu1 }
  0xaf   : > { %v2863_v13 = vadd.f32 %v2860_v10, %v472_v11  ;;  %v2866_v14 = vadd.f32 %v2860_v10, %v482_v12 }
  0xb1   : > { %v512_v15 = vmul.f32 %v2863_v13, %v2863_v13  ;;  %v516_v16 = vmul.f32 %v2866_v14, %v2866_v14 }
  0xb3   : > { %v528_v17 = vmul.f32 %v512_v15, %v2863_v13  ;;  %v532_v18 = vmul.f32 %v516_v16, %v2866_v14 }
  0xb5   : > { %v544_v19 = vmul.f32 0.044715, %v528_v17  ;;  %v548_v20 = vmul.f32 0.044715, %v532_v18  ;;  %v492_v21 = vpop.f32.mrf.mxu2  ;;  %v502_v22 = vpop.f32.mrf.mxu3 }
  0xb6   : > { %v2875_v23 = vadd.f32 %v2860_v10, %v492_v21  ;;  %v2878_v24 = vadd.f32 %v2860_v10, %v502_v22  ;;  %v474_v25 = vpop.f32.mrf.mxu0  ;;  %v484_v26 = vpop.f32.mrf.mxu1 }
  0xb7   : > { %v560_v27 = vadd.f32 %v544_v19, %v2863_v13  ;;  %v564_v28 = vadd.f32 %v548_v20, %v2866_v14  ;;  %v2883_v29 = vadd.f32 %v2860_v10, %v474_v25  ;;  %v2886_v30 = vadd.f32 %v2860_v10, %v484_v26 }
  0xb8   : > { %v520_v31 = vmul.f32 %v2875_v23, %v2875_v23  ;;  %v524_v32 = vmul.f32 %v2878_v24, %v2878_v24 }
  0xb9   : > { %v576_v33 = vmul.f32 0.7978846, %v560_v27  ;;  %v580_v34 = vmul.f32 0.7978846, %v564_v28  ;;  %v513_v35 = vmul.f32 %v2883_v29, %v2883_v29  ;;  %v517_v36 = vmul.f32 %v2886_v30, %v2886_v30 }
  0xba   : > { %v536_v37 = vmul.f32 %v520_v31, %v2875_v23  ;;  %v540_v38 = vmul.f32 %v524_v32, %v2878_v24 }
  0xbb   : > { %2583 = vtanh.f32 %v576_v33  ;;  %v529_v39 = vmul.f32 %v513_v35, %v2883_v29  ;;  %v533_v40 = vmul.f32 %v517_v36, %v2886_v30 }
  0xbc   : > { %2585 = vtanh.f32 %v580_v34  ;;  %v552_v41 = vmul.f32 0.044715, %v536_v37  ;;  %v556_v42 = vmul.f32 0.044715, %v540_v38 }
  0xbd   : > { %v545_v43 = vmul.f32 0.044715, %v529_v39  ;;  %v549_v44 = vmul.f32 0.044715, %v533_v40  ;;  %v494_v45 = vpop.f32.mrf.mxu2  ;;  %v504_v46 = vpop.f32.mrf.mxu3 }
  0xbe   : > { %v568_v47 = vadd.f32 %v552_v41, %v2875_v23  ;;  %v572_v48 = vadd.f32 %v556_v42, %v2878_v24  ;;  %v2903_v49 = vadd.f32 %v2860_v10, %v494_v45  ;;  %v2906_v50 = vadd.f32 %v2860_v10, %v504_v46  ;;  %v477_v51 = vpop.f32.mrf.mxu0  ;;  %v487_v52 = vpop.f32.mrf.mxu1 }
  0xbf   : > { %v561_v53 = vadd.f32 %v545_v43, %v2883_v29  ;;  %v565_v54 = vadd.f32 %v549_v44, %v2886_v30  ;;  %v2911_v55 = vadd.f32 %v2860_v10, %v477_v51  ;;  %v2914_v56 = vadd.f32 %v2860_v10, %v487_v52 }
  0xc0   : > { %v584_v57 = vmul.f32 0.7978846, %v568_v47  ;;  %v588_v58 = vmul.f32 0.7978846, %v572_v48  ;;  %v521_v59 = vmul.f32 %v2903_v49, %v2903_v49  ;;  %v525_v60 = vmul.f32 %v2906_v50, %v2906_v50 }
  0xc1   : > { %v2584_v61 = vpop.eup %2583  ;;  %v577_v62 = vmul.f32 0.7978846, %v561_v53  ;;  %v581_v63 = vmul.f32 0.7978846, %v565_v54  ;;  %v514_v0 = vmul.f32 %v2911_v55, %v2911_v55  ;;  %v518_v1 = vmul.f32 %v2914_v56, %v2914_v56 }
  0xc2   : > { %v2586_v2 = vpop.eup %2585  ;;  %v608_v3 = vadd.f32 1.0, %v2584_v61  ;;  %2587 = vtanh.f32 %v584_v57  ;;  %v537_v4 = vmul.f32 %v521_v59, %v2903_v49  ;;  %v541_v5 = vmul.f32 %v525_v60, %v2906_v50 }
  0xc3   : > { %v612_v6 = vadd.f32 1.0, %v2586_v2  ;;  %2589 = vtanh.f32 %v588_v58  ;;  %v530_v7 = vmul.f32 %v514_v0, %v2911_v55  ;;  %v534_v8 = vmul.f32 %v518_v1, %v2914_v56 }
  0xc4   : > { %v624_v9 = vmul.f32 0.5, %v608_v3  ;;  %2591 = vtanh.f32 %v577_v62  ;;  %v553_v11 = vmul.f32 0.044715, %v537_v4  ;;  %v557_v12 = vmul.f32 0.044715, %v541_v5 }
  0xc5   : > { %v628_v15 = vmul.f32 0.5, %v612_v6  ;;  %2593 = vtanh.f32 %v581_v63  ;;  %v546_v16 = vmul.f32 0.044715, %v530_v7  ;;  %v550_v17 = vmul.f32 0.044715, %v534_v8  ;;  %v497_v18 = vpop.f32.mrf.mxu2  ;;  %v507_v19 = vpop.f32.mrf.mxu3 }
  0xc6   : > { %v640_v20 = vmul.f32 %v624_v9, %v2863_v13  ;;  %v569_v21 = vadd.f32 %v553_v11, %v2903_v49  ;;  %v573_v22 = vadd.f32 %v557_v12, %v2906_v50  ;;  %v2933_v25 = vadd.f32 %v2860_v10, %v497_v18  ;;  %v479_v26 = vpop.f32.mrf.mxu0  ;;  %v489_v54 = vpop.f32.mrf.mxu1 }
  0xc7   : > { %v644_v27 = vmul.f32 %v628_v15, %v2866_v14  ;;  %v562_v28 = vadd.f32 %v546_v16, %v2911_v55  ;;  %v566_v31 = vadd.f32 %v550_v17, %v2914_v56  ;;  %v2939_v32 = vadd.f32 %v2860_v10, %v507_v19 }
  0xc8   : > { %v2588_v33 = vpop.eup %2587  ;;  %2365 = vst [vmem:[%s2941_s15 + $0x20] sm:$0xff] %v640_v20  ;;  %v585_v13 = vmul.f32 0.7978846, %v569_v21  ;;  %v589_v34 = vmul.f32 0.7978846, %v573_v22  ;;  %v522_v35 = vmul.f32 %v2933_v25, %v2933_v25  ;;  %v2947_v14 = vadd.f32 %v2860_v10, %v479_v26 }
  0xc9   : > { %v2590_v36 = vpop.eup %2589  ;;  %2369 = vst [vmem:[%s2941_s15 + $0x40] sm:$0xff] %v644_v27  ;;  %v616_v37 = vadd.f32 1.0, %v2588_v33  ;;  %v578_v38 = vmul.f32 0.7978846, %v562_v28  ;;  %v582_v39 = vmul.f32 0.7978846, %v566_v31  ;;  %v526_v40 = vmul.f32 %v2939_v32, %v2939_v32 }
  0xca   : > { %v2592_v41 = vpop.eup %2591  ;;  %v620_v42 = vadd.f32 1.0, %v2590_v36  ;;  %2595 = vtanh.f32 %v585_v13  ;;  %v538_v43 = vmul.f32 %v522_v35, %v2933_v25  ;;  %v515_v44 = vmul.f32 %v2947_v14, %v2947_v14 }
  0xcb   : > { %v2594_v45 = vpop.eup %2593  ;;  %v632_v46 = vmul.f32 0.5, %v616_v37  ;;  %v609_v47 = vadd.f32 1.0, %v2592_v41  ;;  %2597 = vtanh.f32 %v589_v34  ;;  %v542_v48 = vmul.f32 %v526_v40, %v2939_v32 }
  0xcc   : > { %v636_v51 = vmul.f32 0.5, %v620_v42  ;;  %v613_v52 = vadd.f32 1.0, %v2594_v45  ;;  %2599 = vtanh.f32 %v578_v38  ;;  %v554_v53 = vmul.f32 0.044715, %v538_v43 }
  0xcd   : > { %v648_v57 = vmul.f32 %v632_v46, %v2875_v23  ;;  %v625_v58 = vmul.f32 0.5, %v609_v47  ;;  %2601 = vtanh.f32 %v582_v39  ;;  %v558_v59 = vmul.f32 0.044715, %v542_v48  ;;  %v499_v60 = vpop.f32.mrf.mxu2  ;;  %v509_v61 = vpop.f32.mrf.mxu3 }
  0xce   : > { %v652_v62 = vmul.f32 %v636_v51, %v2878_v24  ;;  %v629_v63 = vmul.f32 0.5, %v613_v52  ;;  %v570_v0 = vadd.f32 %v554_v53, %v2933_v25  ;;  %v531_v1 = vmul.f32 %v515_v44, %v2947_v14 }
  0xcf   : > { %2373 = vst [vmem:[%s2941_s15 + $0x60] sm:$0xff] %v648_v57  ;;  %v641_v2 = vmul.f32 %v625_v58, %v2883_v29  ;;  %v574_v3 = vadd.f32 %v558_v59, %v2939_v32  ;;  %v2964_v23 = vadd.f32 %v2860_v10, %v489_v54  ;;  %v2967_v4 = vadd.f32 %v2860_v10, %v499_v60 }
  0xd0   : > { %v2596_v5 = vpop.eup %2595  ;;  %2377 = vst [vmem:[%s2941_s15 + $0x80] sm:$0xff] %v652_v62  ;;  %v645_v24 = vmul.f32 %v629_v63, %v2886_v30  ;;  %v586_v6 = vmul.f32 0.7978846, %v570_v0  ;;  %v547_v7 = vmul.f32 0.044715, %v531_v1  ;;  %v2972_v8 = vadd.f32 %v2860_v10, %v509_v61 }
  0xd1   : > { %v2598_v9 = vpop.eup %2597  ;;  %2366 = vst [vmem:[%s2941_s15 + $0x28] sm:$0xff] %v641_v2  ;;  %v617_v29 = vadd.f32 1.0, %v2596_v5  ;;  %v590_v11 = vmul.f32 0.7978846, %v574_v3  ;;  %v519_v12 = vmul.f32 %v2964_v23, %v2964_v23  ;;  %v523_v15 = vmul.f32 %v2967_v4, %v2967_v4 }
  0xd2   : > { %v2600_v16 = vpop.eup %2599  ;;  %2370 = vst [vmem:[%s2941_s15 + $0x48] sm:$0xff] %v645_v24  ;;  %v621_v17 = vadd.f32 1.0, %v2598_v9  ;;  %2603 = vtanh.f32 %v586_v6  ;;  %v563_v30 = vadd.f32 %v547_v7, %v2947_v14  ;;  %v527_v10 = vmul.f32 %v2972_v8, %v2972_v8 }
  0xd3   : > { %v2602_v18 = vpop.eup %2601  ;;  %v633_v19 = vmul.f32 0.5, %v617_v29  ;;  %v610_v20 = vadd.f32 1.0, %v2600_v16  ;;  %2605 = vtanh.f32 %v590_v11  ;;  %v535_v21 = vmul.f32 %v519_v12, %v2964_v23 }
  0xd4   : > { %v637_v22 = vmul.f32 0.5, %v621_v17  ;;  %v614_v26 = vadd.f32 1.0, %v2602_v18  ;;  %v579_v27 = vmul.f32 0.7978846, %v563_v30  ;;  %v539_v28 = vmul.f32 %v523_v15, %v2967_v4 }
  0xd5   : > { %v649_v31 = vmul.f32 %v633_v19, %v2903_v49  ;;  %v626_v33 = vmul.f32 0.5, %v610_v20  ;;  %v551_v13 = vmul.f32 0.044715, %v535_v21  ;;  %v543_v34 = vmul.f32 %v527_v10, %v2972_v8 }
  0xd6   : > { %v653_v35 = vmul.f32 %v637_v22, %v2906_v50  ;;  %v630_v36 = vmul.f32 0.5, %v614_v26  ;;  %2607 = vtanh.f32 %v579_v27  ;;  %v555_v37 = vmul.f32 0.044715, %v539_v28 }
  0xd7   : > { %2374 = vst [vmem:[%s2941_s15 + $0x68] sm:$0xff] %v649_v31  ;;  %v642_v38 = vmul.f32 %v626_v33, %v2911_v55  ;;  %v567_v39 = vadd.f32 %v551_v13, %v2964_v23  ;;  %v559_v40 = vmul.f32 0.044715, %v543_v34 }
  0xd8   : > { %v2604_v41 = vpop.eup %2603  ;;  %2378 = vst [vmem:[%s2941_s15 + $0x88] sm:$0xff] %v653_v35  ;;  %v646_v49 = vmul.f32 %v630_v36, %v2914_v56  ;;  %v571_v42 = vadd.f32 %v555_v37, %v2967_v4 }
  0xd9   : > { %v2606_v43 = vpop.eup %2605  ;;  %2367 = vst [vmem:[%s2941_s15 + $0x30] sm:$0xff] %v642_v38  ;;  %v618_v44 = vadd.f32 1.0, %v2604_v41  ;;  %v583_v50 = vmul.f32 0.7978846, %v567_v39  ;;  %v575_v45 = vadd.f32 %v559_v40, %v2972_v8 }
  0xda   : > { %2371 = vst [vmem:[%s2941_s15 + $0x50] sm:$0xff] %v646_v49  ;;  %v622_v46 = vadd.f32 1.0, %v2606_v43  ;;  %v587_v55 = vmul.f32 0.7978846, %v571_v42 }
  0xdb   : > { %v634_v47 = vmul.f32 0.5, %v618_v44  ;;  %2609 = vtanh.f32 %v583_v50  ;;  %v591_v48 = vmul.f32 0.7978846, %v575_v45 }
  0xdc   : > { %v2608_v51 = vpop.eup %2607  ;;  %v638_v52 = vmul.f32 0.5, %v622_v46  ;;  %2611 = vtanh.f32 %v587_v55 }
  0xdd   : > { %v650_v56 = vmul.f32 %v634_v47, %v2933_v25  ;;  %v611_v53 = vadd.f32 1.0, %v2608_v51  ;;  %2613 = vtanh.f32 %v591_v48 }
  0xde   : > { %v654_v54 = vmul.f32 %v638_v52, %v2939_v32 }
  0xdf   : > { %2375 = vst [vmem:[%s2941_s15 + $0x70] sm:$0xff] %v650_v56  ;;  %v627_v57 = vmul.f32 0.5, %v611_v53 }
  0xe0   : > { %2379 = vst [vmem:[%s2941_s15 + $0x90] sm:$0xff] %v654_v54 }
  0xe1   : > { %v2610_v58 = vpop.eup %2609  ;;  %v643_v59 = vmul.f32 %v627_v57, %v2947_v14 }
  0xe2   : > { %v2612_v60 = vpop.eup %2611  ;;  %v615_v61 = vadd.f32 1.0, %v2610_v58 }
  0xe3   : > { %v2614_v62 = vpop.eup %2613  ;;  %2368 = vst [vmem:[%s2941_s15 + $0x38] sm:$0xff] %v643_v59  ;;  %v619_v63 = vadd.f32 1.0, %v2612_v60 }
  0xe4   : > { %v631_v0 = vmul.f32 0.5, %v615_v61  ;;  %v623_v25 = vadd.f32 1.0, %v2614_v62 }
  0xe5   : > { %v635_v1 = vmul.f32 0.5, %v619_v63 }
  0xe6   : > { %v647_v2 = vmul.f32 %v631_v0, %v2964_v23  ;;  %v639_v32 = vmul.f32 0.5, %v623_v25 }
  0xe7   : > { %v651_v3 = vmul.f32 %v635_v1, %v2967_v4 }
  0xe8   : > { %2372 = vst [vmem:[%s2941_s15 + $0x58] sm:$0xff] %v647_v2  ;;  %v655_v5 = vmul.f32 %v639_v32, %v2972_v8 }
  0xe9   : > { %2376 = vst [vmem:[%s2941_s15 + $0x78] sm:$0xff] %v651_v3 }
  0xea   : > { %2380 = vst [vmem:[%s2941_s15 + $0x98] sm:$0xff] %v655_v5 }
  0xeb PF: > { %p2381_p12 = scmp.le.s32.totalorder %s2728_s24, 0 }
  0xed   : > { %679 = sbr.rel (%p2381_p12) target bundleno = 703 (0x2bf), region = 60 }
  0xf2   : > { %v2513_v14 = vld [vmem:[%s4639_s5 + $0x38] sm:$0xff]  ;;  %v682_v24 = vlaneseq  ;;  %s2501_s18 = sshll.u32 %s2821_s8, 7  ;;  %v2512_v23 = vld [vmem:[%s4639_s5 + $0x30] sm:$0xff]  ;;  %v3028_v7 = vld [vmem:[%s4637_s3] ss:$0 sm:$0xff]  ;;  %vm2154_vm9 = vcmask 130048  }
  0xf3   : > { %2105 = vmatpush.bf16.msra.mxu0 %v2513_v14  ;;  %2517 = vmatpush.bf16.msra.mxu1 %v2513_v14  ;;  %s3017_s21 = scalar_lea.vmem [#allocation2], %s2501_s18  ;;  %v2511_v8 = vld [vmem:[%s4639_s5 + $0x28] sm:$0xff]  ;;  %v3048_v16 = vld [vmem:[%s4637_s3 + $0x5] ss:$0 sm:$0xff]  ;;  %v3105_v41 = vld [vmem:[%s4637_s3 + $0x14] ss:$0 sm:$0xff] }
  0xf4   : > { %v3020_v4 = vld [vmem:[%s3017_s21] sm:$0xff]  ;;  %2518 = vmatpush.bf16.msra.mxu2 %v2513_v14  ;;  %2519 = vmatpush.bf16.msra.mxu3 %v2513_v14  ;;  %v3023_v6 = vld [vmem:[%s3017_s21 + $0x8] sm:$0xff]  ;;  %v3033_v9 = vshrl.u32 %v682_v24, 7  ;;  %v3036_v29 = vld [vmem:[%s3017_s21 + $0x10] sm:$0xff]  ;;  %4668 = vst [vmem:[#allocation5_spill] sm:$0xff] %v3105_v41 }
  0xf5   : > { %v3039_v11 = vld [vmem:[%s3017_s21 + $0x18] sm:$0xff]  ;;  %v705_v12 = vmul.f32 %v3028_v7, %v3020_v4  ;;  %v706_v15 = vmul.f32 %v3028_v7, %v3023_v6  ;;  %v3051_v17 = vld [vmem:[%s3017_s21 + $0x20] sm:$0xff]  ;;  %v3054_v30 = vld [vmem:[%s3017_s21 + $0x28] sm:$0xff]  ;;  %v742_v21 = vmul.f32 %v3048_v16, %v3036_v29 }
  0xf6   : > { %v3059_v10 = vld [vmem:[%s4637_s3 + $0xa] ss:$0 sm:$0xff]  ;;  %v3062_v18 = vld [vmem:[%s3017_s21 + $0x30] sm:$0xff]  ;;  %v709_v19 = vmul.f32 %v3028_v7, %v3051_v17  ;;  %v710_v20 = vmul.f32 %v3028_v7, %v3054_v30  ;;  %v743_v22 = vmul.f32 %v3048_v16, %v3039_v11  ;;  %v3073_v26 = vld [vmem:[%s3017_s21 + $0x38] sm:$0xff]  ;;  %vm949_vm1 = vcmp.lt.s32.totalorder %v3033_v9, 2 }
  0xf7   : > { %2106 = vmatpush.bf16.msra.mxu0 %v2512_v23  ;;  %2520 = vmatpush.bf16.msra.mxu1 %v2512_v23  ;;  %4666 = vst [vmem:[#allocation3_spill] sm:$0xff] %v3059_v10  ;;  %v3078_v27 = vld [vmem:[%s4637_s3 + $0xf] ss:$0 sm:$0xff]  ;;  %v746_v28 = vmul.f32 %v3048_v16, %v3062_v18  ;;  %v2510_v31 = vld [vmem:[%s4639_s5 + $0x20] sm:$0xff]  ;;  %v795_v33 = vmul.f32 %v3059_v10, %v3051_v17  ;;  %vm966_vm2 = vcmp.ge.s32.totalorder %v3033_v9, 2  ;;  %v2509_v57 = vld [vmem:[%s4639_s5 + $0x18] sm:$0xff] }
  0xf8   : > { %2521 = vmatpush.bf16.msra.mxu2 %v2512_v23  ;;  %2522 = vmatpush.bf16.msra.mxu3 %v2512_v23  ;;  %4667 = vst [vmem:[#allocation4_spill] sm:$0xff] %v3078_v27  ;;  %v796_v13 = vmul.f32 %v3059_v10, %v3054_v30  ;;  %v3090_v34 = vld [vmem:[%s3017_s21 + $0x40] sm:$0xff]  ;;  %v747_v35 = vmul.f32 %v3048_v16, %v3073_v26  ;;  %v3100_v40 = vld [vmem:[%s3017_s21 + $0x48] sm:$0xff]  ;;  %v3136_v48 = vld [vmem:[%s4637_s3 + $0x10] ss:$0 sm:$0xff]  ;;  %vm1162_vm3 = vcmp.lt.s32.totalorder %v3033_v9, 1 }
  0xf9   : > { %v758_v36 = vadd.f32 %v742_v21, %v705_v12  ;;  %v759_v37 = vadd.f32 %v743_v22, %v706_v15  ;;  %v848_v38 = vmul.f32 %v3078_v27, %v3062_v18  ;;  %v849_v39 = vmul.f32 %v3078_v27, %v3073_v26  ;;  %v3111_v49 = vld [vmem:[%s4637_s3 + $0x1] ss:$0 sm:$0xff]  ;;  %v3116_v42 = vld [vmem:[%s4637_s3 + $0x6] ss:$0 sm:$0xff]  ;;  %v3131_v47 = vld [vmem:[%s4637_s3 + $0xb] ss:$0 sm:$0xff] }
  0xfa   : > { %v3118_v43 = vadd.f32 %v746_v28, %v709_v19  ;;  %v3120_v44 = vadd.f32 %v747_v35, %v710_v20  ;;  %v3124_v50 = vmul.f32 %v3059_v10, %v3090_v34  ;;  %v901_v55 = vmul.f32 %v3105_v41, %v3090_v34  ;;  %v3149_v54 = vld [vmem:[%s4637_s3 + $0x15] ss:$0 sm:$0xff]  ;;  %v3161_v62 = vld [vmem:[%s4637_s3 + $0x2] ss:$0 sm:$0xff]  ;;  %v3170_v1 = vld [vmem:[%s4637_s3 + $0x7] ss:$0 sm:$0xff] }
  0xfb   : > { %2107 = vmatpush.bf16.msra.mxu0 %v2511_v8  ;;  %2523 = vmatpush.bf16.msra.mxu1 %v2511_v8  ;;  %v811_v45 = vadd.f32 %v795_v33, %v758_v36  ;;  %v812_v46 = vadd.f32 %v796_v13, %v759_v37  ;;  %v902_v51 = vmul.f32 %v3105_v41, %v3100_v40  ;;  %v3189_v21 = vld [vmem:[%s4637_s3 + $0x11] ss:$0 sm:$0xff]  ;;  %vm1179_vm4 = vcmp.ge.s32.totalorder %v3033_v9, 1  ;;  %v3202_v13 = vld [vmem:[%s4637_s3 + $0x16] ss:$0 sm:$0xff] }
  0xfc   : > { %2524 = vmatpush.bf16.msra.mxu2 %v2511_v8  ;;  %2525 = vmatpush.bf16.msra.mxu3 %v2511_v8  ;;  %v994_v52 = vmul.f32 %v3111_v49, %v3020_v4  ;;  %v995_v56 = vmul.f32 %v3111_v49, %v3023_v6  ;;  %v1012_v53 = vmul.f32 %v3116_v42, %v3036_v29  ;;  %v3182_v8 = vld [vmem:[%s4637_s3 + $0xc] ss:$0 sm:$0xff]  ;;  %v2508_v22 = vld [vmem:[%s4639_s5 + $0x10] sm:$0xff]  ;;  %vm1561_vm5 = vcmp.lt.s32.totalorder %v3033_v9, 7 }
  0xfd   : > { %v864_v58 = vadd.f32 %v848_v38, %v811_v45  ;;  %v865_v59 = vadd.f32 %v849_v39, %v812_v46  ;;  %v1013_v60 = vmul.f32 %v3116_v42, %v3039_v11  ;;  %v1046_v61 = vmul.f32 %v3131_v47, %v3051_v17  ;;  %v3211_v38 = vld [vmem:[%s4637_s3 + $0x3] ss:$0 sm:$0xff] }
  0xfe   : > { %v1028_v63 = vadd.f32 %v1012_v53, %v994_v52  ;;  %v1047_v0 = vmul.f32 %v3131_v47, %v3054_v30  ;;  %v1080_v25 = vmul.f32 %v3136_v48, %v3062_v18  ;;  %v1081_v14 = vmul.f32 %v3136_v48, %v3073_v26 }
  0xff   : > { %2108 = vmatpush.bf16.msra.mxu0 %v2510_v31  ;;  %2526 = vmatpush.bf16.msra.mxu1 %v2510_v31  ;;  %v917_v2 = vadd.f32 %v901_v55, %v864_v58  ;;  %v918_v32 = vadd.f32 %v902_v51, %v865_v59  ;;  %v1029_v3 = vadd.f32 %v1013_v60, %v995_v56  ;;  %v3220_v51 = vld [vmem:[%s4637_s3 + $0x8] ss:$0 sm:$0xff]  ;;  %v3231_v58 = vld [vmem:[%s4637_s3 + $0xd] ss:$0 sm:$0xff]  ;;  %vm1790_vm7 = vcmp.lt.s32.totalorder %v3033_v9, 6 }
 0x100   : > { %2527 = vmatpush.bf16.msra.mxu2 %v2510_v31  ;;  %2528 = vmatpush.bf16.msra.mxu3 %v2510_v31  ;;  %v1062_v5 = vadd.f32 %v1046_v61, %v1028_v63  ;;  %v1114_v24 = vmul.f32 %v3149_v54, %v3090_v34  ;;  %v1115_v23 = vmul.f32 %v3149_v54, %v3100_v40  ;;  %v2507_v59 = vld [vmem:[%s4639_s5 + $0x8] sm:$0xff] }
 0x101   : > { %v933_v12 = vrot.slane %v917_v2, 6  ;;  %v941_v15 = vrot.slane %v918_v32, 6  ;;  %v1063_v19 = vadd.f32 %v1047_v0, %v1029_v3  ;;  %v1223_v20 = vmul.f32 %v3161_v62, %v3020_v4 }
 0x102   : > { %v1096_v28 = vadd.f32 %v1080_v25, %v1062_v5  ;;  %v1224_v31 = vmul.f32 %v3161_v62, %v3023_v6  ;;  %v1241_v33 = vmul.f32 %v3170_v1, %v3036_v29  ;;  %v1242_v46 = vmul.f32 %v3170_v1, %v3039_v11 }
 0x103   : > { %2109 = vmatpush.bf16.msra.mxu0 %v2509_v57  ;;  %2529 = vmatpush.bf16.msra.mxu1 %v2509_v57  ;;  %v950_v35 = vsel %vm949_vm1, %v933_v12, %v941_v15  ;;  %v958_v36 = vsel %vm949_vm1, %v941_v15, %v933_v12  ;;  %v1097_v37 = vadd.f32 %v1081_v14, %v1063_v19  ;;  %v3253_v12 = vld [vmem:[%s4637_s3 + $0x12] ss:$0 sm:$0xff] }
 0x104   : > { %2530 = vmatpush.bf16.msra.mxu2 %v2509_v57  ;;  %2531 = vmatpush.bf16.msra.mxu3 %v2509_v57  ;;  %v976_v39 = vsel %vm966_vm2, %v958_v36, 0.0  ;;  %v1130_v45 = vadd.f32 %v1114_v24, %v1096_v28  ;;  %v1257_v55 = vadd.f32 %v1241_v33, %v1223_v20  ;;  %v1275_v56 = vmul.f32 %v3182_v8, %v3051_v17  ;;  %v3264_v28 = vld [vmem:[%s4637_s3 + $0x17] ss:$0 sm:$0xff] }
 0x105   : > { %v1131_v52 = vadd.f32 %v1115_v23, %v1097_v37  ;;  %v1276_v53 = vmul.f32 %v3182_v8, %v3054_v30  ;;  %v1309_v57 = vmul.f32 %v3189_v21, %v3062_v18  ;;  %v1258_v61 = vadd.f32 %v1242_v46, %v1224_v31  ;;  %v2506_v31 = vld [vmem:[%s4639_s5] sm:$0xff] }
 0x106   : > { %v1146_v60 = vrot.slane %v1130_v45, 7  ;;  %v1310_v63 = vmul.f32 %v3189_v21, %v3073_v26  ;;  %v1343_v0 = vmul.f32 %v3202_v13, %v3090_v34  ;;  %v1291_v2 = vadd.f32 %v1275_v56, %v1257_v55 }
 0x107   : > { %2110 = vmatpush.bf16.msra.mxu0 %v2508_v22  ;;  %2532 = vmatpush.bf16.msra.mxu1 %v2508_v22  ;;  %v1154_v25 = vrot.slane %v1131_v52, 7  ;;  %v1344_v32 = vmul.f32 %v3202_v13, %v3100_v40  ;;  %v1393_v3 = vmul.f32 %v3211_v38, %v3020_v4  ;;  %v1292_v5 = vadd.f32 %v1276_v53, %v1258_v61  ;;  %v3277_v53 = vld [vmem:[%s4637_s3 + $0x4] ss:$0 sm:$0xff]  ;;  %v3291_v61 = vld [vmem:[%s4637_s3 + $0xe] ss:$0 sm:$0xff] }
 0x108   : > { %2533 = vmatpush.bf16.msra.mxu2 %v2508_v22  ;;  %2534 = vmatpush.bf16.msra.mxu3 %v2508_v22  ;;  %v1394_v14 = vmul.f32 %v3211_v38, %v3023_v6  ;;  %v1411_v24 = vmul.f32 %v3220_v51, %v3036_v29  ;;  %v1412_v23 = vmul.f32 %v3220_v51, %v3039_v11  ;;  %v3272_v46 = vadd.s32 8, %v3033_v9 }
 0x109   : > { %v1163_v15 = vsel %vm1162_vm3, %v1146_v60, %v1154_v25  ;;  %v1171_v19 = vsel %vm1162_vm3, %v1154_v25, %v1146_v60  ;;  %v1325_v20 = vadd.f32 %v1309_v57, %v1291_v2  ;;  %v1445_v22 = vmul.f32 %v3231_v58, %v3051_v17  ;;  %4669 = vst [vmem:[#allocation6_spill] sm:$0xff] %v3277_v53  ;;  %v3282_v57 = vld [vmem:[%s4637_s3 + $0x9] ss:$0 sm:$0xff] }
 0x10a   : > { %v1189_v33 = vsel %vm1179_vm4, %v1171_v19, 0.0  ;;  %v1206_v36 = vadd.f32 %v1163_v15, %v950_v35  ;;  %v1326_v37 = vadd.f32 %v1310_v63, %v1292_v5  ;;  %v1427_v45 = vadd.f32 %v1411_v24, %v1393_v3  ;;  %v3308_v24 = vld [vmem:[%s4637_s3 + $0x18] ss:$0 sm:$0xff] }
 0x10b   : > { %2111 = vmatpush.bf16.msra.mxu0 %v2507_v59  ;;  %2535 = vmatpush.bf16.msra.mxu1 %v2507_v59  ;;  %v1205_v55 = vadd.f32 %v1189_v33, %v976_v39  ;;  %v1359_v52 = vadd.f32 %v1343_v0, %v1325_v20  ;;  %v1428_v56 = vadd.f32 %v1412_v23, %v1394_v14  ;;  %vm1581_vm6 = vcmp.lt.s32.totalorder %v3272_v46, 15 }
 0x10c   : > { %2536 = vmatpush.bf16.msra.mxu2 %v2507_v59  ;;  %2537 = vmatpush.bf16.msra.mxu3 %v2507_v59  ;;  %v1360_v35 = vadd.f32 %v1344_v32, %v1326_v37  ;;  %v1446_v59 = vmul.f32 %v3231_v58, %v3054_v30  ;;  %v1461_v60 = vadd.f32 %v1445_v22, %v1427_v45  ;;  %v3302_v32 = vld [vmem:[%s4637_s3 + $0x13] ss:$0 sm:$0xff]  ;;  %vm1810_vm8 = vcmp.lt.s32.totalorder %v3272_v46, 14 }
 0x10d   : > { %v1479_v39 = vmul.f32 %v3253_v12, %v3062_v18  ;;  %v1375_v63 = vadd.f32 %v1359_v52, %v1205_v55  ;;  %v1480_v0 = vmul.f32 %v3253_v12, %v3073_v26  ;;  %v1513_v25 = vmul.f32 %v3264_v28, %v3090_v34 }
 0x10e   : > { %v1514_v2 = vmul.f32 %v3264_v28, %v3100_v40  ;;  %v1376_v3 = vadd.f32 %v1360_v35, %v1206_v36  ;;  %v1462_v5 = vadd.f32 %v1446_v59, %v1428_v56  ;;  %v1622_v23 = vmul.f32 %v3277_v53, %v3020_v4 }
 0x10f   : > { %2112 = vmatpush.bf16.msra.mxu0 %v2506_v31  ;;  %2538 = vmatpush.bf16.msra.mxu1 %v2506_v31  ;;  %v1495_v14 = vadd.f32 %v1479_v39, %v1461_v60  ;;  %v1623_v15 = vmul.f32 %v3277_v53, %v3023_v6  ;;  %v1640_v19 = vmul.f32 %v3282_v57, %v3036_v29  ;;  %v3338_v60 = vld [vmem:[%s3017_s21 + $0x50] sm:$0xff]  ;;  %v3341_v39 = vld [vmem:[%s3017_s21 + $0x58] sm:$0xff] }
 0x110   : > { %2539 = vmatpush.bf16.msra.mxu2 %v2506_v31  ;;  %2540 = vmatpush.bf16.msra.mxu3 %v2506_v31  ;;  %v1496_v20 = vadd.f32 %v1480_v0, %v1462_v5  ;;  %v1641_v33 = vmul.f32 %v3282_v57, %v3039_v11  ;;  %v1674_v31 = vmul.f32 %v3291_v61, %v3051_v17 }
 0x111   : > { %v1529_v22 = vadd.f32 %v1513_v25, %v1495_v14  ;;  %v1656_v36 = vadd.f32 %v1640_v19, %v1622_v23  ;;  %v1675_v4 = vmul.f32 %v3291_v61, %v3054_v30  ;;  %v1708_v6 = vmul.f32 %v3302_v32, %v3062_v18  ;;  %4670 = vst [vmem:[#allocation7_spill] sm:$0xff] %v3338_v60  ;;  %v3348_v14 = vld [vmem:[%s3017_s21 + $0x60] sm:$0xff]  ;;  %v3351_v23 = vld [vmem:[%s3017_s21 + $0x68] sm:$0xff] }
 0x112   : > { %v1709_v29 = vmul.f32 %v3302_v32, %v3073_v26  ;;  %v1530_v37 = vadd.f32 %v1514_v2, %v1496_v20  ;;  %v1657_v45 = vadd.f32 %v1641_v33, %v1623_v15  ;;  %v1742_v55 = vmul.f32 %v3308_v24, %v3090_v34 }
 0x113   : > { %v1545_v11 = vrot.slane %v1529_v22, 1  ;;  %v1690_v52 = vadd.f32 %v1674_v31, %v1656_v36  ;;  %v1743_v56 = vmul.f32 %v3308_v24, %v3100_v40  ;;  %v800_v35 = vmul.f32 %v3059_v10, %v3100_v40 }
 0x114   : > { %v815_v59 = vadd.f32 %v3124_v50, %v3118_v43  ;;  %v1553_v0 = vrot.slane %v1530_v37, 1  ;;  %v1691_v25 = vadd.f32 %v1675_v4, %v1657_v45  ;;  %v852_v2 = vmul.f32 %v3078_v27, %v3338_v60 }
 0x115   : > { %v853_v5 = vmul.f32 %v3078_v27, %v3341_v39  ;;  %v1724_v15 = vadd.f32 %v1708_v6, %v1690_v52  ;;  %v816_v19 = vadd.f32 %v800_v35, %v3120_v44  ;;  %v905_v43 = vmul.f32 %v3105_v41, %v3348_v14 }
 0x116   : > { %v906_v50 = vmul.f32 %v3105_v41, %v3351_v23  ;;  %v1562_v20 = vsel %vm1561_vm5, %v1545_v11, %v1553_v0  ;;  %v1570_v22 = vsel %vm1561_vm5, %v1553_v0, %v1545_v11  ;;  %v1725_v33 = vadd.f32 %v1709_v29, %v1691_v25 }
 0x117   : > { %v868_v31 = vadd.f32 %v852_v2, %v815_v59  ;;  %v1589_v36 = vsel %vm1581_vm6, %v1570_v22, 0.0  ;;  %v1604_v4 = vadd.f32 %v1562_v20, %v1375_v63  ;;  %v1758_v6 = vadd.f32 %v1742_v55, %v1724_v15  ;;  %v3377_v55 = vld [vmem:[%s4638_s4] ss:$0 sm:$0xff] }
 0x118   : > { %v869_v44 = vadd.f32 %v853_v5, %v816_v19  ;;  %v1605_v37 = vadd.f32 %v1589_v36, %v1376_v3  ;;  %v1759_v45 = vadd.f32 %v1743_v56, %v1725_v33  ;;  %v998_v35 = vmul.f32 %v3111_v49, %v3051_v17 }
 0x119   : > { %v921_v52 = vadd.f32 %v905_v43, %v868_v31  ;;  %v1774_v41 = vrot.slane %v1758_v6, 2  ;;  %v999_v10 = vmul.f32 %v3111_v49, %v3054_v30  ;;  %v1016_v29 = vmul.f32 %v3116_v42, %v3062_v18 }
 0x11a   : > { %v922_v27 = vadd.f32 %v906_v50, %v869_v44  ;;  %v1782_v11 = vrot.slane %v1759_v45, 2  ;;  %v1017_v63 = vmul.f32 %v3116_v42, %v3073_v26  ;;  %v1050_v3 = vmul.f32 %v3131_v47, %v3090_v34 }
 0x11b   : > { %v935_v59 = vrot.slane %v921_v52, 6  ;;  %v1032_v0 = vadd.f32 %v1016_v29, %v998_v35  ;;  %v1051_v25 = vmul.f32 %v3131_v47, %v3100_v40  ;;  %v1084_v2 = vmul.f32 %v3136_v48, %v3338_v60 }
 0x11c   : > { %v943_v56 = vrot.slane %v922_v27, 6  ;;  %v1791_v5 = vsel %vm1790_vm7, %v1774_v41, %v1782_v11  ;;  %v1799_v15 = vsel %vm1790_vm7, %v1782_v11, %v1774_v41  ;;  %v1033_v19 = vadd.f32 %v1017_v63, %v999_v10 }
 0x11d   : > { %v1085_v43 = vmul.f32 %v3136_v48, %v3341_v39  ;;  %v1818_v27 = vsel %vm1810_vm8, %v1799_v15, 0.0  ;;  %v1833_v50 = vadd.f32 %v1791_v5, %v1604_v4  ;;  %v1066_v36 = vadd.f32 %v1050_v3, %v1032_v0 }
 0x11e   : > { %v952_v20 = vsel %vm949_vm1, %v935_v59, %v943_v56  ;;  %v960_v22 = vsel %vm949_vm1, %v943_v56, %v935_v59  ;;  %v1834_v33 = vadd.f32 %v1818_v27, %v1605_v37  ;;  %v1067_v41 = vadd.f32 %v1051_v25, %v1033_v19 }
 0x11f   : > { %v980_v31 = vsel %vm966_vm2, %v960_v22, 0.0  ;;  %v3398_v10 = vadd.f32 %v3377_v55, %v1833_v50  ;;  %v1118_v6 = vmul.f32 %v3149_v54, %v3348_v14  ;;  %v1119_v4 = vmul.f32 %v3149_v54, %v3351_v23 }
 0x120   : > { %v1227_v44 = vmul.f32 %v3161_v62, %v3051_v17  ;;  %v3407_v45 = vadd.f32 %v3377_v55, %v1834_v33  ;;  %v1100_v37 = vadd.f32 %v1084_v2, %v1066_v36  ;;  %v1101_v52 = vadd.f32 %v1085_v43, %v1067_v41 }
 0x121   : > { %v1228_v35 = vmul.f32 %v3161_v62, %v3054_v30  ;;  %v1869_v29 = vmul.f32 %v3398_v10, %v3398_v10  ;;  %v1245_v11 = vmul.f32 %v3170_v1, %v3062_v18  ;;  %v1246_v59 = vmul.f32 %v3170_v1, %v3073_v26 }
 0x122   : > { %v1279_v63 = vmul.f32 %v3182_v8, %v3090_v34  ;;  %v1870_v3 = vmul.f32 %v3407_v45, %v3407_v45  ;;  %v1134_v56 = vadd.f32 %v1118_v6, %v1100_v37  ;;  %v1135_v0 = vadd.f32 %v1119_v4, %v1101_v52 }
 0x123   : > { %v1280_v25 = vmul.f32 %v3182_v8, %v3100_v40  ;;  %v1885_v2 = vmul.f32 %v1869_v29, %v3398_v10  ;;  %v1261_v5 = vadd.f32 %v1245_v11, %v1227_v44  ;;  %v1262_v15 = vadd.f32 %v1246_v59, %v1228_v35 }
 0x124   : > { %v1313_v19 = vmul.f32 %v3189_v21, %v3338_v60  ;;  %v1886_v43 = vmul.f32 %v1870_v3, %v3407_v45  ;;  %v1148_v27 = vrot.slane %v1134_v56, 7  ;;  %v1156_v50 = vrot.slane %v1135_v0, 7 }
 0x125   : > { %v1314_v22 = vmul.f32 %v3189_v21, %v3341_v39  ;;  %v1901_v33 = vmul.f32 0.044715, %v1885_v2  ;;  %v1295_v36 = vadd.f32 %v1279_v63, %v1261_v5  ;;  %v1296_v41 = vadd.f32 %v1280_v25, %v1262_v15 }
 0x126   : > { %v1347_v6 = vmul.f32 %v3202_v13, %v3348_v14  ;;  %v1902_v4 = vmul.f32 0.044715, %v1886_v43  ;;  %v1165_v44 = vsel %vm1162_vm3, %v1148_v27, %v1156_v50  ;;  %v1173_v37 = vsel %vm1162_vm3, %v1156_v50, %v1148_v27 }
 0x127   : > { %v1348_v52 = vmul.f32 %v3202_v13, %v3351_v23  ;;  %v1917_v35 = vadd.f32 %v1901_v33, %v3398_v10  ;;  %v1193_v29 = vsel %vm1179_vm4, %v1173_v37, 0.0  ;;  %v1210_v11 = vadd.f32 %v1165_v44, %v952_v20 }
 0x128   : > { %v1329_v59 = vadd.f32 %v1313_v19, %v1295_v36  ;;  %v1918_v63 = vadd.f32 %v1902_v4, %v3407_v45  ;;  %v1209_v3 = vadd.f32 %v1193_v29, %v980_v31  ;;  %v1330_v56 = vadd.f32 %v1314_v22, %v1296_v41 }
 0x129   : > { %v1397_v0 = vmul.f32 %v3211_v38, %v3051_v17  ;;  %v1933_v25 = vmul.f32 0.7978846, %v1917_v35  ;;  %v1398_v5 = vmul.f32 %v3211_v38, %v3054_v30  ;;  %v1415_v15 = vmul.f32 %v3220_v51, %v3062_v18 }
 0x12a   : > { %v1363_v2 = vadd.f32 %v1347_v6, %v1329_v59  ;;  %v1934_v43 = vmul.f32 0.7978846, %v1918_v63  ;;  %v1364_v27 = vadd.f32 %v1348_v52, %v1330_v56  ;;  %v1416_v20 = vmul.f32 %v3220_v51, %v3073_v26 }
 0x12b   : > { %v1449_v31 = vmul.f32 %v3231_v58, %v3090_v34  ;;  %2642 = vtanh.f32 %v1933_v25  ;;  %v1431_v50 = vadd.f32 %v1415_v15, %v1397_v0  ;;  %v1450_v22 = vmul.f32 %v3231_v58, %v3100_v40 }
 0x12c   : > { %v1379_v19 = vadd.f32 %v1363_v2, %v1209_v3  ;;  %2644 = vtanh.f32 %v1934_v43  ;;  %v1380_v33 = vadd.f32 %v1364_v27, %v1210_v11  ;;  %v1432_v36 = vadd.f32 %v1416_v20, %v1398_v5 }
 0x12d   : > { %v1483_v41 = vmul.f32 %v3253_v12, %v3338_v60  ;;  %v1465_v6 = vadd.f32 %v1449_v31, %v1431_v50  ;;  %v1484_v4 = vmul.f32 %v3253_v12, %v3341_v39  ;;  %v1517_v44 = vmul.f32 %v3264_v28, %v3348_v14 }
 0x12e   : > { %v1518_v37 = vmul.f32 %v3264_v28, %v3351_v23  ;;  %v1466_v52 = vadd.f32 %v1450_v22, %v1432_v36  ;;  %v1626_v35 = vmul.f32 %v3277_v53, %v3051_v17  ;;  %v1627_v29 = vmul.f32 %v3277_v53, %v3054_v30 }
 0x12f   : > { %v1644_v11 = vmul.f32 %v3282_v57, %v3062_v18  ;;  %v1499_v59 = vadd.f32 %v1483_v41, %v1465_v6  ;;  %v1645_v63 = vmul.f32 %v3282_v57, %v3073_v26  ;;  %v1678_v3 = vmul.f32 %v3291_v61, %v3090_v34 }
 0x130   : > { %v1679_v56 = vmul.f32 %v3291_v61, %v3100_v40  ;;  %v1500_v0 = vadd.f32 %v1484_v4, %v1466_v52  ;;  %v1712_v2 = vmul.f32 %v3302_v32, %v3338_v60  ;;  %v1713_v5 = vmul.f32 %v3302_v32, %v3341_v39 }
 0x131   : > { %v1660_v25 = vadd.f32 %v1644_v11, %v1626_v35  ;;  %v2643_v15 = vpop.eup %2642  ;;  %v1533_v18 = vadd.f32 %v1517_v44, %v1499_v59  ;;  %v1661_v43 = vadd.f32 %v1645_v63, %v1627_v29  ;;  %v1746_v26 = vmul.f32 %v3308_v24, %v3348_v14 }
 0x132   : > { %v1747_v27 = vmul.f32 %v3308_v24, %v3351_v23  ;;  %v2645_v20 = vpop.eup %2644  ;;  %v1965_v31 = vadd.f32 1.0, %v2643_v15  ;;  %v1534_v50 = vadd.f32 %v1518_v37, %v1500_v0  ;;  %v713_v36 = vmul.f32 %v3028_v7, %v3090_v34 }
 0x133   : > { %v1694_v22 = vadd.f32 %v1678_v3, %v1660_v25  ;;  %v1966_v41 = vadd.f32 1.0, %v2645_v20  ;;  %v1547_v6 = vrot.slane %v1533_v18, 1  ;;  %v1695_v4 = vadd.f32 %v1679_v56, %v1661_v43  ;;  %v4671_v3 = vld [vmem:[#allocation3_spill] sm:$0xff] }
 0x134   : > { %v714_v44 = vmul.f32 %v3028_v7, %v3100_v40  ;;  %v1981_v52 = vmul.f32 0.5, %v1965_v31  ;;  %v1555_v35 = vrot.slane %v1534_v50, 1  ;;  %v750_v11 = vmul.f32 %v3048_v16, %v3338_v60 }
 0x135   : > { %v1728_v29 = vadd.f32 %v1712_v2, %v1694_v22  ;;  %v1982_v59 = vmul.f32 0.5, %v1966_v41  ;;  %v1729_v63 = vadd.f32 %v1713_v5, %v1695_v4  ;;  %v751_v37 = vmul.f32 %v3048_v16, %v3341_v39 }
 0x136   : > { %v803_v0 = vmul.f32 %v4671_v3, %v3348_v14  ;;  %v1997_v25 = vmul.f32 %v1981_v52, %v3398_v10  ;;  %v1564_v56 = vsel %vm1561_vm5, %v1547_v6, %v1555_v35  ;;  %v1572_v2 = vsel %vm1561_vm5, %v1555_v35, %v1547_v6  ;;  %v3504_v6 = vld [vmem:[%s3017_s21 + $0x70] sm:$0xff]  ;;  %v3510_v35 = vld [vmem:[%s3017_s21 + $0x80] sm:$0xff] }
 0x137   : > { %v1762_v15 = vadd.f32 %v1746_v26, %v1728_v29  ;;  %v1998_v5 = vmul.f32 %v1982_v59, %v3407_v45  ;;  %v1593_v18 = vsel %vm1581_vm6, %v1572_v2, 0.0  ;;  %v1608_v43 = vadd.f32 %v1564_v56, %v1379_v19  ;;  %v3507_v45 = vld [vmem:[%s3017_s21 + $0x78] sm:$0xff] }
 0x138   : > { %v1763_v20 = vadd.f32 %v1747_v27, %v1729_v63  ;;  %v2013_v31 = vadd.f32 %v3051_v17, %v1997_v25  ;;  %v1609_v10 = vadd.f32 %v1593_v18, %v1380_v33  ;;  %v766_v22 = vadd.f32 %v750_v11, %v713_v36  ;;  %v4672_v17 = vld [vmem:[#allocation4_spill] sm:$0xff] }
 0x139   : > { %v1776_v50 = vrot.slane %v1762_v15, 2  ;;  %v2014_v41 = vadd.f32 %v3054_v30, %v1998_v5  ;;  %v767_v52 = vadd.f32 %v751_v37, %v714_v44  ;;  %v804_v26 = vmul.f32 %v4671_v3, %v3351_v23  ;;  %v4673_v30 = vld [vmem:[#allocation5_spill] sm:$0xff]  ;;  %v3523_v63 = vld [vmem:[%s3017_s21 + $0x88] sm:$0xff] }
 0x13a   : > { %v1784_v4 = vrot.slane %v1763_v20, 2  ;;  %v819_v19 = vadd.f32 %v803_v0, %v766_v22  ;;  %v856_v33 = vmul.f32 %v4672_v17, %v3504_v6  ;;  %v857_v27 = vmul.f32 %v4672_v17, %v3507_v45 }
 0x13b   : > { %v909_v36 = vmul.f32 %v4673_v30, %v3510_v35  ;;  %v2029_v44 = vpack.c.bf16 %v2014_v41, %v2013_v31  ;;  %v820_v59 = vadd.f32 %v804_v26, %v767_v52  ;;  %v910_v56 = vmul.f32 %v4673_v30, %v3523_v63 }
 0x13c   : > { %v1793_v29 = vsel %vm1790_vm7, %v1776_v50, %v1784_v4  ;;  %v1801_v11 = vsel %vm1790_vm7, %v1784_v4, %v1776_v50  ;;  %v872_v25 = vadd.f32 %v856_v33, %v819_v19  ;;  %v1002_v5 = vmul.f32 %v3111_v49, %v3090_v34 }
 0x13d   : > { %v1822_v37 = vsel %vm1810_vm8, %v1801_v11, 0.0  ;;  %v1837_v0 = vadd.f32 %v1793_v29, %v1608_v43  ;;  %2113 = vmatmul.bf16.vlgmr.msra.gmra.mxu0 %v2029_v44  ;;  %v873_v15 = vadd.f32 %v857_v27, %v820_v59  ;;  %v1003_v18 = vmul.f32 %v3111_v49, %v3100_v40 }
 0x13e   : > { %v1838_v2 = vadd.f32 %v1822_v37, %v1609_v10  ;;  %v925_v31 = vadd.f32 %v909_v36, %v872_v25  ;;  %v1020_v43 = vmul.f32 %v3116_v42, %v3338_v60  ;;  %v1021_v50 = vmul.f32 %v3116_v42, %v3341_v39 }
 0x13f   : > { %v3534_v20 = vadd.f32 %v3377_v55, %v1837_v0  ;;  %v926_v10 = vadd.f32 %v910_v56, %v873_v15  ;;  %v1054_v41 = vmul.f32 %v3131_v47, %v3348_v14  ;;  %v1055_v4 = vmul.f32 %v3131_v47, %v3351_v23 }
 0x140   : > { %v3541_v22 = vadd.f32 %v3377_v55, %v1838_v2  ;;  %v937_v26 = vrot.slane %v925_v31, 6  ;;  %v1036_v19 = vadd.f32 %v1020_v43, %v1002_v5  ;;  %v1037_v33 = vadd.f32 %v1021_v50, %v1003_v18 }
 0x141   : > { %v1873_v52 = vmul.f32 %v3534_v20, %v3534_v20  ;;  %v945_v36 = vrot.slane %v926_v10, 6  ;;  %v1088_v44 = vmul.f32 %v3136_v48, %v3504_v6  ;;  %v1089_v29 = vmul.f32 %v3136_v48, %v3507_v45 }
 0x142   : > { %v1874_v27 = vmul.f32 %v3541_v22, %v3541_v22  ;;  %v1070_v59 = vadd.f32 %v1054_v41, %v1036_v19  ;;  %v1071_v37 = vadd.f32 %v1055_v4, %v1037_v33  ;;  %v1122_v0 = vmul.f32 %v3149_v54, %v3510_v35 }
 0x143   : > { %v1889_v11 = vmul.f32 %v1873_v52, %v3534_v20  ;;  %v954_v56 = vsel %vm949_vm1, %v937_v26, %v945_v36  ;;  %v962_v2 = vsel %vm949_vm1, %v945_v36, %v937_v26  ;;  %v1123_v15 = vmul.f32 %v3149_v54, %v3523_v63 }
 0x144   : > { %v1890_v25 = vmul.f32 %v1874_v27, %v3541_v22  ;;  %v984_v18 = vsel %vm966_vm2, %v962_v2, 0.0  ;;  %v1104_v31 = vadd.f32 %v1088_v44, %v1070_v59  ;;  %v1105_v43 = vadd.f32 %v1089_v29, %v1071_v37 }
 0x145   : > { %v1905_v5 = vmul.f32 0.044715, %v1889_v11  ;;  %v1231_v10 = vmul.f32 %v3161_v62, %v3090_v34  ;;  %v1232_v41 = vmul.f32 %v3161_v62, %v3100_v40  ;;  %v1249_v4 = vmul.f32 %v3170_v1, %v3338_v60 }
 0x146   : > { %v1906_v50 = vmul.f32 0.044715, %v1890_v25  ;;  %v1138_v26 = vadd.f32 %v1122_v0, %v1104_v31  ;;  %v1139_v19 = vadd.f32 %v1123_v15, %v1105_v43  ;;  %v1250_v33 = vmul.f32 %v3170_v1, %v3341_v39 }
 0x147   : > { %v1921_v52 = vadd.f32 %v1905_v5, %v3534_v20  ;;  %v1265_v36 = vadd.f32 %v1249_v4, %v1231_v10  ;;  %v1283_v44 = vmul.f32 %v3182_v8, %v3348_v14  ;;  %v1284_v29 = vmul.f32 %v3182_v8, %v3351_v23 }
 0x148   : > { %v1922_v27 = vadd.f32 %v1906_v50, %v3541_v22  ;;  %v1150_v59 = vrot.slane %v1138_v26, 7  ;;  %v1158_v37 = vrot.slane %v1139_v19, 7  ;;  %v1266_v25 = vadd.f32 %v1250_v33, %v1232_v41 }
 0x149   : > { %v1937_v11 = vmul.f32 0.7978846, %v1921_v52  ;;  %v1299_v5 = vadd.f32 %v1283_v44, %v1265_v36  ;;  %v1317_v0 = vmul.f32 %v3189_v21, %v3504_v6  ;;  %v1318_v15 = vmul.f32 %v3189_v21, %v3507_v45 }
 0x14a   : > { %v1938_v2 = vmul.f32 0.7978846, %v1922_v27  ;;  %v1167_v31 = vsel %vm1162_vm3, %v1150_v59, %v1158_v37  ;;  %v1175_v43 = vsel %vm1162_vm3, %v1158_v37, %v1150_v59  ;;  %v1300_v50 = vadd.f32 %v1284_v29, %v1266_v25 }
 0x14b   : > { %2646 = vtanh.f32 %v1937_v11  ;;  %v1197_v10 = vsel %vm1179_vm4, %v1175_v43, 0.0  ;;  %v1214_v41 = vadd.f32 %v1167_v31, %v954_v56  ;;  %v1333_v4 = vadd.f32 %v1317_v0, %v1299_v5 }
 0x14c   : > { %2648 = vtanh.f32 %v1938_v2  ;;  %v1213_v52 = vadd.f32 %v1197_v10, %v984_v18  ;;  %v1334_v26 = vadd.f32 %v1318_v15, %v1300_v50  ;;  %v1351_v19 = vmul.f32 %v3202_v13, %v3510_v35 }
 0x14d   : > { %v1352_v33 = vmul.f32 %v3202_v13, %v3523_v63  ;;  %v1401_v27 = vmul.f32 %v3211_v38, %v3090_v34  ;;  %v1402_v36 = vmul.f32 %v3211_v38, %v3100_v40  ;;  %v1419_v44 = vmul.f32 %v3220_v51, %v3338_v60 }
 0x14e   : > { %v1420_v56 = vmul.f32 %v3220_v51, %v3341_v39  ;;  %v1367_v18 = vadd.f32 %v1351_v19, %v1333_v4  ;;  %v1453_v11 = vmul.f32 %v3231_v58, %v3348_v14  ;;  %v1454_v59 = vmul.f32 %v3231_v58, %v3351_v23 }
 0x14f   : > { %v1368_v29 = vadd.f32 %v1352_v33, %v1334_v26  ;;  %v1435_v37 = vadd.f32 %v1419_v44, %v1401_v27  ;;  %v1487_v2 = vmul.f32 %v3253_v12, %v3504_v6  ;;  %v1488_v5 = vmul.f32 %v3253_v12, %v3507_v45 }
 0x150   : > { %v1436_v25 = vadd.f32 %v1420_v56, %v1402_v36  ;;  %v1383_v15 = vadd.f32 %v1367_v18, %v1213_v52  ;;  %v1521_v43 = vmul.f32 %v3264_v28, %v3510_v35  ;;  %v1522_v50 = vmul.f32 %v3264_v28, %v3523_v63 }
 0x151   : > { %v2647_v0 = vpop.eup %2646  ;;  %v1384_v31 = vadd.f32 %v1368_v29, %v1214_v41  ;;  %v1469_v26 = vadd.f32 %v1453_v11, %v1435_v37  ;;  %v1630_v33 = vmul.f32 %v3277_v53, %v3090_v34  ;;  %v1631_v36 = vmul.f32 %v3277_v53, %v3100_v40 }
 0x152   : > { %v2649_v10 = vpop.eup %2648  ;;  %v1969_v4 = vadd.f32 1.0, %v2647_v0  ;;  %v1470_v19 = vadd.f32 %v1454_v59, %v1436_v25  ;;  %v1648_v41 = vmul.f32 %v3282_v57, %v3338_v60  ;;  %v1649_v52 = vmul.f32 %v3282_v57, %v3341_v39 }
 0x153   : > { %v1970_v27 = vadd.f32 1.0, %v2649_v10  ;;  %v1503_v56 = vadd.f32 %v1487_v2, %v1469_v26  ;;  %v1682_v29 = vmul.f32 %v3291_v61, %v3348_v14  ;;  %v1683_v25 = vmul.f32 %v3291_v61, %v3351_v23 }
 0x154   : > { %v1985_v44 = vmul.f32 0.5, %v1969_v4  ;;  %v1504_v18 = vadd.f32 %v1488_v5, %v1470_v19  ;;  %v1664_v59 = vadd.f32 %v1648_v41, %v1630_v33  ;;  %v1665_v37 = vadd.f32 %v1649_v52, %v1631_v36 }
 0x155   : > { %v1986_v11 = vmul.f32 0.5, %v1970_v27  ;;  %v1537_v10 = vadd.f32 %v1521_v43, %v1503_v56  ;;  %v1716_v60 = vmul.f32 %v3302_v32, %v3504_v6  ;;  %v1717_v26 = vmul.f32 %v3302_v32, %v3507_v45 }
 0x156   : > { %v2001_v0 = vmul.f32 %v1985_v44, %v3534_v20  ;;  %v1538_v53 = vadd.f32 %v1522_v50, %v1504_v18  ;;  %v1698_v2 = vadd.f32 %v1682_v29, %v1664_v59  ;;  %v1699_v5 = vadd.f32 %v1683_v25, %v1665_v37  ;;  %v3653_v29 = vld [vmem:[%s3017_s21 + $0x98] sm:$0xff] }
 0x157   : > { %v2002_v4 = vmul.f32 %v1986_v11, %v3541_v22  ;;  %v1549_v33 = vrot.slane %v1537_v10, 1  ;;  %v1750_v20 = vmul.f32 %v3308_v24, %v3510_v35  ;;  %v1751_v22 = vmul.f32 %v3308_v24, %v3523_v63 }
 0x158   : > { %v2017_v19 = vadd.f32 %v3090_v34, %v2001_v0  ;;  %v1557_v27 = vrot.slane %v1538_v53, 1  ;;  %v1732_v50 = vadd.f32 %v1716_v60, %v1698_v2  ;;  %v1733_v36 = vadd.f32 %v1717_v26, %v1699_v5  ;;  %v3660_v0 = vld [vmem:[%s3017_s21 + $0xa0] sm:$0xff] }
 0x159   : > { %v2018_v43 = vadd.f32 %v3100_v40, %v2002_v4  ;;  %v717_v53 = vmul.f32 %v3028_v7, %v3348_v14  ;;  %v718_v52 = vmul.f32 %v3028_v7, %v3351_v23  ;;  %v3648_v40 = vld [vmem:[%s3017_s21 + $0x90] sm:$0xff]  ;;  %v754_v37 = vmul.f32 %v3048_v16, %v3504_v6  ;;  %v3663_v7 = vld [vmem:[%s3017_s21 + $0xa8] sm:$0xff] }
 0x15a   : > { %v1566_v41 = vsel %vm1561_vm5, %v1549_v33, %v1557_v27  ;;  %v1574_v34 = vsel %vm1561_vm5, %v1557_v27, %v1549_v33  ;;  %v1766_v18 = vadd.f32 %v1750_v20, %v1732_v50  ;;  %v1767_v59 = vadd.f32 %v1751_v22, %v1733_v36 }
 0x15b   : > { %v2031_v60 = vpack.c.bf16 %v2018_v43, %v2017_v19  ;;  %v1597_v44 = vsel %vm1581_vm6, %v1574_v34, 0.0  ;;  %v1612_v56 = vadd.f32 %v1566_v41, %v1383_v15  ;;  %v755_v25 = vmul.f32 %v3048_v16, %v3507_v45 }
 0x15c   : > { %v1613_v11 = vadd.f32 %v1597_v44, %v1384_v31  ;;  %v1778_v10 = vrot.slane %v1766_v18, 2  ;;  %v807_v15 = vmul.f32 %v4671_v3, %v3510_v35  ;;  %v808_v4 = vmul.f32 %v4671_v3, %v3523_v63 }
 0x15d   : > { %2123 = vmatmul.bf16.vlgmr.msra.gmra.mxu1 %v2031_v60  ;;  %v860_v31 = vmul.f32 %v4672_v17, %v3648_v40  ;;  %v1786_v2 = vrot.slane %v1767_v59, 2  ;;  %v770_v5 = vadd.f32 %v754_v37, %v717_v53  ;;  %v771_v26 = vadd.f32 %v755_v25, %v718_v52 }
 0x15e   : > { %v861_v16 = vmul.f32 %v4672_v17, %v3653_v29  ;;  %v913_v19 = vmul.f32 %v4673_v30, %v3660_v0  ;;  %v914_v33 = vmul.f32 %v4673_v30, %v3663_v7  ;;  %v1006_v27 = vmul.f32 %v3111_v49, %v3348_v14 }
 0x15f   : > { %v1007_v3 = vmul.f32 %v3111_v49, %v3351_v23  ;;  %v1795_v20 = vsel %vm1790_vm7, %v1778_v10, %v1786_v2  ;;  %v1803_v43 = vsel %vm1790_vm7, %v1786_v2, %v1778_v10  ;;  %v823_v50 = vadd.f32 %v807_v15, %v770_v5 }
 0x160   : > { %v824_v17 = vadd.f32 %v808_v4, %v771_v26  ;;  %v1826_v36 = vsel %vm1810_vm8, %v1803_v43, 0.0  ;;  %v1841_v22 = vadd.f32 %v1795_v20, %v1612_v56  ;;  %v1024_v30 = vmul.f32 %v3116_v42, %v3504_v6 }
 0x161   : > { %v1025_v41 = vmul.f32 %v3116_v42, %v3507_v45  ;;  %v1842_v34 = vadd.f32 %v1826_v36, %v1613_v11  ;;  %v876_v49 = vadd.f32 %v860_v31, %v823_v50  ;;  %v1058_v52 = vmul.f32 %v3131_v47, %v3510_v35 }
 0x162   : > { %v877_v53 = vadd.f32 %v861_v16, %v824_v17  ;;  %v3694_v60 = vadd.f32 %v3377_v55, %v1841_v22  ;;  %v1040_v44 = vadd.f32 %v1024_v30, %v1006_v27  ;;  %v1059_v56 = vmul.f32 %v3131_v47, %v3523_v63 }
 0x163   : > { %v1041_v18 = vadd.f32 %v1025_v41, %v1007_v3  ;;  %v3699_v59 = vadd.f32 %v3377_v55, %v1842_v34  ;;  %v929_v37 = vadd.f32 %v913_v19, %v876_v49  ;;  %v1092_v42 = vmul.f32 %v3136_v48, %v3648_v40 }
 0x164   : > { %v930_v25 = vadd.f32 %v914_v33, %v877_v53  ;;  %v1877_v11 = vmul.f32 %v3694_v60, %v3694_v60  ;;  %v1074_v10 = vadd.f32 %v1058_v52, %v1040_v44  ;;  %v1093_v4 = vmul.f32 %v3136_v48, %v3653_v29 }
 0x165   : > { %v1075_v15 = vadd.f32 %v1059_v56, %v1041_v18  ;;  %v1878_v31 = vmul.f32 %v3699_v59, %v3699_v59  ;;  %v939_v47 = vrot.slane %v929_v37, 6  ;;  %v1126_v5 = vmul.f32 %v3149_v54, %v3660_v0 }
 0x166   : > { %v947_v2 = vrot.slane %v930_v25, 6  ;;  %v1893_v26 = vmul.f32 %v1877_v11, %v3694_v60  ;;  %v1108_v16 = vadd.f32 %v1092_v42, %v1074_v10  ;;  %v1127_v33 = vmul.f32 %v3149_v54, %v3663_v7 }
 0x167   : > { %v1109_v19 = vadd.f32 %v1093_v4, %v1075_v15  ;;  %v1894_v27 = vmul.f32 %v1878_v31, %v3699_v59  ;;  %v1235_v20 = vmul.f32 %v3161_v62, %v3348_v14  ;;  %v1236_v54 = vmul.f32 %v3161_v62, %v3351_v23 }
 0x168   : > { %v956_v48 = vsel %vm949_vm1, %v939_v47, %v947_v2  ;;  %v964_v3 = vsel %vm949_vm1, %v947_v2, %v939_v47  ;;  %v1909_v43 = vmul.f32 0.044715, %v1893_v26  ;;  %v1142_v17 = vadd.f32 %v1126_v5, %v1108_v16 }
 0x169   : > { %v988_v50 = vsel %vm966_vm2, %v964_v3, 0.0  ;;  %v1143_v36 = vadd.f32 %v1127_v33, %v1109_v19  ;;  %v1910_v22 = vmul.f32 0.044715, %v1894_v27  ;;  %v1253_v30 = vmul.f32 %v3170_v1, %v3504_v6 }
 0x16a   : > { %v1254_v41 = vmul.f32 %v3170_v1, %v3507_v45  ;;  %v1925_v34 = vadd.f32 %v1909_v43, %v3694_v60  ;;  %v1152_v49 = vrot.slane %v1142_v17, 7  ;;  %v1287_v52 = vmul.f32 %v3182_v8, %v3510_v35 }
 0x16b   : > { %v1160_v53 = vrot.slane %v1143_v36, 7  ;;  %v1926_v44 = vadd.f32 %v1910_v22, %v3699_v59  ;;  %v1269_v18 = vadd.f32 %v1253_v30, %v1235_v20  ;;  %v1288_v62 = vmul.f32 %v3182_v8, %v3523_v63 }
 0x16c   : > { %v1270_v56 = vadd.f32 %v1254_v41, %v1236_v54  ;;  %v1941_v37 = vmul.f32 0.7978846, %v1925_v34  ;;  %v1321_v42 = vmul.f32 %v3189_v21, %v3648_v40  ;;  %v1322_v8 = vmul.f32 %v3189_v21, %v3653_v29 }
 0x16d   : > { %v1169_v25 = vsel %vm1162_vm3, %v1152_v49, %v1160_v53  ;;  %v1177_v1 = vsel %vm1162_vm3, %v1160_v53, %v1152_v49  ;;  %v1942_v11 = vmul.f32 0.7978846, %v1926_v44  ;;  %v1303_v4 = vadd.f32 %v1287_v52, %v1269_v18 }
 0x16e   : > { %v1201_v10 = vsel %vm1179_vm4, %v1177_v1, 0.0  ;;  %v1218_v15 = vadd.f32 %v1169_v25, %v956_v48  ;;  %2650 = vtanh.f32 %v1941_v37  ;;  %v1304_v47 = vadd.f32 %v1288_v62, %v1270_v56 }
 0x16f   : > { %v1217_v31 = vadd.f32 %v1201_v10, %v988_v50  ;;  %2652 = vtanh.f32 %v1942_v11  ;;  %v1337_v2 = vadd.f32 %v1321_v42, %v1303_v4  ;;  %v1355_v5 = vmul.f32 %v3202_v13, %v3660_v0 }
 0x170   : > { %v1356_v26 = vmul.f32 %v3202_v13, %v3663_v7  ;;  %v1338_v16 = vadd.f32 %v1322_v8, %v1304_v47  ;;  %v1405_v19 = vmul.f32 %v3211_v38, %v3348_v14  ;;  %v1406_v33 = vmul.f32 %v3211_v38, %v3351_v23 }
 0x171   : > { %v1423_v27 = vmul.f32 %v3220_v51, %v3504_v6  ;;  %v1371_v48 = vadd.f32 %v1355_v5, %v1337_v2  ;;  %v1424_v21 = vmul.f32 %v3220_v51, %v3507_v45  ;;  %v1457_v3 = vmul.f32 %v3231_v58, %v3510_v35  ;;  %v3787_v5 = vld [vmem:[%s3017_s21 + $0x10] sm:$0xff] }
 0x172   : > { %v1458_v13 = vmul.f32 %v3231_v58, %v3523_v63  ;;  %v1372_v20 = vadd.f32 %v1356_v26, %v1338_v16  ;;  %v1491_v50 = vmul.f32 %v3253_v12, %v3648_v40  ;;  %v1492_v38 = vmul.f32 %v3253_v12, %v3653_v29  ;;  %v4674_v58 = vld [vmem:[#allocation6_spill] sm:$0xff]  ;;  %v3793_v26 = vld [vmem:[%s3017_s21 + $0x20] sm:$0xff] }
 0x173   : > { %v1439_v43 = vadd.f32 %v1423_v27, %v1405_v19  ;;  %v1387_v17 = vadd.f32 %v1371_v48, %v1217_v31  ;;  %v1440_v36 = vadd.f32 %v1424_v21, %v1406_v33  ;;  %v1525_v22 = vmul.f32 %v3264_v28, %v3660_v0 }
 0x174   : > { %v1526_v51 = vmul.f32 %v3264_v28, %v3663_v7  ;;  %v2651_v54 = vpop.eup %2650  ;;  %v1388_v30 = vadd.f32 %v1372_v20, %v1218_v15  ;;  %v1634_v34 = vmul.f32 %v4674_v58, %v3348_v14  ;;  %v1635_v49 = vmul.f32 %v4674_v58, %v3351_v23 }
 0x175   : > { %v1473_v41 = vadd.f32 %v1457_v3, %v1439_v43  ;;  %v2653_v53 = vpop.eup %2652  ;;  %v1973_v52 = vadd.f32 1.0, %v2651_v54  ;;  %v1474_v12 = vadd.f32 %v1458_v13, %v1440_v36  ;;  %v1652_v44 = vmul.f32 %v3282_v57, %v3504_v6  ;;  %v3802_v3 = vld [vmem:[%s3017_s21 + $0x28] sm:$0xff] }
 0x176   : > { %v1653_v18 = vmul.f32 %v3282_v57, %v3507_v45  ;;  %v1974_v56 = vadd.f32 1.0, %v2653_v53  ;;  %v1686_v62 = vmul.f32 %v3291_v61, %v3510_v35  ;;  %v1687_v37 = vmul.f32 %v3291_v61, %v3523_v63  ;;  %v3790_v61 = vld [vmem:[%s3017_s21 + $0x18] sm:$0xff] }
 0x177   : > { %v1507_v28 = vadd.f32 %v1491_v50, %v1473_v41  ;;  %v1989_v25 = vmul.f32 0.5, %v1973_v52  ;;  %v1508_v1 = vadd.f32 %v1492_v38, %v1474_v12  ;;  %v1668_v42 = vadd.f32 %v1652_v44, %v1634_v34  ;;  %v3833_v53 = vld [vmem:[%s3017_s21 + $0x38] sm:$0xff]  ;;  %v3836_v52 = vld [vmem:[%s3017_s21 + $0x40] sm:$0xff]  ;;  %v3841_v44 = vld [vmem:[%s4637_s3 + $0xa] ss:$0 sm:$0xff] }
 0x178   : > { %v1669_v11 = vadd.f32 %v1653_v18, %v1635_v49  ;;  %v1990_v10 = vmul.f32 0.5, %v1974_v56  ;;  %v1720_v57 = vmul.f32 %v3302_v32, %v3648_v40  ;;  %v1721_v4 = vmul.f32 %v3302_v32, %v3653_v29  ;;  %v3830_v49 = vld [vmem:[%s3017_s21 + $0x30] sm:$0xff]  ;;  %v3848_v18 = vld [vmem:[%s3017_s21 + $0x48] sm:$0xff] }
 0x179   : > { %v1541_v15 = vadd.f32 %v1525_v22, %v1507_v28  ;;  %v2005_v31 = vmul.f32 %v1989_v25, %v3694_v60  ;;  %v1542_v47 = vadd.f32 %v1526_v51, %v1508_v1  ;;  %v1702_v8 = vadd.f32 %v1686_v62, %v1668_v42  ;;  %v3853_v56 = vld [vmem:[%s4637_s3 + $0xf] ss:$0 sm:$0xff]  ;;  %v3866_v1 = vld [vmem:[%s4637_s3 + $0x14] ss:$0 sm:$0xff]  ;;  %v4675_v42 = vld [vmem:[#allocation7_spill] sm:$0xff] }
 0x17a   : > { %v1703_v2 = vadd.f32 %v1687_v37, %v1669_v11  ;;  %v2006_v16 = vmul.f32 %v1990_v10, %v3699_v59  ;;  %v1754_v33 = vmul.f32 %v3308_v24, %v3660_v0  ;;  %v1755_v32 = vmul.f32 %v3308_v24, %v3663_v7  ;;  %v3808_v59 = vld [vmem:[%s4637_s3] ss:$0 sm:$0xff] }
 0x17b   : > { %v1551_v19 = vrot.slane %v1541_v15, 1  ;;  %v2021_v60 = vadd.f32 %v3348_v14, %v2005_v31  ;;  %v1559_v27 = vrot.slane %v1542_v47, 1  ;;  %v1736_v48 = vadd.f32 %v1720_v57, %v1702_v8  ;;  %v3817_v14 = vld [vmem:[%s4637_s3 + $0x5] ss:$0 sm:$0xff]  ;;  %v3877_v8 = vld [vmem:[%s4637_s3 + $0x1] ss:$0 sm:$0xff] }
 0x17c   : > { %v1737_v21 = vadd.f32 %v1721_v4, %v1703_v2  ;;  %v2022_v13 = vadd.f32 %v3351_v23, %v2006_v16  ;;  %v707_v0 = vmul.f32 %v3808_v59, %v3787_v5  ;;  %v708_v24 = vmul.f32 %v3808_v59, %v3790_v61 }
 0x17d   : > { %v744_v23 = vmul.f32 %v3817_v14, %v3793_v26  ;;  %v1568_v7 = vsel %vm1561_vm5, %v1551_v19, %v1559_v27  ;;  %v1576_v20 = vsel %vm1561_vm5, %v1559_v27, %v1551_v19  ;;  %v1770_v43 = vadd.f32 %v1754_v33, %v1736_v48 }
 0x17e   : > { %v1771_v50 = vadd.f32 %v1755_v32, %v1737_v21  ;;  %v2033_v38 = vpack.c.bf16 %v2022_v13, %v2021_v60  ;;  %v1601_v36 = vsel %vm1581_vm6, %v1576_v20, 0.0  ;;  %v1616_v22 = vadd.f32 %v1568_v7, %v1387_v17  ;;  %v3889_v60 = vld [vmem:[%s4637_s3 + $0x6] ss:$0 sm:$0xff]  ;;  %v3901_v13 = vld [vmem:[%s4637_s3 + $0xb] ss:$0 sm:$0xff] }
 0x17f   : > { %v745_v51 = vmul.f32 %v3817_v14, %v3802_v3  ;;  %v1617_v54 = vadd.f32 %v1601_v36, %v1388_v30  ;;  %v1780_v41 = vrot.slane %v1770_v43, 2  ;;  %v760_v34 = vadd.f32 %v744_v23, %v707_v0 }
 0x180   : > { %v1788_v58 = vrot.slane %v1771_v50, 2  ;;  %2133 = vmatmul.bf16.vlgmr.msra.gmra.mxu2 %v2033_v38  ;;  %v797_v17 = vmul.f32 %v3841_v44, %v3830_v49  ;;  %v798_v30 = vmul.f32 %v3841_v44, %v3833_v53  ;;  %v850_v28 = vmul.f32 %v3853_v56, %v3836_v52  ;;  %v3914_v38 = vld [vmem:[%s4637_s3 + $0x10] ss:$0 sm:$0xff] }
 0x181   : > { %v761_v12 = vadd.f32 %v745_v51, %v708_v24  ;;  %v851_v25 = vmul.f32 %v3853_v56, %v3848_v18  ;;  %v903_v11 = vmul.f32 %v3866_v1, %v4675_v42  ;;  %v904_v47 = vmul.f32 %v3866_v1, %v3341_v39 }
 0x182   : > { %v1797_v62 = vsel %vm1790_vm7, %v1780_v41, %v1788_v58  ;;  %v1805_v37 = vsel %vm1790_vm7, %v1788_v58, %v1780_v41  ;;  %v813_v57 = vadd.f32 %v797_v17, %v760_v34  ;;  %v996_v2 = vmul.f32 %v3877_v8, %v3787_v5  ;;  %v3925_v17 = vld [vmem:[%s4637_s3 + $0x15] ss:$0 sm:$0xff] }
 0x183   : > { %v1830_v10 = vsel %vm1810_vm8, %v1805_v37, 0.0  ;;  %v1845_v15 = vadd.f32 %v1797_v62, %v1616_v22  ;;  %v814_v4 = vadd.f32 %v798_v30, %v761_v12  ;;  %v997_v16 = vmul.f32 %v3877_v8, %v3790_v61 }
 0x184   : > { %v1846_v31 = vadd.f32 %v1830_v10, %v1617_v54  ;;  %v866_v33 = vadd.f32 %v850_v28, %v813_v57  ;;  %v1014_v27 = vmul.f32 %v3889_v60, %v3793_v26  ;;  %v1015_v21 = vmul.f32 %v3889_v60, %v3802_v3 }
 0x185   : > { %v3884_v19 = vadd.f32 %v3377_v55, %v1845_v15  ;;  %v867_v32 = vadd.f32 %v851_v25, %v814_v4  ;;  %v1048_v0 = vmul.f32 %v3901_v13, %v3830_v49  ;;  %v1049_v24 = vmul.f32 %v3901_v13, %v3833_v53 }
 0x186   : > { %v3894_v48 = vadd.f32 %v3377_v55, %v1846_v31  ;;  %v919_v7 = vadd.f32 %v903_v11, %v866_v33  ;;  %v1030_v20 = vadd.f32 %v1014_v27, %v996_v2  ;;  %v1031_v50 = vadd.f32 %v1015_v21, %v997_v16  ;;  %v3950_v2 = vld [vmem:[%s4637_s3 + $0x7] ss:$0 sm:$0xff]  ;;  %v3960_v21 = vld [vmem:[%s4637_s3 + $0xc] ss:$0 sm:$0xff] }
 0x187   : > { %v1881_v23 = vmul.f32 %v3884_v19, %v3884_v19  ;;  %v920_v55 = vadd.f32 %v904_v47, %v867_v32  ;;  %v1082_v36 = vmul.f32 %v3914_v38, %v3836_v52  ;;  %v1083_v22 = vmul.f32 %v3914_v38, %v3848_v18 }
 0x188   : > { %v1882_v43 = vmul.f32 %v3894_v48, %v3894_v48  ;;  %v934_v54 = vrot.slane %v919_v7, 6  ;;  %v1064_v58 = vadd.f32 %v1048_v0, %v1030_v20  ;;  %v1065_v12 = vadd.f32 %v1049_v24, %v1031_v50 }
 0x189   : > { %v1897_v51 = vmul.f32 %v1881_v23, %v3884_v19  ;;  %v942_v41 = vrot.slane %v920_v55, 6  ;;  %v1116_v30 = vmul.f32 %v3925_v17, %v4675_v42  ;;  %v1117_v28 = vmul.f32 %v3925_v17, %v3341_v39  ;;  %v3940_v42 = vld [vmem:[%s4637_s3 + $0x2] ss:$0 sm:$0xff] }
 0x18a   : > { %v1898_v34 = vmul.f32 %v1882_v43, %v3894_v48  ;;  %v1098_v11 = vadd.f32 %v1082_v36, %v1064_v58  ;;  %v1099_v57 = vadd.f32 %v1083_v22, %v1065_v12  ;;  %v1225_v39 = vmul.f32 %v3940_v42, %v3787_v5  ;;  %v3969_v36 = vld [vmem:[%s4637_s3 + $0x11] ss:$0 sm:$0xff] }
 0x18b   : > { %v1913_v62 = vmul.f32 0.044715, %v1897_v51  ;;  %v951_v37 = vsel %vm949_vm1, %v934_v54, %v942_v41  ;;  %v959_v25 = vsel %vm949_vm1, %v942_v41, %v934_v54  ;;  %v1226_v47 = vmul.f32 %v3940_v42, %v3790_v61  ;;  %v3978_v41 = vld [vmem:[%s4637_s3 + $0x16] ss:$0 sm:$0xff] }
 0x18c   : > { %v1914_v10 = vmul.f32 0.044715, %v1898_v34  ;;  %v978_v15 = vsel %vm966_vm2, %v959_v25, 0.0  ;;  %v1132_v31 = vadd.f32 %v1116_v30, %v1098_v11  ;;  %v1243_v16 = vmul.f32 %v3950_v2, %v3793_v26  ;;  %4676 = vst [vmem:[#allocation3_spill] sm:$0xff] %v3978_v41  ;;  %v3981_v58 = vld [vmem:[%s3017_s21 + $0x50] sm:$0xff] }
 0x18d   : > { %v1929_v4 = vadd.f32 %v1913_v62, %v3884_v19  ;;  %v1133_v32 = vadd.f32 %v1117_v28, %v1099_v57  ;;  %v1244_v27 = vmul.f32 %v3950_v2, %v3802_v3  ;;  %v1277_v0 = vmul.f32 %v3960_v21, %v3830_v49 }
 0x18e   : > { %v1930_v33 = vadd.f32 %v1914_v10, %v3894_v48  ;;  %v1147_v23 = vrot.slane %v1132_v31, 7  ;;  %v1259_v7 = vadd.f32 %v1243_v16, %v1225_v39  ;;  %v1278_v55 = vmul.f32 %v3960_v21, %v3833_v53  ;;  %v2690_v10 = vld [vmem:[%s3017_s21 + $0x58] sm:$0xff]  ;;  %v3996_v31 = vld [vmem:[%s4637_s3 + $0x3] ss:$0 sm:$0xff] }
 0x18f   : > { %v1945_v24 = vmul.f32 0.7978846, %v1929_v4  ;;  %v1155_v43 = vrot.slane %v1133_v32, 7  ;;  %v1260_v50 = vadd.f32 %v1244_v27, %v1226_v47  ;;  %v1311_v22 = vmul.f32 %v3969_v36, %v3836_v52  ;;  %4677 = vst [vmem:[#allocation4_spill] sm:$0xff] %v3996_v31  ;;  %v4014_v27 = vld [vmem:[%s4637_s3 + $0xd] ss:$0 sm:$0xff] }
 0x190   : > { %v1946_v20 = vmul.f32 0.7978846, %v1930_v33  ;;  %v1293_v51 = vadd.f32 %v1277_v0, %v1259_v7  ;;  %v1312_v54 = vmul.f32 %v3969_v36, %v3848_v18  ;;  %v1345_v34 = vmul.f32 %v3981_v58, %v3978_v41  ;;  %4679 = vst [vmem:[#allocation6_spill] sm:$0xff] %v4014_v27  ;;  %v4023_v7 = vld [vmem:[%s4637_s3 + $0x12] ss:$0 sm:$0xff] }
 0x191   : > { %2654 = vtanh.f32 %v1945_v24  ;;  %v1164_v12 = vsel %vm1162_vm3, %v1147_v23, %v1155_v43  ;;  %v1172_v30 = vsel %vm1162_vm3, %v1155_v43, %v1147_v23  ;;  %v1294_v28 = vadd.f32 %v1278_v55, %v1260_v50  ;;  %4680 = vst [vmem:[#allocation7_spill] sm:$0xff] %v4023_v7 }
 0x192   : > { %2656 = vtanh.f32 %v1946_v20  ;;  %v1191_v62 = vsel %vm1179_vm4, %v1172_v30, 0.0  ;;  %v1208_v25 = vadd.f32 %v1164_v12, %v951_v37  ;;  %v1327_v11 = vadd.f32 %v1311_v22, %v1293_v51  ;;  %v4005_v37 = vld [vmem:[%s4637_s3 + $0x8] ss:$0 sm:$0xff] }
 0x193   : > { %v1346_v57 = vmul.f32 %v2690_v10, %v3978_v41  ;;  %v1207_v39 = vadd.f32 %v1191_v62, %v978_v15  ;;  %v1328_v4 = vadd.f32 %v1312_v54, %v1294_v28  ;;  %v1395_v47 = vmul.f32 %v3996_v31, %v3787_v5  ;;  %4678 = vst [vmem:[#allocation5_spill] sm:$0xff] %v4005_v37  ;;  %v4032_v54 = vld [vmem:[%s4637_s3 + $0x17] ss:$0 sm:$0xff] }
 0x194   : > { %v1396_v16 = vmul.f32 %v3996_v31, %v3790_v61  ;;  %v1361_v33 = vadd.f32 %v1345_v34, %v1327_v11  ;;  %v1413_v15 = vmul.f32 %v4005_v37, %v3793_v26  ;;  %v1414_v32 = vmul.f32 %v4005_v37, %v3802_v3  ;;  %4681 = vst [vmem:[#allocation8_spill] sm:$0xff] %v4032_v54  ;;  %v4040_v11 = vld [vmem:[%s4637_s3 + $0x4] ss:$0 sm:$0xff] }
 0x195   : > { %v1447_v0 = vmul.f32 %v4014_v27, %v3830_v49  ;;  %v1362_v24 = vadd.f32 %v1346_v57, %v1328_v4  ;;  %v1448_v23 = vmul.f32 %v4014_v27, %v3833_v53  ;;  %v1481_v55 = vmul.f32 %v4023_v7, %v3836_v52 }
 0x196   : > { %v1482_v20 = vmul.f32 %v4023_v7, %v3848_v18  ;;  %v1377_v50 = vadd.f32 %v1361_v33, %v1207_v39  ;;  %v1429_v22 = vadd.f32 %v1413_v15, %v1395_v47  ;;  %v1430_v51 = vadd.f32 %v1414_v32, %v1396_v16 }
 0x197   : > { %v2655_v43 = vpop.eup %2654  ;;  %v1515_v34 = vmul.f32 %v4032_v54, %v3981_v58  ;;  %v1378_v28 = vadd.f32 %v1362_v24, %v1208_v25  ;;  %v1516_v62 = vmul.f32 %v4032_v54, %v2690_v10  ;;  %v1624_v57 = vmul.f32 %v4040_v11, %v3787_v5  ;;  %v4049_v25 = vld [vmem:[%s4637_s3 + $0x9] ss:$0 sm:$0xff]  ;;  %v4058_v5 = vld [vmem:[%s4637_s3 + $0xe] ss:$0 sm:$0xff] }
 0x198   : > { %v2657_v12 = vpop.eup %2656  ;;  %v1977_v30 = vadd.f32 1.0, %v2655_v43  ;;  %v1463_v4 = vadd.f32 %v1447_v0, %v1429_v22  ;;  %v1464_v47 = vadd.f32 %v1448_v23, %v1430_v51  ;;  %v1625_v16 = vmul.f32 %v4040_v11, %v3790_v61  ;;  %4682 = vst [vmem:[#allocation9_spill] sm:$0xff] %v4049_v25 }
 0x199   : > { %v1978_v39 = vadd.f32 1.0, %v2657_v12  ;;  %v1642_v15 = vmul.f32 %v4049_v25, %v3793_v26  ;;  %v1643_v32 = vmul.f32 %v4049_v25, %v3802_v3  ;;  %v1676_v61 = vmul.f32 %v4058_v5, %v3830_v49  ;;  %v4068_v3 = vld [vmem:[%s4637_s3 + $0x13] ss:$0 sm:$0xff] }
 0x19a   : > { %v1993_v33 = vmul.f32 0.5, %v1977_v30  ;;  %v1497_v24 = vadd.f32 %v1481_v55, %v1463_v4  ;;  %v1498_v23 = vadd.f32 %v1482_v20, %v1464_v47  ;;  %v1677_v43 = vmul.f32 %v4058_v5, %v3833_v53  ;;  %v4079_v47 = vld [vmem:[%s4637_s3 + $0x18] ss:$0 sm:$0xff] }
 0x19b   : > { %v1994_v0 = vmul.f32 0.5, %v1978_v39  ;;  %v1658_v26 = vadd.f32 %v1642_v15, %v1624_v57  ;;  %v1659_v51 = vadd.f32 %v1643_v32, %v1625_v16  ;;  %v1710_v12 = vmul.f32 %v4068_v3, %v3836_v52 }
 0x19c   : > { %v2009_v22 = vmul.f32 %v1993_v33, %v3884_v19  ;;  %v1531_v39 = vadd.f32 %v1515_v34, %v1497_v24  ;;  %v1532_v55 = vadd.f32 %v1516_v62, %v1498_v23  ;;  %v1711_v20 = vmul.f32 %v4068_v3, %v3848_v18 }
 0x19d   : > { %v2010_v30 = vmul.f32 %v1994_v0, %v3894_v48  ;;  %v1692_v19 = vadd.f32 %v1676_v61, %v1658_v26  ;;  %v1693_v57 = vadd.f32 %v1677_v43, %v1659_v51  ;;  %v1744_v16 = vmul.f32 %v4079_v47, %v3981_v58  ;;  %v4098_v26 = vld [vmem:[%s3017_s21 + $0x50] sm:$0xff] }
 0x19e   : > { %v2025_v4 = vadd.f32 %v3510_v35, %v2009_v22  ;;  %v1546_v48 = vrot.slane %v1531_v39, 1  ;;  %v1554_v34 = vrot.slane %v1532_v55, 1  ;;  %v1745_v62 = vmul.f32 %v4079_v47, %v2690_v10  ;;  %v4103_v39 = vld [vmem:[%s3017_s21 + $0x58] sm:$0xff] }
 0x19f   : > { %v2026_v33 = vadd.f32 %v3523_v63, %v2010_v30  ;;  %v1726_v15 = vadd.f32 %v1710_v12, %v1692_v19  ;;  %v1727_v32 = vadd.f32 %v1711_v20, %v1693_v57  ;;  %v711_v35 = vmul.f32 %v3808_v59, %v3830_v49  ;;  %v4108_v20 = vld [vmem:[%s3017_s21 + $0x60] sm:$0xff]  ;;  %v4113_v57 = vld [vmem:[%s3017_s21 + $0x68] sm:$0xff] }
 0x1a0   : > { %v712_v61 = vmul.f32 %v3808_v59, %v3833_v53  ;;  %v1563_v58 = vsel %vm1561_vm5, %v1546_v48, %v1554_v34  ;;  %v1571_v63 = vsel %vm1561_vm5, %v1554_v34, %v1546_v48  ;;  %v748_v10 = vmul.f32 %v3817_v14, %v3836_v52 }
 0x1a1   : > { %v2035_v0 = vpack.c.bf16 %v2026_v33, %v2025_v4  ;;  %v1591_v24 = vsel %vm1581_vm6, %v1571_v63, 0.0  ;;  %v1606_v23 = vadd.f32 %v1563_v58, %v1377_v50  ;;  %v1760_v43 = vadd.f32 %v1744_v16, %v1726_v15 }
 0x1a2   : > { %v1761_v22 = vadd.f32 %v1745_v62, %v1727_v32  ;;  %v1607_v51 = vadd.f32 %v1591_v24, %v1378_v28  ;;  %v749_v12 = vmul.f32 %v3817_v14, %v3848_v18  ;;  %v764_v30 = vadd.f32 %v748_v10, %v711_v35 }
 0x1a3   : > { %2143 = vmatmul.bf16.vlgmr.msra.gmra.mxu3 %v2035_v0  ;;  %v801_v55 = vmul.f32 %v3841_v44, %v4098_v26  ;;  %v1775_v4 = vrot.slane %v1760_v43, 2  ;;  %v802_v50 = vmul.f32 %v3841_v44, %v4103_v39  ;;  %v854_v28 = vmul.f32 %v3853_v56, %v4108_v20 }
 0x1a4   : > { %v1783_v19 = vrot.slane %v1761_v22, 2  ;;  %v765_v16 = vadd.f32 %v749_v12, %v712_v61  ;;  %v855_v48 = vmul.f32 %v3853_v56, %v4113_v57  ;;  %v907_v34 = vmul.f32 %v3866_v1, %v3504_v6  ;;  %v4140_v12 = vld [vmem:[%s4638_s4] ss:$0 sm:$0xff] }
 0x1a5   : > { %v817_v33 = vadd.f32 %v801_v55, %v764_v30  ;;  %v908_v32 = vmul.f32 %v3866_v1, %v3507_v45  ;;  %v1000_v35 = vmul.f32 %v3877_v8, %v3830_v49  ;;  %v1001_v24 = vmul.f32 %v3877_v8, %v3833_v53 }
 0x1a6   : > { %v1792_v62 = vsel %vm1790_vm7, %v1775_v4, %v1783_v19  ;;  %v1800_v15 = vsel %vm1790_vm7, %v1783_v19, %v1775_v4  ;;  %v818_v58 = vadd.f32 %v802_v50, %v765_v16  ;;  %v1018_v43 = vmul.f32 %v3889_v60, %v3836_v52 }
 0x1a7   : > { %v1820_v61 = vsel %vm1810_vm8, %v1800_v15, 0.0  ;;  %v1835_v0 = vadd.f32 %v1792_v62, %v1606_v23  ;;  %v870_v63 = vadd.f32 %v854_v28, %v817_v33  ;;  %v1019_v22 = vmul.f32 %v3889_v60, %v3848_v18 }
 0x1a8   : > { %v1836_v10 = vadd.f32 %v1820_v61, %v1607_v51  ;;  %v871_v23 = vadd.f32 %v855_v48, %v818_v58  ;;  %v1052_v51 = vmul.f32 %v3901_v13, %v4098_v26  ;;  %v1034_v19 = vadd.f32 %v1018_v43, %v1000_v35 }
 0x1a9   : > { %v4143_v30 = vadd.f32 %v4140_v12, %v1835_v0  ;;  %v923_v55 = vadd.f32 %v907_v34, %v870_v63  ;;  %v1035_v50 = vadd.f32 %v1019_v22, %v1001_v24  ;;  %v1053_v28 = vmul.f32 %v3901_v13, %v4103_v39 }
 0x1aa   : > { %v4148_v4 = vadd.f32 %v4140_v12, %v1836_v10  ;;  %v924_v33 = vadd.f32 %v908_v32, %v871_v23  ;;  %v1086_v48 = vmul.f32 %v3914_v38, %v4108_v20  ;;  %v1068_v15 = vadd.f32 %v1052_v51, %v1034_v19 }
 0x1ab   : > { %v1871_v16 = vmul.f32 %v4143_v30, %v4143_v30  ;;  %v936_v62 = vrot.slane %v923_v55, 6  ;;  %v1069_v61 = vadd.f32 %v1053_v28, %v1035_v50  ;;  %v1087_v35 = vmul.f32 %v3914_v38, %v4113_v57 }
 0x1ac   : > { %v1872_v34 = vmul.f32 %v4148_v4, %v4148_v4  ;;  %v944_v58 = vrot.slane %v924_v33, 6  ;;  %v1120_v63 = vmul.f32 %v3925_v17, %v3504_v6  ;;  %v1121_v32 = vmul.f32 %v3925_v17, %v3507_v45 }
 0x1ad   : > { %v1887_v0 = vmul.f32 %v1871_v16, %v4143_v30  ;;  %v1102_v24 = vadd.f32 %v1086_v48, %v1068_v15  ;;  %v1103_v43 = vadd.f32 %v1087_v35, %v1069_v61  ;;  %v1229_v22 = vmul.f32 %v3940_v42, %v3830_v49 }
 0x1ae   : > { %v1888_v10 = vmul.f32 %v1872_v34, %v4148_v4  ;;  %v953_v55 = vsel %vm949_vm1, %v936_v62, %v944_v58  ;;  %v961_v51 = vsel %vm949_vm1, %v944_v58, %v936_v62  ;;  %v1230_v6 = vmul.f32 %v3940_v42, %v3833_v53 }
 0x1af   : > { %v1903_v23 = vmul.f32 0.044715, %v1887_v0  ;;  %v982_v45 = vsel %vm966_vm2, %v961_v51, 0.0  ;;  %v1136_v50 = vadd.f32 %v1120_v63, %v1102_v24  ;;  %v1137_v28 = vadd.f32 %v1121_v32, %v1103_v43 }
 0x1b0   : > { %v1904_v19 = vmul.f32 0.044715, %v1888_v10  ;;  %v1247_v33 = vmul.f32 %v3950_v2, %v3836_v52  ;;  %v1248_v48 = vmul.f32 %v3950_v2, %v3848_v18  ;;  %v1281_v62 = vmul.f32 %v3960_v21, %v4098_v26 }
 0x1b1   : > { %v1919_v16 = vadd.f32 %v1903_v23, %v4143_v30  ;;  %v1149_v15 = vrot.slane %v1136_v50, 7  ;;  %v1157_v61 = vrot.slane %v1137_v28, 7  ;;  %v1282_v35 = vmul.f32 %v3960_v21, %v4103_v39  ;;  %v2702_v28 = vld [vmem:[%s3017_s21 + $0x70] sm:$0xff] }
 0x1b2   : > { %v1920_v34 = vadd.f32 %v1904_v19, %v4148_v4  ;;  %v1263_v58 = vadd.f32 %v1247_v33, %v1229_v22  ;;  %v1264_v63 = vadd.f32 %v1248_v48, %v1230_v6  ;;  %v1315_v32 = vmul.f32 %v3969_v36, %v4108_v20  ;;  %v2703_v48 = vld [vmem:[%s3017_s21 + $0x78] sm:$0xff] }
 0x1b3   : > { %v1935_v0 = vmul.f32 0.7978846, %v1919_v16  ;;  %v1166_v24 = vsel %vm1162_vm3, %v1149_v15, %v1157_v61  ;;  %v1174_v43 = vsel %vm1162_vm3, %v1157_v61, %v1149_v15  ;;  %v1316_v23 = vmul.f32 %v3969_v36, %v4113_v57 }
 0x1b4   : > { %v1936_v10 = vmul.f32 0.7978846, %v1920_v34  ;;  %v1195_v51 = vsel %vm1179_vm4, %v1174_v43, 0.0  ;;  %v1212_v22 = vadd.f32 %v1166_v24, %v953_v55  ;;  %v1297_v6 = vadd.f32 %v1281_v62, %v1263_v58 }
 0x1b5   : > { %2658 = vtanh.f32 %v1935_v0  ;;  %v1211_v19 = vadd.f32 %v1195_v51, %v982_v45  ;;  %v1298_v50 = vadd.f32 %v1282_v35, %v1264_v63  ;;  %v1349_v16 = vmul.f32 %v2702_v28, %v3978_v41 }
 0x1b6   : > { %2660 = vtanh.f32 %v1936_v10  ;;  %v1331_v33 = vadd.f32 %v1315_v32, %v1297_v6  ;;  %v1350_v34 = vmul.f32 %v2703_v48, %v3978_v41  ;;  %v1399_v15 = vmul.f32 %v3996_v31, %v3830_v49 }
 0x1b7   : > { %v1400_v61 = vmul.f32 %v3996_v31, %v3833_v53  ;;  %v1332_v0 = vadd.f32 %v1316_v23, %v1298_v50  ;;  %v1417_v55 = vmul.f32 %v4005_v37, %v3836_v52  ;;  %v1418_v45 = vmul.f32 %v4005_v37, %v3848_v18 }
 0x1b8   : > { %v1451_v62 = vmul.f32 %v4014_v27, %v4098_v26  ;;  %v1365_v35 = vadd.f32 %v1349_v16, %v1331_v33  ;;  %v1452_v58 = vmul.f32 %v4014_v27, %v4103_v39  ;;  %v1485_v63 = vmul.f32 %v4023_v7, %v4108_v20 }
 0x1b9   : > { %v1486_v32 = vmul.f32 %v4023_v7, %v4113_v57  ;;  %v1366_v10 = vadd.f32 %v1350_v34, %v1332_v0  ;;  %v1433_v24 = vadd.f32 %v1417_v55, %v1399_v15  ;;  %v1434_v43 = vadd.f32 %v1418_v45, %v1400_v61 }
 0x1ba   : > { %v1519_v23 = vmul.f32 %v2702_v28, %v4032_v54  ;;  %v1381_v6 = vadd.f32 %v1365_v35, %v1211_v19  ;;  %v1520_v50 = vmul.f32 %v2703_v48, %v4032_v54  ;;  %v1628_v16 = vmul.f32 %v4040_v11, %v3830_v49 }
 0x1bb   : > { %v2659_v51 = vpop.eup %2658  ;;  %v1629_v33 = vmul.f32 %v4040_v11, %v3833_v53  ;;  %v1382_v31 = vadd.f32 %v1366_v10, %v1212_v22  ;;  %v1467_v41 = vadd.f32 %v1451_v62, %v1433_v24  ;;  %v1468_v7 = vadd.f32 %v1452_v58, %v1434_v43 }
 0x1bc   : > { %v2661_v27 = vpop.eup %2660  ;;  %v1967_v37 = vadd.f32 1.0, %v2659_v51  ;;  %v1646_v15 = vmul.f32 %v4049_v25, %v3836_v52  ;;  %v1647_v19 = vmul.f32 %v4049_v25, %v3848_v18  ;;  %v1680_v61 = vmul.f32 %v4058_v5, %v4098_v26 }
 0x1bd   : > { %v1968_v34 = vadd.f32 1.0, %v2661_v27  ;;  %v1501_v55 = vadd.f32 %v1485_v63, %v1467_v41  ;;  %v1502_v45 = vadd.f32 %v1486_v32, %v1468_v7  ;;  %v1681_v35 = vmul.f32 %v4058_v5, %v4103_v39 }
 0x1be   : > { %v1983_v0 = vmul.f32 0.5, %v1967_v37  ;;  %v1662_v22 = vadd.f32 %v1646_v15, %v1628_v16  ;;  %v1663_v62 = vadd.f32 %v1647_v19, %v1629_v33  ;;  %v1714_v27 = vmul.f32 %v4068_v3, %v4108_v20 }
 0x1bf   : > { %v1984_v51 = vmul.f32 0.5, %v1968_v34  ;;  %v1535_v58 = vadd.f32 %v1519_v23, %v1501_v55  ;;  %v1536_v10 = vadd.f32 %v1520_v50, %v1502_v45  ;;  %v1715_v18 = vmul.f32 %v4068_v3, %v4113_v57 }
 0x1c0   : > { %v1999_v52 = vmul.f32 %v1983_v0, %v4143_v30  ;;  %v1696_v41 = vadd.f32 %v1680_v61, %v1662_v22  ;;  %v1697_v7 = vadd.f32 %v1681_v35, %v1663_v62  ;;  %v1748_v63 = vmul.f32 %v2702_v28, %v4079_v47  ;;  %v4255_v35 = vld [vmem:[%s3017_s21 + $0x70] sm:$0xff]  ;;  %v4261_v22 = vld [vmem:[%s3017_s21 + $0x80] sm:$0xff] }
 0x1c1   : > { %v2000_v37 = vmul.f32 %v1984_v51, %v4148_v4  ;;  %v1548_v24 = vrot.slane %v1535_v58, 1  ;;  %v1556_v43 = vrot.slane %v1536_v10, 1  ;;  %v1749_v16 = vmul.f32 %v2703_v48, %v4079_v47  ;;  %v4258_v51 = vld [vmem:[%s3017_s21 + $0x78] sm:$0xff] }
 0x1c2   : > { %v2015_v32 = vadd.f32 %v3830_v49, %v1999_v52  ;;  %v1730_v30 = vadd.f32 %v1714_v27, %v1696_v41  ;;  %v1731_v23 = vadd.f32 %v1715_v18, %v1697_v7  ;;  %v715_v4 = vmul.f32 %v3808_v59, %v4098_v26 }
 0x1c3   : > { %v2016_v33 = vadd.f32 %v3833_v53, %v2000_v37  ;;  %v1565_v50 = vsel %vm1561_vm5, %v1548_v24, %v1556_v43  ;;  %v1573_v49 = vsel %vm1561_vm5, %v1556_v43, %v1548_v24  ;;  %v716_v28 = vmul.f32 %v3808_v59, %v4103_v39 }
 0x1c4   : > { %v752_v53 = vmul.f32 %v3817_v14, %v4108_v20  ;;  %v1595_v34 = vsel %vm1581_vm6, %v1573_v49, 0.0  ;;  %v1610_v15 = vadd.f32 %v1565_v50, %v1381_v6  ;;  %v1764_v19 = vadd.f32 %v1748_v63, %v1730_v30 }
 0x1c5   : > { %v2030_v48 = vpack.c.bf16 %v2016_v33, %v2015_v32  ;;  %v1611_v61 = vadd.f32 %v1595_v34, %v1382_v31  ;;  %v1765_v0 = vadd.f32 %v1749_v16, %v1731_v23  ;;  %v753_v55 = vmul.f32 %v3817_v14, %v4113_v57  ;;  %v4268_v31 = vld [vmem:[%s3017_s21 + $0x88] sm:$0xff] }
 0x1c6   : > { %v768_v45 = vadd.f32 %v752_v53, %v715_v4  ;;  %v1777_v62 = vrot.slane %v1764_v19, 2  ;;  %v805_v27 = vmul.f32 %v3841_v44, %v4255_v35  ;;  %v806_v6 = vmul.f32 %v3841_v44, %v4258_v51 }
 0x1c7   : > { %2118 = vmatmul.bf16.gmra.mxu0 %v2030_v48  ;;  %v858_v52 = vmul.f32 %v3853_v56, %v4261_v22  ;;  %v1785_v58 = vrot.slane %v1765_v0, 2  ;;  %v769_v10 = vadd.f32 %v753_v55, %v716_v28  ;;  %v859_v18 = vmul.f32 %v3853_v56, %v4268_v31 }
 0x1c8   : > { %v911_v37 = vmul.f32 %v3866_v1, %v3648_v40  ;;  %v821_v41 = vadd.f32 %v805_v27, %v768_v45  ;;  %v912_v7 = vmul.f32 %v3866_v1, %v3653_v29  ;;  %v1004_v63 = vmul.f32 %v3877_v8, %v4098_v26 }
 0x1c9   : > { %v1005_v32 = vmul.f32 %v3877_v8, %v4103_v39  ;;  %v1794_v24 = vsel %vm1790_vm7, %v1777_v62, %v1785_v58  ;;  %v1802_v43 = vsel %vm1790_vm7, %v1785_v58, %v1777_v62  ;;  %v822_v16 = vadd.f32 %v806_v6, %v769_v10 }
 0x1ca   : > { %v1022_v33 = vmul.f32 %v3889_v60, %v4108_v20  ;;  %v1824_v30 = vsel %vm1810_vm8, %v1802_v43, 0.0  ;;  %v1839_v23 = vadd.f32 %v1794_v24, %v1610_v15  ;;  %v874_v4 = vadd.f32 %v858_v52, %v821_v41 }
 0x1cb   : > { %v1023_v50 = vmul.f32 %v3889_v60, %v4113_v57  ;;  %v1840_v49 = vadd.f32 %v1824_v30, %v1611_v61  ;;  %v875_v28 = vadd.f32 %v859_v18, %v822_v16  ;;  %v1056_v48 = vmul.f32 %v3901_v13, %v4255_v35 }
 0x1cc   : > { %v1038_v53 = vadd.f32 %v1022_v33, %v1004_v63  ;;  %v4295_v34 = vadd.f32 %v4140_v12, %v1839_v23  ;;  %v927_v19 = vadd.f32 %v911_v37, %v874_v4  ;;  %v1057_v55 = vmul.f32 %v3901_v13, %v4258_v51 }
 0x1cd   : > { %v1039_v0 = vadd.f32 %v1023_v50, %v1005_v32  ;;  %v4300_v15 = vadd.f32 %v4140_v12, %v1840_v49  ;;  %v928_v45 = vadd.f32 %v912_v7, %v875_v28  ;;  %v1090_v61 = vmul.f32 %v3914_v38, %v4261_v22 }
 0x1ce   : > { %v1072_v62 = vadd.f32 %v1056_v48, %v1038_v53  ;;  %v1875_v27 = vmul.f32 %v4295_v34, %v4295_v34  ;;  %v938_v6 = vrot.slane %v927_v19, 6  ;;  %v1091_v58 = vmul.f32 %v3914_v38, %v4268_v31 }
 0x1cf   : > { %v1073_v52 = vadd.f32 %v1057_v55, %v1039_v0  ;;  %v1876_v10 = vmul.f32 %v4300_v15, %v4300_v15  ;;  %v946_v18 = vrot.slane %v928_v45, 6  ;;  %v1124_v41 = vmul.f32 %v3925_v17, %v3648_v40 }
 0x1d0   : > { %v1106_v37 = vadd.f32 %v1090_v61, %v1072_v62  ;;  %v1891_v7 = vmul.f32 %v1875_v27, %v4295_v34  ;;  %v1125_v32 = vmul.f32 %v3925_v17, %v3653_v29  ;;  %v1233_v24 = vmul.f32 %v3940_v42, %v4098_v26 }
 0x1d1   : > { %v1107_v63 = vadd.f32 %v1091_v58, %v1073_v52  ;;  %v1892_v43 = vmul.f32 %v1876_v10, %v4300_v15  ;;  %v955_v16 = vsel %vm949_vm1, %v938_v6, %v946_v18  ;;  %v963_v33 = vsel %vm949_vm1, %v946_v18, %v938_v6 }
 0x1d2   : > { %v1140_v30 = vadd.f32 %v1124_v41, %v1106_v37  ;;  %v1907_v23 = vmul.f32 0.044715, %v1891_v7  ;;  %v986_v40 = vsel %vm966_vm2, %v963_v33, 0.0  ;;  %v1234_v29 = vmul.f32 %v3940_v42, %v4103_v39 }
 0x1d3   : > { %v1141_v4 = vadd.f32 %v1125_v32, %v1107_v63  ;;  %v1908_v50 = vmul.f32 0.044715, %v1892_v43  ;;  %v1251_v28 = vmul.f32 %v3950_v2, %v4108_v20  ;;  %v1252_v53 = vmul.f32 %v3950_v2, %v4113_v57  ;;  %v4683_v43 = vld [vmem:[#allocation3_spill] sm:$0xff] }
 0x1d4   : > { %v1151_v49 = vrot.slane %v1140_v30, 7  ;;  %v1923_v48 = vadd.f32 %v1907_v23, %v4295_v34  ;;  %v1285_v0 = vmul.f32 %v3960_v21, %v4255_v35  ;;  %v1286_v55 = vmul.f32 %v3960_v21, %v4258_v51  ;;  %v2705_v23 = vld [vmem:[%s3017_s21 + $0x98] sm:$0xff] }
 0x1d5   : > { %v1159_v19 = vrot.slane %v1141_v4, 7  ;;  %v1924_v45 = vadd.f32 %v1908_v50, %v4300_v15  ;;  %v1267_v62 = vadd.f32 %v1251_v28, %v1233_v24  ;;  %v1268_v61 = vadd.f32 %v1252_v53, %v1234_v29  ;;  %v2704_v24 = vld [vmem:[%s3017_s21 + $0x90] sm:$0xff]  ;;  %v4684_v29 = vld [vmem:[#allocation4_spill] sm:$0xff] }
 0x1d6   : > { %v1319_v27 = vmul.f32 %v3969_v36, %v4261_v22  ;;  %v1939_v6 = vmul.f32 0.7978846, %v1923_v48  ;;  %v1320_v10 = vmul.f32 %v3969_v36, %v4268_v31  ;;  %v1353_v33 = vmul.f32 %v2704_v24, %v4683_v43 }
 0x1d7   : > { %v1168_v52 = vsel %vm1162_vm3, %v1151_v49, %v1159_v19  ;;  %v1176_v58 = vsel %vm1162_vm3, %v1159_v19, %v1151_v49  ;;  %v1940_v18 = vmul.f32 0.7978846, %v1924_v45  ;;  %v1301_v7 = vadd.f32 %v1285_v0, %v1267_v62  ;;  %v4686_v19 = vld [vmem:[#allocation6_spill] sm:$0xff]  ;;  %v4687_v45 = vld [vmem:[#allocation7_spill] sm:$0xff] }
 0x1d8   : > { %v1199_v37 = vsel %vm1179_vm4, %v1176_v58, 0.0  ;;  %v1216_v41 = vadd.f32 %v1168_v52, %v955_v16  ;;  %2662 = vtanh.f32 %v1939_v6  ;;  %v1302_v32 = vadd.f32 %v1286_v55, %v1268_v61  ;;  %v4685_v16 = vld [vmem:[#allocation5_spill] sm:$0xff] }
 0x1d9   : > { %v1215_v63 = vadd.f32 %v1199_v37, %v986_v40  ;;  %2664 = vtanh.f32 %v1940_v18  ;;  %v1335_v30 = vadd.f32 %v1319_v27, %v1301_v7  ;;  %v1354_v4 = vmul.f32 %v2705_v23, %v4683_v43 }
 0x1da   : > { %v1403_v50 = vmul.f32 %v4684_v29, %v4098_v26  ;;  %v1336_v49 = vadd.f32 %v1320_v10, %v1302_v32  ;;  %v1404_v28 = vmul.f32 %v4684_v29, %v4103_v39  ;;  %v1421_v53 = vmul.f32 %v4685_v16, %v4108_v20 }
 0x1db   : > { %v1422_v40 = vmul.f32 %v4685_v16, %v4113_v57  ;;  %v1369_v48 = vadd.f32 %v1353_v33, %v1335_v30  ;;  %v1455_v0 = vmul.f32 %v4686_v19, %v4255_v35  ;;  %v1456_v55 = vmul.f32 %v4686_v19, %v4258_v51 }
 0x1dc   : > { %v1489_v62 = vmul.f32 %v4687_v45, %v4261_v22  ;;  %v1370_v61 = vadd.f32 %v1354_v4, %v1336_v49  ;;  %v1437_v27 = vadd.f32 %v1421_v53, %v1403_v50  ;;  %v1490_v52 = vmul.f32 %v4687_v45, %v4268_v31 }
 0x1dd   : > { %v1438_v6 = vadd.f32 %v1422_v40, %v1404_v28  ;;  %v1385_v58 = vadd.f32 %v1369_v48, %v1215_v63  ;;  %v1523_v10 = vmul.f32 %v2704_v24, %v4032_v54  ;;  %v1524_v18 = vmul.f32 %v2705_v23, %v4032_v54 }
 0x1de   : > { %v1632_v37 = vmul.f32 %v4040_v11, %v4098_v26  ;;  %v2663_v7 = vpop.eup %2662  ;;  %v1386_v32 = vadd.f32 %v1370_v61, %v1216_v41  ;;  %v1471_v33 = vadd.f32 %v1455_v0, %v1437_v27  ;;  %v1633_v4 = vmul.f32 %v4040_v11, %v4103_v39 }
 0x1df   : > { %v1472_v30 = vadd.f32 %v1456_v55, %v1438_v6  ;;  %v2665_v50 = vpop.eup %2664  ;;  %v1971_v49 = vadd.f32 1.0, %v2663_v7  ;;  %v1650_v28 = vmul.f32 %v4049_v25, %v4108_v20  ;;  %v1651_v63 = vmul.f32 %v4049_v25, %v4113_v57 }
 0x1e0   : > { %v1684_v53 = vmul.f32 %v4058_v5, %v4255_v35  ;;  %v1972_v40 = vadd.f32 1.0, %v2665_v50  ;;  %v1505_v48 = vadd.f32 %v1489_v62, %v1471_v33  ;;  %v1685_v41 = vmul.f32 %v4058_v5, %v4258_v51 }
 0x1e1   : > { %v1506_v54 = vadd.f32 %v1490_v52, %v1472_v30  ;;  %v1987_v0 = vmul.f32 0.5, %v1971_v49  ;;  %v1666_v55 = vadd.f32 %v1650_v28, %v1632_v37  ;;  %v1667_v61 = vadd.f32 %v1651_v63, %v1633_v4  ;;  %v4399_v28 = vld [vmem:[%s3017_s21 + $0x90] sm:$0xff] }
 0x1e2   : > { %v1718_v27 = vmul.f32 %v4068_v3, %v4261_v22  ;;  %v1988_v6 = vmul.f32 0.5, %v1972_v40  ;;  %v1539_v20 = vadd.f32 %v1523_v10, %v1505_v48  ;;  %v1719_v57 = vmul.f32 %v4068_v3, %v4268_v31  ;;  %v4407_v40 = vld [vmem:[%s3017_s21 + $0xa0] sm:$0xff]  ;;  %v4410_v48 = vld [vmem:[%s3017_s21 + $0xa8] sm:$0xff] }
 0x1e3   : > { %v1540_v7 = vadd.f32 %v1524_v18, %v1506_v54  ;;  %v2003_v25 = vmul.f32 %v1987_v0, %v4295_v34  ;;  %v1700_v62 = vadd.f32 %v1684_v53, %v1666_v55  ;;  %v1701_v52 = vadd.f32 %v1685_v41, %v1667_v61  ;;  %v4417_v61 = vld [vmem:[%s3017_s21 + $0xb0] sm:$0xff] }
 0x1e4   : > { %v1752_v33 = vmul.f32 %v2704_v24, %v4079_v47  ;;  %v2004_v37 = vmul.f32 %v1988_v6, %v4300_v15  ;;  %v1550_v30 = vrot.slane %v1539_v20, 1  ;;  %v1753_v50 = vmul.f32 %v2705_v23, %v4079_v47 }
 0x1e5   : > { %v1558_v4 = vrot.slane %v1540_v7, 1  ;;  %v2019_v54 = vadd.f32 %v4098_v26, %v2003_v25  ;;  %v1734_v10 = vadd.f32 %v1718_v27, %v1700_v62  ;;  %v1735_v18 = vadd.f32 %v1719_v57, %v1701_v52  ;;  %v4402_v25 = vld [vmem:[%s3017_s21 + $0x98] sm:$0xff] }
 0x1e6   : > { %v719_v34 = vmul.f32 %v3808_v59, %v4255_v35  ;;  %v2020_v49 = vadd.f32 %v4103_v39, %v2004_v37  ;;  %v720_v23 = vmul.f32 %v3808_v59, %v4258_v51  ;;  %v756_v55 = vmul.f32 %v3817_v14, %v4261_v22  ;;  %v4420_v27 = vld [vmem:[%s3017_s21 + $0xb8] sm:$0xff] }
 0x1e7   : > { %v1567_v24 = vsel %vm1561_vm5, %v1550_v30, %v1558_v4  ;;  %v1575_v15 = vsel %vm1561_vm5, %v1558_v4, %v1550_v30  ;;  %v1768_v39 = vadd.f32 %v1752_v33, %v1734_v10  ;;  %v1769_v53 = vadd.f32 %v1753_v50, %v1735_v18 }
 0x1e8   : > { %v1599_v26 = vsel %vm1581_vm6, %v1575_v15, 0.0  ;;  %v1614_v63 = vadd.f32 %v1567_v24, %v1385_v58  ;;  %v2032_v41 = vpack.c.bf16 %v2020_v49, %v2019_v54  ;;  %v757_v59 = vmul.f32 %v3817_v14, %v4268_v31 }
 0x1e9   : > { %v1615_v0 = vadd.f32 %v1599_v26, %v1386_v32  ;;  %v1779_v6 = vrot.slane %v1768_v39, 2  ;;  %v1787_v58 = vrot.slane %v1769_v53, 2  ;;  %v809_v20 = vmul.f32 %v3841_v44, %v4399_v28 }
 0x1ea   : > { %v810_v7 = vmul.f32 %v3841_v44, %v4402_v25  ;;  %2128 = vmatmul.bf16.gmra.mxu1 %v2032_v41  ;;  %v772_v32 = vadd.f32 %v756_v55, %v719_v34  ;;  %v773_v57 = vadd.f32 %v757_v59, %v720_v23  ;;  %v862_v62 = vmul.f32 %v3853_v56, %v4407_v40 }
 0x1eb   : > { %v863_v14 = vmul.f32 %v3853_v56, %v4410_v48  ;;  %v1796_v52 = vsel %vm1790_vm7, %v1779_v6, %v1787_v58  ;;  %v1804_v33 = vsel %vm1790_vm7, %v1787_v58, %v1779_v6  ;;  %v915_v37 = vmul.f32 %v3866_v1, %v4417_v61 }
 0x1ec   : > { %v916_v44 = vmul.f32 %v3866_v1, %v4420_v27  ;;  %v1828_v30 = vsel %vm1810_vm8, %v1804_v33, 0.0  ;;  %v1843_v4 = vadd.f32 %v1796_v52, %v1614_v63  ;;  %v825_v50 = vadd.f32 %v809_v20, %v772_v32 }
 0x1ed   : > { %v826_v54 = vadd.f32 %v810_v7, %v773_v57  ;;  %v1844_v10 = vadd.f32 %v1828_v30, %v1615_v0  ;;  %v1008_v56 = vmul.f32 %v3877_v8, %v4255_v35  ;;  %v1009_v18 = vmul.f32 %v3877_v8, %v4258_v51 }
 0x1ee   : > { %v1026_v34 = vmul.f32 %v3889_v60, %v4261_v22  ;;  %v4447_v49 = vadd.f32 %v4140_v12, %v1843_v4  ;;  %v878_v1 = vadd.f32 %v862_v62, %v825_v50  ;;  %v1027_v15 = vmul.f32 %v3889_v60, %v4268_v31 }
 0x1ef   : > { %v879_v24 = vadd.f32 %v863_v14, %v826_v54  ;;  %v4452_v23 = vadd.f32 %v4140_v12, %v1844_v10  ;;  %v1060_v63 = vmul.f32 %v3901_v13, %v4399_v28  ;;  %v1061_v8 = vmul.f32 %v3901_v13, %v4402_v25 }
 0x1f0   : > { %v1042_v26 = vadd.f32 %v1026_v34, %v1008_v56  ;;  %v1879_v39 = vmul.f32 %v4447_v49, %v4447_v49  ;;  %v931_v53 = vadd.f32 %v915_v37, %v878_v1  ;;  %v1043_v0 = vadd.f32 %v1027_v15, %v1009_v18 }
 0x1f1   : > { %v932_v41 = vadd.f32 %v916_v44, %v879_v24  ;;  %v1880_v55 = vmul.f32 %v4452_v23, %v4452_v23  ;;  %v1094_v59 = vmul.f32 %v3914_v38, %v4407_v40  ;;  %v1095_v6 = vmul.f32 %v3914_v38, %v4410_v48 }
 0x1f2   : > { %v1076_v60 = vadd.f32 %v1060_v63, %v1042_v26  ;;  %v1895_v58 = vmul.f32 %v1879_v39, %v4447_v49  ;;  %v940_v20 = vrot.slane %v931_v53, 6  ;;  %v1077_v7 = vadd.f32 %v1061_v8, %v1043_v0 }
 0x1f3   : > { %v948_v13 = vrot.slane %v932_v41, 6  ;;  %v1896_v32 = vmul.f32 %v1880_v55, %v4452_v23  ;;  %v1128_v62 = vmul.f32 %v3925_v17, %v4417_v61  ;;  %v1129_v14 = vmul.f32 %v3925_v17, %v4420_v27 }
 0x1f4   : > { %v1110_v57 = vadd.f32 %v1094_v59, %v1076_v60  ;;  %v1911_v52 = vmul.f32 0.044715, %v1895_v58  ;;  %v1111_v37 = vadd.f32 %v1095_v6, %v1077_v7  ;;  %v1237_v4 = vmul.f32 %v3940_v42, %v4255_v35 }
 0x1f5   : > { %v965_v33 = vsel %vm949_vm1, %v948_v13, %v940_v20  ;;  %v1912_v38 = vmul.f32 0.044715, %v1896_v32  ;;  %v1238_v10 = vmul.f32 %v3940_v42, %v4258_v51  ;;  %v1255_v17 = vmul.f32 %v3950_v2, %v4261_v22 }
 0x1f6   : > { %v990_v44 = vsel %vm966_vm2, %v965_v33, 0.0  ;;  %v1144_v30 = vadd.f32 %v1128_v62, %v1110_v57  ;;  %v1927_v50 = vadd.f32 %v1911_v52, %v4447_v49  ;;  %v1145_v54 = vadd.f32 %v1129_v14, %v1111_v37 }
 0x1f7   : > { %v1928_v56 = vadd.f32 %v1912_v38, %v4452_v23  ;;  %v1256_v34 = vmul.f32 %v3950_v2, %v4268_v31  ;;  %v1289_v1 = vmul.f32 %v3960_v21, %v4399_v28  ;;  %v1271_v26 = vadd.f32 %v1255_v17, %v1237_v4 }
 0x1f8   : > { %v1153_v18 = vrot.slane %v1144_v30, 7  ;;  %v1943_v24 = vmul.f32 0.7978846, %v1927_v50  ;;  %v1161_v15 = vrot.slane %v1145_v54, 7  ;;  %v1290_v63 = vmul.f32 %v3960_v21, %v4402_v25 }
 0x1f9   : > { %v1944_v8 = vmul.f32 0.7978846, %v1928_v56  ;;  %v1272_v42 = vadd.f32 %v1256_v34, %v1238_v10  ;;  %v1323_v39 = vmul.f32 %v3969_v36, %v4407_v40  ;;  %v1324_v53 = vmul.f32 %v3969_v36, %v4410_v48 }
 0x1fa   : > { %2666 = vtanh.f32 %v1943_v24  ;;  %v957_v2 = vsel %vm949_vm1, %v940_v20, %v948_v13  ;;  %v1178_v41 = vsel %vm1162_vm3, %v1161_v15, %v1153_v18  ;;  %v1305_v0 = vadd.f32 %v1289_v1, %v1271_v26  ;;  %v4689_v24 = vld [vmem:[#allocation9_spill] sm:$0xff] }
 0x1fb   : > { %2668 = vtanh.f32 %v1944_v8  ;;  %v1170_v21 = vsel %vm1162_vm3, %v1153_v18, %v1161_v15  ;;  %v1203_v55 = vsel %vm1179_vm4, %v1178_v41, 0.0  ;;  %v1306_v60 = vadd.f32 %v1290_v63, %v1272_v42 }
 0x1fc   : > { %v1219_v59 = vadd.f32 %v1203_v55, %v990_v44  ;;  %v1339_v6 = vadd.f32 %v1323_v39, %v1305_v0  ;;  %v1357_v36 = vmul.f32 %v4683_v43, %v4417_v61  ;;  %v1358_v58 = vmul.f32 %v4683_v43, %v4420_v27 }
 0x1fd   : > { %v1340_v20 = vadd.f32 %v1324_v53, %v1306_v60  ;;  %v1407_v13 = vmul.f32 %v4684_v29, %v4255_v35  ;;  %v1408_v7 = vmul.f32 %v4684_v29, %v4258_v51  ;;  %v1425_v32 = vmul.f32 %v4685_v16, %v4261_v22 }
 0x1fe   : > { %v1373_v57 = vadd.f32 %v1357_v36, %v1339_v6  ;;  %v1426_v62 = vmul.f32 %v4685_v16, %v4268_v31  ;;  %v1459_v14 = vmul.f32 %v4686_v19, %v4399_v28  ;;  %v1460_v43 = vmul.f32 %v4686_v19, %v4402_v25  ;;  %v4688_v16 = vld [vmem:[#allocation8_spill] sm:$0xff] }
 0x1ff   : > { %v1220_v52 = vadd.f32 %v1170_v21, %v957_v2  ;;  %v1374_v33 = vadd.f32 %v1358_v58, %v1340_v20  ;;  %v1441_v37 = vadd.f32 %v1425_v32, %v1407_v13  ;;  %v1493_v38 = vmul.f32 %v4687_v45, %v4407_v40 }
 0x200   : > { %v2667_v29 = vpop.eup %2666  ;;  %v1389_v44 = vadd.f32 %v1373_v57, %v1219_v59  ;;  %v1442_v30 = vadd.f32 %v1426_v62, %v1408_v7  ;;  %v1494_v4 = vmul.f32 %v4687_v45, %v4410_v48  ;;  %v1527_v50 = vmul.f32 %v4688_v16, %v4417_v61 }
 0x201   : > { %v2669_v54 = vpop.eup %2668  ;;  %v1975_v10 = vadd.f32 1.0, %v2667_v29  ;;  %v1475_v17 = vadd.f32 %v1459_v14, %v1441_v37  ;;  %v1528_v19 = vmul.f32 %v4688_v16, %v4420_v27  ;;  %v1636_v56 = vmul.f32 %v4040_v11, %v4255_v35  ;;  %v2114_v37 = vpop.f32.mrf.mxu0 }
 0x202   : > { %v1976_v18 = vadd.f32 1.0, %v2669_v54  ;;  %v1476_v34 = vadd.f32 %v1460_v43, %v1442_v30  ;;  %v1637_v1 = vmul.f32 %v4040_v11, %v4258_v51  ;;  %v1654_v45 = vmul.f32 %v4689_v24, %v4261_v22 }
 0x203   : > { %v1991_v15 = vmul.f32 0.5, %v1975_v10  ;;  %v1509_v26 = vadd.f32 %v1493_v38, %v1475_v17  ;;  %v1655_v63 = vmul.f32 %v4689_v24, %v4268_v31  ;;  %v1688_v8 = vmul.f32 %v4058_v5, %v4399_v28  ;;  %v2124_v38 = vpop.f32.mrf.mxu1 }
 0x204   : > { %v1992_v42 = vmul.f32 0.5, %v1976_v18  ;;  %v1510_v39 = vadd.f32 %v1494_v4, %v1476_v34  ;;  %v1670_v53 = vadd.f32 %v1654_v45, %v1636_v56  ;;  %v1689_v2 = vmul.f32 %v4058_v5, %v4402_v25 }
 0x205   : > { %v2007_v41 = vmul.f32 %v1991_v15, %v4447_v49  ;;  %v1543_v11 = vadd.f32 %v1527_v50, %v1509_v26  ;;  %v1671_v0 = vadd.f32 %v1655_v63, %v1637_v1  ;;  %v1722_v22 = vmul.f32 %v4068_v3, %v4407_v40 }
 0x206   : > { %v2008_v21 = vmul.f32 %v1992_v42, %v4452_v23  ;;  %v1544_v55 = vadd.f32 %v1528_v19, %v1510_v39  ;;  %v1704_v31 = vadd.f32 %v1688_v8, %v1670_v53  ;;  %v1723_v60 = vmul.f32 %v4068_v3, %v4410_v48 }
 0x207   : > { %v2023_v59 = vadd.f32 %v4255_v35, %v2007_v41  ;;  %v1552_v6 = vrot.slane %v1543_v11, 1  ;;  %v1705_v36 = vadd.f32 %v1689_v2, %v1671_v0  ;;  %v1756_v5 = vmul.f32 %v4079_v47, %v4417_v61 }
 0x208   : > { %v2024_v49 = vadd.f32 %v4258_v51, %v2008_v21  ;;  %v1560_v58 = vrot.slane %v1544_v55, 1  ;;  %v1738_v20 = vadd.f32 %v1722_v22, %v1704_v31  ;;  %v1757_v40 = vmul.f32 %v4079_v47, %v4420_v27 }
 0x209   : > { %v1390_v23 = vadd.f32 %v1374_v33, %v1220_v52  ;;  %v1739_v13 = vadd.f32 %v1723_v60, %v1705_v36  ;;  %v4565_v33 = vld [vmem:[%s4640_s6] ss:$0 sm:$0xff]  ;;  %v2116_v56 = vpop.f32.mrf.mxu0 }
 0x20a   : > { %v2034_v7 = vpack.c.bf16 %v2024_v49, %v2023_v59  ;;  %v1569_v3 = vsel %vm1561_vm5, %v1552_v6, %v1560_v58  ;;  %v1577_v35 = vsel %vm1561_vm5, %v1560_v58, %v1552_v6  ;;  %v1772_v48 = vadd.f32 %v1756_v5, %v1738_v20 }
 0x20b   : > { %v1603_v61 = vsel %vm1581_vm6, %v1577_v35, 0.0  ;;  %v1773_v32 = vadd.f32 %v1757_v40, %v1739_v13  ;;  %v1618_v51 = vadd.f32 %v1569_v3, %v1389_v44  ;;  %v2134_v44 = vpop.f32.mrf.mxu2  ;;  %v2115_v30 = vadd.f32 %v4565_v33, %v2114_v37  ;;  %v2126_v18 = vpop.f32.mrf.mxu1 }
 0x20c   : > { %2138 = vmatmul.bf16.gmra.mxu2 %v2034_v7  ;;  %v1781_v57 = vrot.slane %v1772_v48, 2  ;;  %v1619_v62 = vadd.f32 %v1603_v61, %v1390_v23  ;;  %v2125_v46 = vadd.f32 %v4565_v33, %v2124_v38  ;;  %v2135_v4 = vadd.f32 %v4565_v33, %v2134_v44 }
 0x20d   : > { %v1789_v14 = vrot.slane %v1773_v32, 2  ;;  %2155 = vst.msk [vmem:[%s2834_s25] sm:$0xff] %vm2154_vm9, %v2115_v30  ;;  %v2117_v1 = vadd.f32 %v4565_v33, %v2116_v56 }
 0x20e   : > { %2159 = vst.msk [vmem:[%s2834_s25 + $0x20] sm:$0xff] %vm2154_vm9, %v2125_v46 }
 0x20f   : > { %v1798_v47 = vsel %vm1790_vm7, %v1781_v57, %v1789_v14  ;;  %v1806_v27 = vsel %vm1790_vm7, %v1789_v14, %v1781_v57  ;;  %2163 = vst.msk [vmem:[%s2834_s25 + $0x40] sm:$0xff] %vm2154_vm9, %v2135_v4 }
 0x210   : > { %v1832_v43 = vsel %vm1810_vm8, %v1806_v27, 0.0  ;;  %v1847_v52 = vadd.f32 %v1798_v47, %v1618_v51  ;;  %2156 = vst.msk [vmem:[%s2834_s25 + $0x8] sm:$0xff] %vm2154_vm9, %v2117_v1 }
 0x211   : > { %v1848_v29 = vadd.f32 %v1832_v43, %v1619_v62 }
 0x212   : > { %v1867_v9 = vadd.f32 %v4140_v12, %v1847_v52 }
 0x213   : > { %v1868_v16 = vadd.f32 %v4140_v12, %v1848_v29  ;;  %v2127_v12 = vadd.f32 %v4565_v33, %v2126_v18  ;;  %v2136_v24 = vpop.f32.mrf.mxu2 }
 0x214   : > { %v1883_v50 = vmul.f32 %v1867_v9, %v1867_v9  ;;  %v2137_v15 = vadd.f32 %v4565_v33, %v2136_v24 }
 0x215   : > { %v1884_v54 = vmul.f32 %v1868_v16, %v1868_v16  ;;  %2160 = vst.msk [vmem:[%s2834_s25 + $0x28] sm:$0xff] %vm2154_vm9, %v2127_v12 }
 0x216   : > { %v1899_v10 = vmul.f32 %v1883_v50, %v1867_v9  ;;  %2164 = vst.msk [vmem:[%s2834_s25 + $0x48] sm:$0xff] %vm2154_vm9, %v2137_v15 }
 0x217   : > { %v1900_v17 = vmul.f32 %v1884_v54, %v1868_v16 }
 0x218   : > { %v1915_v19 = vmul.f32 0.044715, %v1899_v10 }
 0x219   : > { %v1916_v34 = vmul.f32 0.044715, %v1900_v17 }
 0x21a   : > { %v1931_v45 = vadd.f32 %v1915_v19, %v1867_v9 }
 0x21b   : > { %v1932_v26 = vadd.f32 %v1916_v34, %v1868_v16 }
 0x21c   : > { %v1947_v63 = vmul.f32 0.7978846, %v1931_v45 }
 0x21d   : > { %v1948_v8 = vmul.f32 0.7978846, %v1932_v26 }
 0x21e   : > { %2670 = vtanh.f32 %v1947_v63 }
 0x21f   : > { %2672 = vtanh.f32 %v1948_v8 }
 0x224   : > { %v2671_v42 = vpop.eup %2670 }
 0x225   : > { %v2673_v39 = vpop.eup %2672  ;;  %v1979_v53 = vadd.f32 1.0, %v2671_v42 }
 0x226   : > { %v2144_v2 = vpop.f32.mrf.mxu3  ;;  %v1980_v41 = vadd.f32 1.0, %v2673_v39 }
 0x227   : > { %v2145_v11 = vadd.f32 %v4565_v33, %v2144_v2  ;;  %v1995_v0 = vmul.f32 0.5, %v1979_v53 }
 0x228   : > { %v1996_v22 = vmul.f32 0.5, %v1980_v41 }
 0x229   : > { %2167 = vst.msk [vmem:[%s2834_s25 + $0x60] sm:$0xff] %vm2154_vm9, %v2145_v11  ;;  %v2011_v21 = vmul.f32 %v1995_v0, %v1867_v9 }
 0x22a   : > { %v2012_v55 = vmul.f32 %v1996_v22, %v1868_v16 }
 0x22b   : > { %v2027_v31 = vadd.f32 %v4399_v28, %v2011_v21 }
 0x22c   : > { %v2028_v60 = vadd.f32 %v4402_v25, %v2012_v55 }
 0x22e   : > { %v2146_v59 = vpop.f32.mrf.mxu3  ;;  %v2036_v6 = vpack.c.bf16 %v2028_v60, %v2027_v31 }
 0x22f   : > { %v2147_v36 = vadd.f32 %v4565_v33, %v2146_v59 }
 0x230   : > { %2148 = vmatmul.bf16.gmra.mxu3 %v2036_v6 }
 0x231   : > { %2168 = vst.msk [vmem:[%s2834_s25 + $0x68] sm:$0xff] %vm2154_vm9, %v2147_v36 }
 0x244   : > { %v2119_v5 = vpop.f32.mrf.mxu0 }
 0x245   : > { %v2120_v49 = vadd.f32 %v4565_v33, %v2119_v5 }
 0x247   : > { %2157 = vst.msk [vmem:[%s2834_s25 + $0x10] sm:$0xff] %vm2154_vm9, %v2120_v49 }
 0x24c   : > { %v2121_v40 = vpop.f32.mrf.mxu0 }
 0x24d   : > { %v2122_v13 = vadd.f32 %v4565_v33, %v2121_v40 }
 0x24f   : > { %2158 = vst.msk [vmem:[%s2834_s25 + $0x18] sm:$0xff] %vm2154_vm9, %v2122_v13 }
 0x267   : > { %v2129_v58 = vpop.f32.mrf.mxu1 }
 0x268   : > { %v2130_v28 = vadd.f32 %v4565_v33, %v2129_v58 }
 0x26a   : > { %2161 = vst.msk [vmem:[%s2834_s25 + $0x30] sm:$0xff] %vm2154_vm9, %v2130_v28 }
 0x26f   : > { %v2131_v23 = vpop.f32.mrf.mxu1 }
 0x270   : > { %v2132_v7 = vadd.f32 %v4565_v33, %v2131_v23 }
 0x272   : > { %2162 = vst.msk [vmem:[%s2834_s25 + $0x38] sm:$0xff] %vm2154_vm9, %v2132_v7 }
 0x28f   : > { %v2139_v25 = vpop.f32.mrf.mxu2 }
 0x290   : > { %v2140_v20 = vadd.f32 %v4565_v33, %v2139_v25 }
 0x292   : > { %2165 = vst.msk [vmem:[%s2834_s25 + $0x50] sm:$0xff] %vm2154_vm9, %v2140_v20 }
 0x297   : > { %v2141_v3 = vpop.f32.mrf.mxu2 }
 0x298   : > { %v2142_v35 = vadd.f32 %v4565_v33, %v2141_v3 }
 0x29a   : > { %2166 = vst.msk [vmem:[%s2834_s25 + $0x58] sm:$0xff] %vm2154_vm9, %v2142_v35 }
 0x2b3   : > { %v2149_v48 = vpop.f32.mrf.mxu3 }
 0x2b4   : > { %v2150_v61 = vadd.f32 %v4565_v33, %v2149_v48 }
 0x2b6   : > { %2169 = vst.msk [vmem:[%s2834_s25 + $0x70] sm:$0xff] %vm2154_vm9, %v2150_v61 }
 0x2bb   : > { %v2151_v32 = vpop.f32.mrf.mxu3 }
 0x2bc   : > { %v2152_v51 = vadd.f32 %v4565_v33, %v2151_v32 }
 0x2be   : > { %2170 = vst.msk [vmem:[%s2834_s25 + $0x78] sm:$0xff] %vm2154_vm9, %v2152_v51 }
 0x2bf PF: > { %s17_s28 = sadd.s32 1, %s2744_s28   ;;  %s4690_s24 = smov %s2736_s26 }
 0x2c0   : > { %p14_p13 = scmp.ge.s32.totalorder %s17_s28, 8   ;;  %s4691_s25 = smov %s2740_s27 }
 0x2c1   : > { %s4692_s26 = smov %s4695_s29  ;;  %s4693_s27 = smov %s4699_s30 }
 0x2c2   :  { %16 = sbr.rel (!%p14_p13) target bundleno = 3 (0x3), region = 97 }

</bundles_post_ra>
